<compile_context>
chip_gen: v7x
topology: tpu7x:2x2x1
jax: 0.10.0
libtpu: 0.0.40
codegen_flags: <defaults>
</compile_context>

<pallas_src>
import numpy as np
import jax
import jax.numpy as jnp
from jax.experimental import pallas as pl
from jax.experimental.pallas import tpu as pltpu

# ------------------------- configuration --------------------------------------
B = 2
H_RES, W_RES = 8, 8            # input_resolution
C = 32                         # dim
NUM_HEADS = 4
HEAD_DIM = C // NUM_HEADS
WINDOW_SIZE = 4
SHIFT_SIZE = 0
MLP_RATIO = 4.0
HIDDEN = int(C * MLP_RATIO)    # 128
LAYER_NUM = 0
SCALE = HEAD_DIM ** (-0.5)
N = WINDOW_SIZE * WINDOW_SIZE          # tokens per window (16)
L = H_RES * W_RES                      # tokens per image (64)
NWH = H_RES // WINDOW_SIZE             # window rows  (2)
NWW = W_RES // WINDOW_SIZE             # window cols  (2)
NW = NWH * NWW                         # retained windows per image (4)
WB = B * NW                            # windows in the folded batch (8)
ROWS = B * L                           # folded token rows (128)
EPS = 1e-5                             # torch.nn.LayerNorm default


def _check_pad_mask_is_trivial():
    """Prove (at import time) that for layer_num==0 / shift==0 the padded
    windows are fully discarded by pad_del and the pad_attn_mask of every
    retained window is exactly zero, so skipping the padding is exact."""
    assert LAYER_NUM == 0 and SHIFT_SIZE == 0
    h_pad = H_RES + 4
    img = np.zeros((h_pad, W_RES), np.float32)
    img[0:4, :] = -10.0
    win = img.reshape(h_pad // WINDOW_SIZE, WINDOW_SIZE, NWW, WINDOW_SIZE)
    win = win.transpose(0, 2, 1, 3).reshape(-1, N)
    mask = win[:, None, :] + win[:, :, None]
    mask = np.where(mask != 0.0, -900.0, 0.0)
    n_pad_windows = (h_pad // WINDOW_SIZE - NWH) * NWW      # purely-pad windows
    assert np.all(mask[n_pad_windows:] == 0.0)


_check_pad_mask_is_trivial()


def _build_rel_pos_index():
    coords = np.stack(np.meshgrid(np.arange(WINDOW_SIZE),
                                  np.arange(WINDOW_SIZE), indexing="ij"))
    cf = coords.reshape(2, -1)
    rel = (cf[:, :, None] - cf[:, None, :]).transpose(1, 2, 0).astype(np.int64)
    rel[:, :, 0] += WINDOW_SIZE - 1
    rel[:, :, 1] += WINDOW_SIZE - 1
    rel[:, :, 0] *= 2 * WINDOW_SIZE - 1
    return rel.sum(-1)                                       # (N, N)


REL_POS_INDEX = _build_rel_pos_index()


def _build_window_perm():
    """0/1 permutation matrices: window-major row order <-> original row order.
    Applied inside the kernel via MXU matmuls (P @ x gathers, P^T @ y scatters
    back), matching window_partition / window_reverse + pad_del exactly."""
    idx = np.arange(ROWS).reshape(B, NWH, WINDOW_SIZE, NWW, WINDOW_SIZE)
    idx = idx.transpose(0, 1, 3, 2, 4).reshape(-1)           # (b, wr, wc, r, c)
    p = np.zeros((ROWS, ROWS), np.float32)
    p[np.arange(ROWS), idx] = 1.0
    return p, np.ascontiguousarray(p.T)


# ------------------------- fused block kernel ---------------------------------
def _gelu_erf(x):
    # erf-based GELU (matches torch.nn.GELU default) via Abramowitz-Stegun
    # 7.1.26 (|err| < 1.5e-7).
    z = x * 0.7071067811865476
    az = jnp.abs(z)
    t = 1.0 / (1.0 + 0.3275911 * az)
    poly = ((((1.061405429 * t - 1.453152027) * t + 1.421413741) * t
             - 0.284496736) * t + 0.254829592) * t
    erf_abs = 1.0 - poly * jnp.exp(-az * az)
    erf = jnp.where(z >= 0, erf_abs, -erf_abs)
    return 0.5 * x * (1.0 + erf)


def _swin_block_kernel(x_ref, p_ref, pt_ref, wqkv_ref, wproj_ref, w1_ref,
                       w2_ref, bvec_ref, abias_ref, o_ref):
    x = x_ref[...]                                           # (ROWS, C), original row order

    # ---- window-major row permutation on the MXU ------------------------------
    xw = jnp.dot(p_ref[...], x, preferred_element_type=jnp.float32)

    # packed bias slab: row0 = bqkv(96), row1 = b1m(128), row2 = bproj(32),
    # row3 = b2m(32)   (LN affines + SCALE already folded at param prep)
    bvec = bvec_ref[...]
    b_qkv = bvec[0:1, :3 * C]
    b_fc1 = bvec[1:2, :HIDDEN]
    b_proj = bvec[2:3, :C]
    b_fc2 = bvec[3:4, :C]

    # ---- norm1 (affine folded into wqkv / b_qkv) -------------------------------
    mu = jnp.mean(xw, axis=-1, keepdims=True)
    xc = xw - mu
    var = jnp.mean(xc * xc, axis=-1, keepdims=True)
    xn = xc * jax.lax.rsqrt(var + EPS)

    # ---- window attention ------------------------------------------------------
    # one lane-dense QKV projection for the whole folded batch: (128,32)@(32,96)
    qkv = jnp.dot(xn, wqkv_ref[...],
                  preferred_element_type=jnp.float32) + b_qkv

    heads = []
    for h in range(NUM_HEADS):                               # unrolled (4)
        lo = h * HEAD_DIM
        q = qkv[:, lo:lo + HEAD_DIM].reshape(WB, N, HEAD_DIM)        # SCALE pre-folded
        k = qkv[:, C + lo:C + lo + HEAD_DIM].reshape(WB, N, HEAD_DIM)
        v = qkv[:, 2 * C + lo:2 * C + lo + HEAD_DIM].reshape(WB, N, HEAD_DIM)
        s = jnp.einsum("wqd,wkd->wqk", q, k,
                       preferred_element_type=jnp.float32)   # (WB, N, N)
        s = s + abias_ref[h]                                  # rel-pos bias (pad mask == 0)
        s = s - jnp.max(s, axis=-1, keepdims=True)
        p = jnp.exp(s)
        denom = jnp.sum(p, axis=-1, keepdims=True)
        inv = pl.reciprocal(denom, approx=True)               # EUP slot
        inv = inv * (2.0 - denom * inv)                       # Newton refinement
        p = p * inv
        oh = jnp.einsum("wqk,wkd->wqd", p, v,
                        preferred_element_type=jnp.float32)   # (WB, N, hd)
        heads.append(oh.reshape(ROWS, HEAD_DIM))
    attn = jnp.concatenate(heads, axis=-1)                    # (ROWS, C), in registers

    attn = jnp.dot(attn, wproj_ref[...],
                   preferred_element_type=jnp.float32) + b_proj

    # ---- residual 1 (drop_path = identity) -------------------------------------
    x1 = xw + attn                                            # window order

    # ---- norm2 (affine folded) + MLP + residual 2 -------------------------------
    mu2 = jnp.mean(x1, axis=-1, keepdims=True)
    xc2 = x1 - mu2
    var2 = jnp.mean(xc2 * xc2, axis=-1, keepdims=True)
    x2n = xc2 * jax.lax.rsqrt(var2 + EPS)
    hdn = jnp.dot(x2n, w1_ref[...],
                  preferred_element_type=jnp.float32) + b_fc1
    hdn = _gelu_erf(hdn)
    y = jnp.dot(hdn, w2_ref[...],
                preferred_element_type=jnp.float32) + b_fc2
    outw = x1 + y                                             # window order

    # ---- inverse window permutation + store ------------------------------------
    out = jnp.dot(pt_ref[...], outw, preferred_element_type=jnp.float32)
    o_ref[...] = out.astype(o_ref.dtype)


def _spec(shape):
    zeros = (0,) * len(shape)
    return pl.BlockSpec(shape, lambda i, _z=zeros: _z)


def swin_block_forward(x, kparams):
    Bq, Lq, Cq = x.shape
    assert Bq * Lq == ROWS and Cq == C, "kernel is specialized to (2, 64, 32)"
    xf = x.reshape(Bq * Lq, Cq)                               # free reshape (no copy)

    out = pl.pallas_call(
        _swin_block_kernel,
        out_shape=jax.ShapeDtypeStruct((ROWS, C), x.dtype),
        grid=(1,),                                            # single fused step
        in_specs=[
            _spec((ROWS, C)),                                 # activations
            _spec((ROWS, ROWS)), _spec((ROWS, ROWS)),         # P, P^T
            _spec((C, 3 * C)),                                # qkv weight (folded)
            _spec((C, C)),                                    # proj weight
            _spec((C, HIDDEN)),                               # fc1 weight (folded)
            _spec((HIDDEN, C)),                               # fc2 weight
            _spec((4, 128)),                                  # packed bias slab
            _spec((NUM_HEADS, N, N)),                         # rel-pos bias
        ],
        out_specs=_spec((ROWS, C)),
        compiler_params=pltpu.CompilerParams(
            dimension_semantics=("arbitrary",)),
    )(xf, kparams["P"], kparams["PT"], kparams["wqkv"], kparams["wproj"],
      kparams["w1"], kparams["w2"], kparams["bvec"], kparams["attn_bias"])

    return out.reshape(Bq, Lq, Cq)                            # free reshape


# ------------------------- parameter preparation ------------------------------
def precompute_attn_bias(rpb_table):
    idx = jnp.asarray(REL_POS_INDEX.reshape(-1))
    bias = rpb_table[idx].reshape(N, N, NUM_HEADS)
    return jnp.transpose(bias, (2, 0, 1)).astype(jnp.float32)  # (H, N, N)


def prepare_kernel_params(params):
    """One-time parameter transform (runs once at load time, not per forward):
    folds LayerNorm affines and the attention scale into the linear weights,
    packs bias vectors, and precomputes the relative-position bias and the
    window permutation matrices."""
    f32 = jnp.float32
    # norm1 affine -> qkv
    wqkv = params["wqkv"] * params["g1"][:, None]
    bqkv = params["bqkv"] + params["b1"] @ params["wqkv"]
    # attention scale -> Q columns
    wqkv = wqkv.at[:, :C].multiply(SCALE)
    bqkv = bqkv.at[:C].multiply(SCALE)
    # norm2 affine -> fc1
    w1 = params["w1"] * params["g2"][:, None]
    b1m = params["b1m"] + params["b2"] @ params["w1"]
    # packed bias slab (4, 128)
    bvec = jnp.zeros((4, 128), f32)
    bvec = bvec.at[0, :3 * C].set(bqkv)
    bvec = bvec.at[1, :HIDDEN].set(b1m)
    bvec = bvec.at[2, :C].set(params["bproj"])
    bvec = bvec.at[3, :C].set(params["b2m"])
    p_np, pt_np = _build_window_perm()
    return {
        "P": jnp.asarray(p_np), "PT": jnp.asarray(pt_np),
        "wqkv": wqkv.astype(f32), "wproj": params["wproj"].astype(f32),
        "w1": w1.astype(f32), "w2": params["w2"].astype(f32),
        "bvec": bvec, "attn_bias": precompute_attn_bias(params["rpb_table"]),
    }


def make_params(key):
    ks = jax.random.split(key, 9)
    f32 = jnp.float32
    rpb_table = 0.02 * jax.random.normal(
        ks[4], ((2 * WINDOW_SIZE - 1) ** 2, NUM_HEADS), f32)
    return {
        # norm1
        "g1": jnp.ones((C,), f32), "b1": jnp.zeros((C,), f32),
        # WindowAttention (weights stored as (in, out): y = x @ W + b)
        "wqkv": 0.05 * jax.random.normal(ks[0], (C, 3 * C), f32),
        "bqkv": 0.02 * jax.random.normal(ks[1], (3 * C,), f32),
        "wproj": 0.05 * jax.random.normal(ks[2], (C, C), f32),
        "bproj": 0.02 * jax.random.normal(ks[3], (C,), f32),
        "rpb_table": rpb_table,
        # norm2 + Mlp
        "g2": jnp.ones((C,), f32), "b2": jnp.zeros((C,), f32),
        "w1": 0.05 * jax.random.normal(ks[5], (C, HIDDEN), f32),
        "b1m": 0.02 * jax.random.normal(ks[6], (HIDDEN,), f32),
        "w2": 0.05 * jax.random.normal(ks[7], (HIDDEN, C), f32),
        "b2m": 0.02 * jax.random.normal(ks[8], (C,), f32),
    }


if __name__ == "__main__":
    key = jax.random.PRNGKey(0)
    kparam_key, kx = jax.random.split(key)
    params = make_params(kparam_key)
    kernel_params = prepare_kernel_params(params)   # one-time weight prep
    x = jax.random.normal(kx, (B, L, C), jnp.float32)

    fwd = jax.jit(swin_block_forward)
    out = fwd(x, kernel_params)
    jax.block_until_ready(out)

    assert out.shape == (B, L, C), out.shape
    assert bool(jnp.all(jnp.isfinite(out)))
    print("KERNEL_OK")
</pallas_src>

<mosaic_0001>
module attributes {stable_mosaic.version = 11 : i64} {
  func.func @_swin_block_kernel(%arg0: i32, %arg1: memref<128x32xf32, #tpu.memory_space<vmem>>, %arg2: memref<128x128xf32, #tpu.memory_space<vmem>>, %arg3: memref<128x128xf32, #tpu.memory_space<vmem>>, %arg4: memref<32x96xf32, #tpu.memory_space<vmem>>, %arg5: memref<32x32xf32, #tpu.memory_space<vmem>>, %arg6: memref<32x128xf32, #tpu.memory_space<vmem>>, %arg7: memref<128x32xf32, #tpu.memory_space<vmem>>, %arg8: memref<4x128xf32, #tpu.memory_space<vmem>>, %arg9: memref<4x16x16xf32, #tpu.memory_space<vmem>>, %arg10: memref<128x32xf32, #tpu.memory_space<vmem>>) attributes {dimension_semantics = [#tpu.dimension_semantics<arbitrary>], iteration_bounds = array<i64: 1>, scalar_prefetch = 0 : i64, scratch_operands = 0 : i64, tpu.core_type = #tpu.core_type<tc>, window_params = [{pipeline_mode = #tpu.pipeline_mode<synchronous>, transform_indices = @transform_0, window_bounds = array<i64: 128, 32>}, {pipeline_mode = #tpu.pipeline_mode<synchronous>, transform_indices = @transform_1, window_bounds = array<i64: 128, 128>}, {pipeline_mode = #tpu.pipeline_mode<synchronous>, transform_indices = @transform_2, window_bounds = array<i64: 128, 128>}, {pipeline_mode = #tpu.pipeline_mode<synchronous>, transform_indices = @transform_3, window_bounds = array<i64: 32, 96>}, {pipeline_mode = #tpu.pipeline_mode<synchronous>, transform_indices = @transform_4, window_bounds = array<i64: 32, 32>}, {pipeline_mode = #tpu.pipeline_mode<synchronous>, transform_indices = @transform_5, window_bounds = array<i64: 32, 128>}, {pipeline_mode = #tpu.pipeline_mode<synchronous>, transform_indices = @transform_6, window_bounds = array<i64: 128, 32>}, {pipeline_mode = #tpu.pipeline_mode<synchronous>, transform_indices = @transform_7, window_bounds = array<i64: 4, 128>}, {pipeline_mode = #tpu.pipeline_mode<synchronous>, transform_indices = @transform_8, window_bounds = array<i64: 4, 16, 16>}, {pipeline_mode = #tpu.pipeline_mode<synchronous>, transform_indices = @transform_9, window_bounds = array<i64: 128, 32>}]} {
    %c0 = arith.constant 0 : index
    %c0_0 = arith.constant 0 : index
    %0 = vector.load %arg1[%c0, %c0_0] : memref<128x32xf32, #tpu.memory_space<vmem>>, vector<128x32xf32>
    %c0_1 = arith.constant 0 : index
    %c0_2 = arith.constant 0 : index
    %1 = vector.load %arg2[%c0_1, %c0_2] : memref<128x128xf32, #tpu.memory_space<vmem>>, vector<128x128xf32>
    %cst = arith.constant dense<0.000000e+00> : vector<128x32xf32>
    %2 = tpu.matmul %1, %0, %cst {dimension_numbers = #tpu.dot_dimension_numbers<[1], [0], [0], [1], [0, 0, 1, 1], [], []>} : vector<128x128xf32>, vector<128x32xf32>, vector<128x32xf32> -> vector<128x32xf32>
    %c0_3 = arith.constant 0 : index
    %c0_4 = arith.constant 0 : index
    %3 = vector.load %arg8[%c0_3, %c0_4] : memref<4x128xf32, #tpu.memory_space<vmem>>, vector<4x128xf32>
    %4 = vector.extract_strided_slice %3 {offsets = [0, 0], sizes = [1, 96], strides = [1, 1]} : vector<4x128xf32> to vector<1x96xf32>
    %5 = vector.extract_strided_slice %3 {offsets = [1, 0], sizes = [1, 128], strides = [1, 1]} : vector<4x128xf32> to vector<1x128xf32>
    %6 = vector.extract_strided_slice %3 {offsets = [2, 0], sizes = [1, 32], strides = [1, 1]} : vector<4x128xf32> to vector<1x32xf32>
    %7 = vector.extract_strided_slice %3 {offsets = [3, 0], sizes = [1, 32], strides = [1, 1]} : vector<4x128xf32> to vector<1x32xf32>
    %cst_5 = arith.constant dense<0.000000e+00> : vector<128xf32>
    %8 = vector.multi_reduction <add>, %2, %cst_5 [1] : vector<128x32xf32> to vector<128xf32>
    %9 = vector.shape_cast %8 : vector<128xf32> to vector<128x1xf32>
    %cst_6 = arith.constant 3.200000e+01 : f32
    %10 = vector.broadcast %cst_6 : f32 to vector<128x1xf32>
    %11 = arith.divf %9, %10 : vector<128x1xf32>
    %12 = vector.broadcast %11 : vector<128x1xf32> to vector<128x32xf32>
    %13 = arith.subf %2, %12 : vector<128x32xf32>
    %14 = arith.mulf %13, %13 : vector<128x32xf32>
    %cst_7 = arith.constant dense<0.000000e+00> : vector<128xf32>
    %15 = vector.multi_reduction <add>, %14, %cst_7 [1] : vector<128x32xf32> to vector<128xf32>
    %16 = vector.shape_cast %15 : vector<128xf32> to vector<128x1xf32>
    %cst_8 = arith.constant 3.200000e+01 : f32
    %17 = vector.broadcast %cst_8 : f32 to vector<128x1xf32>
    %18 = arith.divf %16, %17 : vector<128x1xf32>
    %cst_9 = arith.constant 9.99999974E-6 : f32
    %19 = vector.broadcast %cst_9 : f32 to vector<128x1xf32>
    %20 = arith.addf %18, %19 : vector<128x1xf32>
    %21 = math.rsqrt %20 : vector<128x1xf32>
    %22 = vector.broadcast %21 : vector<128x1xf32> to vector<128x32xf32>
    %23 = arith.mulf %13, %22 : vector<128x32xf32>
    %c0_10 = arith.constant 0 : index
    %c0_11 = arith.constant 0 : index
    %24 = vector.load %arg4[%c0_10, %c0_11] : memref<32x96xf32, #tpu.memory_space<vmem>>, vector<32x96xf32>
    %cst_12 = arith.constant dense<0.000000e+00> : vector<128x96xf32>
    %25 = tpu.matmul %23, %24, %cst_12 {dimension_numbers = #tpu.dot_dimension_numbers<[1], [0], [0], [1], [0, 0, 1, 1], [], []>} : vector<128x32xf32>, vector<32x96xf32>, vector<128x96xf32> -> vector<128x96xf32>
    %26 = vector.broadcast %4 : vector<1x96xf32> to vector<128x96xf32>
    %27 = arith.addf %25, %26 : vector<128x96xf32>
    %28 = vector.extract_strided_slice %27 {offsets = [0, 0], sizes = [128, 8], strides = [1, 1]} : vector<128x96xf32> to vector<128x8xf32>
    %29 = vector.shape_cast %28 : vector<128x8xf32> to vector<8x16x8xf32>
    %30 = vector.extract_strided_slice %27 {offsets = [0, 32], sizes = [128, 8], strides = [1, 1]} : vector<128x96xf32> to vector<128x8xf32>
    %31 = vector.shape_cast %30 : vector<128x8xf32> to vector<8x16x8xf32>
    %32 = vector.extract_strided_slice %27 {offsets = [0, 64], sizes = [128, 8], strides = [1, 1]} : vector<128x96xf32> to vector<128x8xf32>
    %33 = vector.shape_cast %32 : vector<128x8xf32> to vector<8x16x8xf32>
    "tpu.trace_start"() <{level = 10 : i32, message = "wqd,wkd->wqk"}> : () -> ()
    %cst_13 = arith.constant dense<0.000000e+00> : vector<8x16x16xf32>
    %34 = tpu.matmul %29, %31, %cst_13 {dimension_numbers = #tpu.dot_dimension_numbers<[2], [2], [1], [1], [0, 0, 0, 1, 1, 1], [0], [0]>} : vector<8x16x8xf32>, vector<8x16x8xf32>, vector<8x16x16xf32> -> vector<8x16x16xf32>
    "tpu.trace_stop"() : () -> ()
    %c0_14 = arith.constant 0 : index
    %c0_15 = arith.constant 0 : index
    %c0_16 = arith.constant 0 : index
    %35 = vector.load %arg9[%c0_14, %c0_15, %c0_16] : memref<4x16x16xf32, #tpu.memory_space<vmem>>, vector<1x16x16xf32>
    %36 = vector.shape_cast %35 : vector<1x16x16xf32> to vector<16x16xf32>
    %37 = vector.shape_cast %36 : vector<16x16xf32> to vector<1x16x16xf32>
    %38 = vector.broadcast %37 : vector<1x16x16xf32> to vector<8x16x16xf32>
    %39 = arith.addf %34, %38 : vector<8x16x16xf32>
    %cst_17 = arith.constant dense<0xFF800000> : vector<8x16xf32>
    %40 = vector.multi_reduction <maximumf>, %39, %cst_17 [2] : vector<8x16x16xf32> to vector<8x16xf32>
    %41 = vector.shape_cast %40 : vector<8x16xf32> to vector<8x16x1xf32>
    %42 = vector.broadcast %41 : vector<8x16x1xf32> to vector<8x16x16xf32>
    %43 = arith.subf %39, %42 : vector<8x16x16xf32>
    %44 = math.exp %43 : vector<8x16x16xf32>
    %cst_18 = arith.constant dense<0.000000e+00> : vector<8x16xf32>
    %45 = vector.multi_reduction <add>, %44, %cst_18 [2] : vector<8x16x16xf32> to vector<8x16xf32>
    %46 = vector.shape_cast %45 : vector<8x16xf32> to vector<8x16x1xf32>
    %47 = tpu.reciprocal %46 {approx = true} : vector<8x16x1xf32> -> vector<8x16x1xf32>
    %48 = arith.mulf %46, %47 : vector<8x16x1xf32>
    %cst_19 = arith.constant 2.000000e+00 : f32
    %49 = vector.broadcast %cst_19 : f32 to vector<8x16x1xf32>
    %50 = arith.subf %49, %48 : vector<8x16x1xf32>
    %51 = arith.mulf %47, %50 : vector<8x16x1xf32>
    %52 = vector.broadcast %51 : vector<8x16x1xf32> to vector<8x16x16xf32>
    %53 = arith.mulf %44, %52 : vector<8x16x16xf32>
    "tpu.trace_start"() <{level = 10 : i32, message = "wqk,wkd->wqd"}> : () -> ()
    %cst_20 = arith.constant dense<0.000000e+00> : vector<8x16x8xf32>
    %54 = tpu.matmul %53, %33, %cst_20 {dimension_numbers = #tpu.dot_dimension_numbers<[2], [1], [1], [2], [0, 0, 0, 1, 1, 2], [0], [0]>} : vector<8x16x16xf32>, vector<8x16x8xf32>, vector<8x16x8xf32> -> vector<8x16x8xf32>
    "tpu.trace_stop"() : () -> ()
    %55 = vector.shape_cast %54 : vector<8x16x8xf32> to vector<128x8xf32>
    %56 = vector.extract_strided_slice %27 {offsets = [0, 8], sizes = [128, 8], strides = [1, 1]} : vector<128x96xf32> to vector<128x8xf32>
    %57 = vector.shape_cast %56 : vector<128x8xf32> to vector<8x16x8xf32>
    %58 = vector.extract_strided_slice %27 {offsets = [0, 40], sizes = [128, 8], strides = [1, 1]} : vector<128x96xf32> to vector<128x8xf32>
    %59 = vector.shape_cast %58 : vector<128x8xf32> to vector<8x16x8xf32>
    %60 = vector.extract_strided_slice %27 {offsets = [0, 72], sizes = [128, 8], strides = [1, 1]} : vector<128x96xf32> to vector<128x8xf32>
    %61 = vector.shape_cast %60 : vector<128x8xf32> to vector<8x16x8xf32>
    "tpu.trace_start"() <{level = 10 : i32, message = "wqd,wkd->wqk"}> : () -> ()
    %cst_21 = arith.constant dense<0.000000e+00> : vector<8x16x16xf32>
    %62 = tpu.matmul %57, %59, %cst_21 {dimension_numbers = #tpu.dot_dimension_numbers<[2], [2], [1], [1], [0, 0, 0, 1, 1, 1], [0], [0]>} : vector<8x16x8xf32>, vector<8x16x8xf32>, vector<8x16x16xf32> -> vector<8x16x16xf32>
    "tpu.trace_stop"() : () -> ()
    %c1 = arith.constant 1 : index
    %c0_22 = arith.constant 0 : index
    %c0_23 = arith.constant 0 : index
    %63 = vector.load %arg9[%c1, %c0_22, %c0_23] : memref<4x16x16xf32, #tpu.memory_space<vmem>>, vector<1x16x16xf32>
    %64 = vector.shape_cast %63 : vector<1x16x16xf32> to vector<16x16xf32>
    %65 = vector.shape_cast %64 : vector<16x16xf32> to vector<1x16x16xf32>
    %66 = vector.broadcast %65 : vector<1x16x16xf32> to vector<8x16x16xf32>
    %67 = arith.addf %62, %66 : vector<8x16x16xf32>
    %cst_24 = arith.constant dense<0xFF800000> : vector<8x16xf32>
    %68 = vector.multi_reduction <maximumf>, %67, %cst_24 [2] : vector<8x16x16xf32> to vector<8x16xf32>
    %69 = vector.shape_cast %68 : vector<8x16xf32> to vector<8x16x1xf32>
    %70 = vector.broadcast %69 : vector<8x16x1xf32> to vector<8x16x16xf32>
    %71 = arith.subf %67, %70 : vector<8x16x16xf32>
    %72 = math.exp %71 : vector<8x16x16xf32>
    %cst_25 = arith.constant dense<0.000000e+00> : vector<8x16xf32>
    %73 = vector.multi_reduction <add>, %72, %cst_25 [2] : vector<8x16x16xf32> to vector<8x16xf32>
    %74 = vector.shape_cast %73 : vector<8x16xf32> to vector<8x16x1xf32>
    %75 = tpu.reciprocal %74 {approx = true} : vector<8x16x1xf32> -> vector<8x16x1xf32>
    %76 = arith.mulf %74, %75 : vector<8x16x1xf32>
    %cst_26 = arith.constant 2.000000e+00 : f32
    %77 = vector.broadcast %cst_26 : f32 to vector<8x16x1xf32>
    %78 = arith.subf %77, %76 : vector<8x16x1xf32>
    %79 = arith.mulf %75, %78 : vector<8x16x1xf32>
    %80 = vector.broadcast %79 : vector<8x16x1xf32> to vector<8x16x16xf32>
    %81 = arith.mulf %72, %80 : vector<8x16x16xf32>
    "tpu.trace_start"() <{level = 10 : i32, message = "wqk,wkd->wqd"}> : () -> ()
    %cst_27 = arith.constant dense<0.000000e+00> : vector<8x16x8xf32>
    %82 = tpu.matmul %81, %61, %cst_27 {dimension_numbers = #tpu.dot_dimension_numbers<[2], [1], [1], [2], [0, 0, 0, 1, 1, 2], [0], [0]>} : vector<8x16x16xf32>, vector<8x16x8xf32>, vector<8x16x8xf32> -> vector<8x16x8xf32>
    "tpu.trace_stop"() : () -> ()
    %83 = vector.shape_cast %82 : vector<8x16x8xf32> to vector<128x8xf32>
    %84 = vector.extract_strided_slice %27 {offsets = [0, 16], sizes = [128, 8], strides = [1, 1]} : vector<128x96xf32> to vector<128x8xf32>
    %85 = vector.shape_cast %84 : vector<128x8xf32> to vector<8x16x8xf32>
    %86 = vector.extract_strided_slice %27 {offsets = [0, 48], sizes = [128, 8], strides = [1, 1]} : vector<128x96xf32> to vector<128x8xf32>
    %87 = vector.shape_cast %86 : vector<128x8xf32> to vector<8x16x8xf32>
    %88 = vector.extract_strided_slice %27 {offsets = [0, 80], sizes = [128, 8], strides = [1, 1]} : vector<128x96xf32> to vector<128x8xf32>
    %89 = vector.shape_cast %88 : vector<128x8xf32> to vector<8x16x8xf32>
    "tpu.trace_start"() <{level = 10 : i32, message = "wqd,wkd->wqk"}> : () -> ()
    %cst_28 = arith.constant dense<0.000000e+00> : vector<8x16x16xf32>
    %90 = tpu.matmul %85, %87, %cst_28 {dimension_numbers = #tpu.dot_dimension_numbers<[2], [2], [1], [1], [0, 0, 0, 1, 1, 1], [0], [0]>} : vector<8x16x8xf32>, vector<8x16x8xf32>, vector<8x16x16xf32> -> vector<8x16x16xf32>
    "tpu.trace_stop"() : () -> ()
    %c2 = arith.constant 2 : index
    %c0_29 = arith.constant 0 : index
    %c0_30 = arith.constant 0 : index
    %91 = vector.load %arg9[%c2, %c0_29, %c0_30] : memref<4x16x16xf32, #tpu.memory_space<vmem>>, vector<1x16x16xf32>
    %92 = vector.shape_cast %91 : vector<1x16x16xf32> to vector<16x16xf32>
    %93 = vector.shape_cast %92 : vector<16x16xf32> to vector<1x16x16xf32>
    %94 = vector.broadcast %93 : vector<1x16x16xf32> to vector<8x16x16xf32>
    %95 = arith.addf %90, %94 : vector<8x16x16xf32>
    %cst_31 = arith.constant dense<0xFF800000> : vector<8x16xf32>
    %96 = vector.multi_reduction <maximumf>, %95, %cst_31 [2] : vector<8x16x16xf32> to vector<8x16xf32>
    %97 = vector.shape_cast %96 : vector<8x16xf32> to vector<8x16x1xf32>
    %98 = vector.broadcast %97 : vector<8x16x1xf32> to vector<8x16x16xf32>
    %99 = arith.subf %95, %98 : vector<8x16x16xf32>
    %100 = math.exp %99 : vector<8x16x16xf32>
    %cst_32 = arith.constant dense<0.000000e+00> : vector<8x16xf32>
    %101 = vector.multi_reduction <add>, %100, %cst_32 [2] : vector<8x16x16xf32> to vector<8x16xf32>
    %102 = vector.shape_cast %101 : vector<8x16xf32> to vector<8x16x1xf32>
    %103 = tpu.reciprocal %102 {approx = true} : vector<8x16x1xf32> -> vector<8x16x1xf32>
    %104 = arith.mulf %102, %103 : vector<8x16x1xf32>
    %cst_33 = arith.constant 2.000000e+00 : f32
    %105 = vector.broadcast %cst_33 : f32 to vector<8x16x1xf32>
    %106 = arith.subf %105, %104 : vector<8x16x1xf32>
    %107 = arith.mulf %103, %106 : vector<8x16x1xf32>
    %108 = vector.broadcast %107 : vector<8x16x1xf32> to vector<8x16x16xf32>
    %109 = arith.mulf %100, %108 : vector<8x16x16xf32>
    "tpu.trace_start"() <{level = 10 : i32, message = "wqk,wkd->wqd"}> : () -> ()
    %cst_34 = arith.constant dense<0.000000e+00> : vector<8x16x8xf32>
    %110 = tpu.matmul %109, %89, %cst_34 {dimension_numbers = #tpu.dot_dimension_numbers<[2], [1], [1], [2], [0, 0, 0, 1, 1, 2], [0], [0]>} : vector<8x16x16xf32>, vector<8x16x8xf32>, vector<8x16x8xf32> -> vector<8x16x8xf32>
    "tpu.trace_stop"() : () -> ()
    %111 = vector.shape_cast %110 : vector<8x16x8xf32> to vector<128x8xf32>
    %112 = vector.extract_strided_slice %27 {offsets = [0, 24], sizes = [128, 8], strides = [1, 1]} : vector<128x96xf32> to vector<128x8xf32>
    %113 = vector.shape_cast %112 : vector<128x8xf32> to vector<8x16x8xf32>
    %114 = vector.extract_strided_slice %27 {offsets = [0, 56], sizes = [128, 8], strides = [1, 1]} : vector<128x96xf32> to vector<128x8xf32>
    %115 = vector.shape_cast %114 : vector<128x8xf32> to vector<8x16x8xf32>
    %116 = vector.extract_strided_slice %27 {offsets = [0, 88], sizes = [128, 8], strides = [1, 1]} : vector<128x96xf32> to vector<128x8xf32>
    %117 = vector.shape_cast %116 : vector<128x8xf32> to vector<8x16x8xf32>
    "tpu.trace_start"() <{level = 10 : i32, message = "wqd,wkd->wqk"}> : () -> ()
    %cst_35 = arith.constant dense<0.000000e+00> : vector<8x16x16xf32>
    %118 = tpu.matmul %113, %115, %cst_35 {dimension_numbers = #tpu.dot_dimension_numbers<[2], [2], [1], [1], [0, 0, 0, 1, 1, 1], [0], [0]>} : vector<8x16x8xf32>, vector<8x16x8xf32>, vector<8x16x16xf32> -> vector<8x16x16xf32>
    "tpu.trace_stop"() : () -> ()
    %c3 = arith.constant 3 : index
    %c0_36 = arith.constant 0 : index
    %c0_37 = arith.constant 0 : index
    %119 = vector.load %arg9[%c3, %c0_36, %c0_37] : memref<4x16x16xf32, #tpu.memory_space<vmem>>, vector<1x16x16xf32>
    %120 = vector.shape_cast %119 : vector<1x16x16xf32> to vector<16x16xf32>
    %121 = vector.shape_cast %120 : vector<16x16xf32> to vector<1x16x16xf32>
    %122 = vector.broadcast %121 : vector<1x16x16xf32> to vector<8x16x16xf32>
    %123 = arith.addf %118, %122 : vector<8x16x16xf32>
    %cst_38 = arith.constant dense<0xFF800000> : vector<8x16xf32>
    %124 = vector.multi_reduction <maximumf>, %123, %cst_38 [2] : vector<8x16x16xf32> to vector<8x16xf32>
    %125 = vector.shape_cast %124 : vector<8x16xf32> to vector<8x16x1xf32>
    %126 = vector.broadcast %125 : vector<8x16x1xf32> to vector<8x16x16xf32>
    %127 = arith.subf %123, %126 : vector<8x16x16xf32>
    %128 = math.exp %127 : vector<8x16x16xf32>
    %cst_39 = arith.constant dense<0.000000e+00> : vector<8x16xf32>
    %129 = vector.multi_reduction <add>, %128, %cst_39 [2] : vector<8x16x16xf32> to vector<8x16xf32>
    %130 = vector.shape_cast %129 : vector<8x16xf32> to vector<8x16x1xf32>
    %131 = tpu.reciprocal %130 {approx = true} : vector<8x16x1xf32> -> vector<8x16x1xf32>
    %132 = arith.mulf %130, %131 : vector<8x16x1xf32>
    %cst_40 = arith.constant 2.000000e+00 : f32
    %133 = vector.broadcast %cst_40 : f32 to vector<8x16x1xf32>
    %134 = arith.subf %133, %132 : vector<8x16x1xf32>
    %135 = arith.mulf %131, %134 : vector<8x16x1xf32>
    %136 = vector.broadcast %135 : vector<8x16x1xf32> to vector<8x16x16xf32>
    %137 = arith.mulf %128, %136 : vector<8x16x16xf32>
    "tpu.trace_start"() <{level = 10 : i32, message = "wqk,wkd->wqd"}> : () -> ()
    %cst_41 = arith.constant dense<0.000000e+00> : vector<8x16x8xf32>
    %138 = tpu.matmul %137, %117, %cst_41 {dimension_numbers = #tpu.dot_dimension_numbers<[2], [1], [1], [2], [0, 0, 0, 1, 1, 2], [0], [0]>} : vector<8x16x16xf32>, vector<8x16x8xf32>, vector<8x16x8xf32> -> vector<8x16x8xf32>
    "tpu.trace_stop"() : () -> ()
    %139 = vector.shape_cast %138 : vector<8x16x8xf32> to vector<128x8xf32>
    %140 = tpu.concatenate %55, %83, %111, %139 in 1 : vector<128x8xf32>, vector<128x8xf32>, vector<128x8xf32>, vector<128x8xf32> -> vector<128x32xf32>
    %c0_42 = arith.constant 0 : index
    %c0_43 = arith.constant 0 : index
    %141 = vector.load %arg5[%c0_42, %c0_43] : memref<32x32xf32, #tpu.memory_space<vmem>>, vector<32x32xf32>
    %cst_44 = arith.constant dense<0.000000e+00> : vector<128x32xf32>
    %142 = tpu.matmul %140, %141, %cst_44 {dimension_numbers = #tpu.dot_dimension_numbers<[1], [0], [0], [1], [0, 0, 1, 1], [], []>} : vector<128x32xf32>, vector<32x32xf32>, vector<128x32xf32> -> vector<128x32xf32>
    %143 = vector.broadcast %6 : vector<1x32xf32> to vector<128x32xf32>
    %144 = arith.addf %142, %143 : vector<128x32xf32>
    %145 = arith.addf %2, %144 : vector<128x32xf32>
    %cst_45 = arith.constant dense<0.000000e+00> : vector<128xf32>
    %146 = vector.multi_reduction <add>, %145, %cst_45 [1] : vector<128x32xf32> to vector<128xf32>
    %147 = vector.shape_cast %146 : vector<128xf32> to vector<128x1xf32>
    %cst_46 = arith.constant 3.200000e+01 : f32
    %148 = vector.broadcast %cst_46 : f32 to vector<128x1xf32>
    %149 = arith.divf %147, %148 : vector<128x1xf32>
    %150 = vector.broadcast %149 : vector<128x1xf32> to vector<128x32xf32>
    %151 = arith.subf %145, %150 : vector<128x32xf32>
    %152 = arith.mulf %151, %151 : vector<128x32xf32>
    %cst_47 = arith.constant dense<0.000000e+00> : vector<128xf32>
    %153 = vector.multi_reduction <add>, %152, %cst_47 [1] : vector<128x32xf32> to vector<128xf32>
    %154 = vector.shape_cast %153 : vector<128xf32> to vector<128x1xf32>
    %cst_48 = arith.constant 3.200000e+01 : f32
    %155 = vector.broadcast %cst_48 : f32 to vector<128x1xf32>
    %156 = arith.divf %154, %155 : vector<128x1xf32>
    %cst_49 = arith.constant 9.99999974E-6 : f32
    %157 = vector.broadcast %cst_49 : f32 to vector<128x1xf32>
    %158 = arith.addf %156, %157 : vector<128x1xf32>
    %159 = math.rsqrt %158 : vector<128x1xf32>
    %160 = vector.broadcast %159 : vector<128x1xf32> to vector<128x32xf32>
    %161 = arith.mulf %151, %160 : vector<128x32xf32>
    %c0_50 = arith.constant 0 : index
    %c0_51 = arith.constant 0 : index
    %162 = vector.load %arg6[%c0_50, %c0_51] : memref<32x128xf32, #tpu.memory_space<vmem>>, vector<32x128xf32>
    %cst_52 = arith.constant dense<0.000000e+00> : vector<128x128xf32>
    %163 = tpu.matmul %161, %162, %cst_52 {dimension_numbers = #tpu.dot_dimension_numbers<[1], [0], [0], [1], [0, 0, 1, 1], [], []>} : vector<128x32xf32>, vector<32x128xf32>, vector<128x128xf32> -> vector<128x128xf32>
    %164 = vector.broadcast %5 : vector<1x128xf32> to vector<128x128xf32>
    %165 = arith.addf %163, %164 : vector<128x128xf32>
    %cst_53 = arith.constant 0.707106769 : f32
    %166 = vector.broadcast %cst_53 : f32 to vector<128x128xf32>
    %167 = arith.mulf %165, %166 : vector<128x128xf32>
    %168 = math.absf %167 : vector<128x128xf32>
    %cst_54 = arith.constant 0.327591091 : f32
    %169 = vector.broadcast %cst_54 : f32 to vector<128x128xf32>
    %170 = arith.mulf %169, %168 : vector<128x128xf32>
    %cst_55 = arith.constant 1.000000e+00 : f32
    %171 = vector.broadcast %cst_55 : f32 to vector<128x128xf32>
    %172 = arith.addf %171, %170 : vector<128x128xf32>
    %cst_56 = arith.constant 1.000000e+00 : f32
    %173 = vector.broadcast %cst_56 : f32 to vector<128x128xf32>
    %174 = arith.divf %173, %172 : vector<128x128xf32>
    %cst_57 = arith.constant 1.06140542 : f32
    %175 = vector.broadcast %cst_57 : f32 to vector<128x128xf32>
    %176 = arith.mulf %175, %174 : vector<128x128xf32>
    %cst_58 = arith.constant 1.45315206 : f32
    %177 = vector.broadcast %cst_58 : f32 to vector<128x128xf32>
    %178 = arith.subf %176, %177 : vector<128x128xf32>
    %179 = arith.mulf %178, %174 : vector<128x128xf32>
    %cst_59 = arith.constant 1.42141378 : f32
    %180 = vector.broadcast %cst_59 : f32 to vector<128x128xf32>
    %181 = arith.addf %179, %180 : vector<128x128xf32>
    %182 = arith.mulf %181, %174 : vector<128x128xf32>
    %cst_60 = arith.constant 0.284496725 : f32
    %183 = vector.broadcast %cst_60 : f32 to vector<128x128xf32>
    %184 = arith.subf %182, %183 : vector<128x128xf32>
    %185 = arith.mulf %184, %174 : vector<128x128xf32>
    %cst_61 = arith.constant 0.254829586 : f32
    %186 = vector.broadcast %cst_61 : f32 to vector<128x128xf32>
    %187 = arith.addf %185, %186 : vector<128x128xf32>
    %188 = arith.mulf %187, %174 : vector<128x128xf32>
    %cst_62 = arith.constant 0.000000e+00 : f32
    %189 = vector.broadcast %cst_62 : f32 to vector<128x128xf32>
    %190 = arith.subf %189, %168 : vector<128x128xf32>
    %191 = arith.mulf %190, %168 : vector<128x128xf32>
    %192 = math.exp %191 : vector<128x128xf32>
    %193 = arith.mulf %188, %192 : vector<128x128xf32>
    %cst_63 = arith.constant 1.000000e+00 : f32
    %194 = vector.broadcast %cst_63 : f32 to vector<128x128xf32>
    %195 = arith.subf %194, %193 : vector<128x128xf32>
    %cst_64 = arith.constant 0.000000e+00 : f32
    %196 = vector.broadcast %cst_64 : f32 to vector<128x128xf32>
    %197 = arith.cmpf oge, %167, %196 : vector<128x128xf32>
    %cst_65 = arith.constant 0.000000e+00 : f32
    %198 = vector.broadcast %cst_65 : f32 to vector<128x128xf32>
    %199 = arith.subf %198, %195 : vector<128x128xf32>
    %200 = arith.select %197, %195, %199 : vector<128x128xi1>, vector<128x128xf32>
    %cst_66 = arith.constant 5.000000e-01 : f32
    %201 = vector.broadcast %cst_66 : f32 to vector<128x128xf32>
    %202 = arith.mulf %201, %165 : vector<128x128xf32>
    %cst_67 = arith.constant 1.000000e+00 : f32
    %203 = vector.broadcast %cst_67 : f32 to vector<128x128xf32>
    %204 = arith.addf %203, %200 : vector<128x128xf32>
    %205 = arith.mulf %202, %204 : vector<128x128xf32>
    %c0_68 = arith.constant 0 : index
    %c0_69 = arith.constant 0 : index
    %206 = vector.load %arg7[%c0_68, %c0_69] : memref<128x32xf32, #tpu.memory_space<vmem>>, vector<128x32xf32>
    %cst_70 = arith.constant dense<0.000000e+00> : vector<128x32xf32>
    %207 = tpu.matmul %205, %206, %cst_70 {dimension_numbers = #tpu.dot_dimension_numbers<[1], [0], [0], [1], [0, 0, 1, 1], [], []>} : vector<128x128xf32>, vector<128x32xf32>, vector<128x32xf32> -> vector<128x32xf32>
    %208 = vector.broadcast %7 : vector<1x32xf32> to vector<128x32xf32>
    %209 = arith.addf %207, %208 : vector<128x32xf32>
    %210 = arith.addf %145, %209 : vector<128x32xf32>
    %c0_71 = arith.constant 0 : index
    %c0_72 = arith.constant 0 : index
    %211 = vector.load %arg3[%c0_71, %c0_72] : memref<128x128xf32, #tpu.memory_space<vmem>>, vector<128x128xf32>
    %cst_73 = arith.constant dense<0.000000e+00> : vector<128x32xf32>
    %212 = tpu.matmul %211, %210, %cst_73 {dimension_numbers = #tpu.dot_dimension_numbers<[1], [0], [0], [1], [0, 0, 1, 1], [], []>} : vector<128x128xf32>, vector<128x32xf32>, vector<128x32xf32> -> vector<128x32xf32>
    %c0_74 = arith.constant 0 : index
    %c0_75 = arith.constant 0 : index
    %213 = vector.load %arg10[%c0_74, %c0_75] : memref<128x32xf32, #tpu.memory_space<vmem>>, vector<128x32xf32>
    tpu.vector_store %arg10[%c0_74, %c0_75], %212 {strides = array<i32>} : memref<128x32xf32, #tpu.memory_space<vmem>>, vector<128x32xf32>,
    return
  }
  func.func @transform_0(%arg0: i32) -> (i32, i32) {
    %c0_i32 = arith.constant 0 : i32
    %c0_i32_0 = arith.constant 0 : i32
    %c0_i32_1 = arith.constant 0 : i32
    return %c0_i32, %c0_i32_0 : i32, i32
  }
  func.func @transform_1(%arg0: i32) -> (i32, i32) {
    %c0_i32 = arith.constant 0 : i32
    %c0_i32_0 = arith.constant 0 : i32
    %c0_i32_1 = arith.constant 0 : i32
    return %c0_i32, %c0_i32_0 : i32, i32
  }
  func.func @transform_2(%arg0: i32) -> (i32, i32) {
    %c0_i32 = arith.constant 0 : i32
    %c0_i32_0 = arith.constant 0 : i32
    %c0_i32_1 = arith.constant 0 : i32
    return %c0_i32, %c0_i32_0 : i32, i32
  }
  func.func @transform_3(%arg0: i32) -> (i32, i32) {
    %c0_i32 = arith.constant 0 : i32
    %c0_i32_0 = arith.constant 0 : i32
    %c0_i32_1 = arith.constant 0 : i32
    return %c0_i32, %c0_i32_0 : i32, i32
  }
  func.func @transform_4(%arg0: i32) -> (i32, i32) {
    %c0_i32 = arith.constant 0 : i32
    %c0_i32_0 = arith.constant 0 : i32
    %c0_i32_1 = arith.constant 0 : i32
    return %c0_i32, %c0_i32_0 : i32, i32
  }
  func.func @transform_5(%arg0: i32) -> (i32, i32) {
    %c0_i32 = arith.constant 0 : i32
    %c0_i32_0 = arith.constant 0 : i32
    %c0_i32_1 = arith.constant 0 : i32
    return %c0_i32, %c0_i32_0 : i32, i32
  }
  func.func @transform_6(%arg0: i32) -> (i32, i32) {
    %c0_i32 = arith.constant 0 : i32
    %c0_i32_0 = arith.constant 0 : i32
    %c0_i32_1 = arith.constant 0 : i32
    return %c0_i32, %c0_i32_0 : i32, i32
  }
  func.func @transform_7(%arg0: i32) -> (i32, i32) {
    %c0_i32 = arith.constant 0 : i32
    %c0_i32_0 = arith.constant 0 : i32
    %c0_i32_1 = arith.constant 0 : i32
    return %c0_i32, %c0_i32_0 : i32, i32
  }
  func.func @transform_8(%arg0: i32) -> (i32, i32, i32) {
    %c0_i32 = arith.constant 0 : i32
    %c0_i32_0 = arith.constant 0 : i32
    %c0_i32_1 = arith.constant 0 : i32
    %c0_i32_2 = arith.constant 0 : i32
    return %c0_i32, %c0_i32_0, %c0_i32_1 : i32, i32, i32
  }
  func.func @transform_9(%arg0: i32) -> (i32, i32) {
    %c0_i32 = arith.constant 0 : i32
    %c0_i32_0 = arith.constant 0 : i32
    %c0_i32_1 = arith.constant 0 : i32
    return %c0_i32, %c0_i32_0 : i32, i32
  }
}

</mosaic_0001>

<bundles_post_ra>
// kernel: swin_block_forward.1
= control target key start
LH: loop header
LB: loop body
LE: loop exit
PB: predicated region body
PF: predicated region fallthrough
CT: control target
= control target key end

     0   :  { %14 = vsyncpa [#allocation3], 0  ;;  %s14403_s0 = inlined_call_operand.vmem [shape: f32[128,32], index: 0, kind: input, shape index: {}]   ;;  %s14404_s1 = inlined_call_operand.vmem [shape: f32[128,128], index: 1, kind: input, shape index: {}]   ;;  %s14405_s2 = inlined_call_operand.vmem [shape: f32[128,128], index: 2, kind: input, shape index: {}]   ;;  %s14406_s3 = inlined_call_operand.vmem [shape: f32[32,96], index: 3, kind: input, shape index: {}]   ;;  %s14407_s4 = inlined_call_operand.hbm [shape: f32[32,32], index: 4, kind: input, shape index: {}]   ;;  %s14408_s5 = inlined_call_operand.hbm [shape: f32[32,128], index: 5, kind: input, shape index: {}]   ;;  %s14409_s6 = inlined_call_operand.vmem [shape: f32[128,32], index: 6, kind: input, shape index: {}]   ;;  %s14410_s7 = inlined_call_operand.hbm [shape: f32[4,128], index: 7, kind: input, shape index: {}]   ;;  %s14411_s8 = inlined_call_operand.vmem [shape: f32[4,16,16], index: 8, kind: input, shape index: {}]   ;;  %s14412_s9 = inlined_call_operand.vmem [shape: f32[128,32], index: 9, kind: output, shape index: {}]  }
   0x1   :  { %15 = vsyncpa [#allocation5], 0  ;;  %s11548_s30 = smov [#allocation4]   ;;  %s11549_s11 = smov [#allocation2]  }
   0x2   :  { %s41_s10 = sshll.u32 %s11548_s30, 4  ;;  %s29_s12 = sshll.u32 %s11549_s11, 4  ;;  %s42_s10 = int_to_ptr.vmem [resolvable:$true] %s41_s10  ;;  %s11616_s12 = int_to_ptr.vmem [resolvable:$true] %s29_s12 }
   0x3   :  { %s11478_s15 = scalar_lea.hbm %s14408_s5, 512 }
   0x4   :  { %p11479_p0 = scmp.ne.s32.totalorder %s14408_s5, %s11478_s15  ;;  %p11482_p1 = scmp.lt.u32.totalorder %s11478_s15, %s14408_s5 }
   0x6   :  { %p11484_p2 = pnand %p11482_p1, %p11479_p0 }
   0x8   :  { %11487 = shalt.err (!%p11484_p2)
}
   0x9   :  { %s11488_s20 = scalar_lea.vmem %s42_s10, 512  ;;  %p11493_p4 = scmp.lt.s32.totalorder %s42_s10, %s42_s10 }
   0xa   :  { %p11489_p3 = scmp.ne.s32.totalorder %s42_s10, %s11488_s20  ;;  %p11494_p5 = scmp.lt.s32.totalorder %s11488_s20, %s11488_s20 }
   0xc   :  { %p11495_p6 = por %p11494_p5, %p11493_p4 }
   0xe   :  { %p11496_p7 = pnand %p11495_p6, %p11489_p3 }
  0x10   :  { %11499 = shalt.err (!%p11496_p7)
}
  0x11   :  { %s11550_s21 = smov 128   ;;  %s11551_s22 = smov 8  }
  0x12   :  { %47 = dma.hbm_to_vmem [thread:$0]  %s14408_s5, 512, %s42_s10, [#allocation5], %s11550_s21, %s11550_s21, %s11551_s22  }
  0x13   :  { %s11500_s27 = scalar_lea.hbm %s14407_s4, 512 }
  0x14   :  { %p11501_p8 = scmp.ne.s32.totalorder %s14407_s4, %s11500_s27  ;;  %p11504_p9 = scmp.lt.u32.totalorder %s11500_s27, %s14407_s4 }
  0x16   :  { %p11506_p10 = pnand %p11504_p9, %p11501_p8 }
  0x18   :  { %11509 = shalt.err (!%p11506_p10)
}
  0x19   :  { %s11510_s13 = scalar_lea.vmem %s11616_s12, 512  ;;  %p11515_p12 = scmp.lt.s32.totalorder %s11616_s12, %s11616_s12 }
  0x1a   :  { %p11511_p11 = scmp.ne.s32.totalorder %s11616_s12, %s11510_s13  ;;  %p11516_p13 = scmp.lt.s32.totalorder %s11510_s13, %s11510_s13 }
  0x1c   :  { %p11517_p0 = por %p11516_p13, %p11515_p12 }
  0x1e   :  { %p11518_p1 = pnand %p11517_p0, %p11511_p11 }
  0x20   :  { %11521 = shalt.err (!%p11518_p1)
}
  0x21   :  { %35 = dma.hbm_to_vmem [thread:$0]  %s14407_s4, 512, %s11616_s12, [#allocation3], %s11550_s21, %s11550_s21, %s11551_s22  }
  0x22   :  { %s11552_s14 = smov [#allocation6]   ;;  %s11522_s18 = scalar_lea.hbm %s14410_s7, 64 }
  0x23   :  { %s56_s15 = sshll.u32 %s11552_s14, 4  ;;  %p11523_p2 = scmp.ne.s32.totalorder %s14410_s7, %s11522_s18  ;;  %s57_s15 = int_to_ptr.vmem [resolvable:$true] %s56_s15 }
  0x24   :  { %p11526_p3 = scmp.lt.u32.totalorder %s11522_s18, %s14410_s7 }
  0x26   :  { %p11528_p4 = pnand %p11526_p3, %p11523_p2 }
  0x28   :  { %11531 = shalt.err (!%p11528_p4)
}
  0x29   :  { %s11532_s25 = scalar_lea.vmem %s57_s15, 64  ;;  %p11537_p6 = scmp.lt.s32.totalorder %s57_s15, %s57_s15 }
  0x2a   :  { %p11533_p5 = scmp.ne.s32.totalorder %s57_s15, %s11532_s25  ;;  %p11538_p7 = scmp.lt.s32.totalorder %s11532_s25, %s11532_s25 }
  0x2c   :  { %p11539_p8 = por %p11538_p7, %p11537_p6 }
  0x2e   :  { %p11540_p9 = pnand %p11539_p8, %p11533_p5 }
  0x30   :  { %11543 = shalt.err (!%p11540_p9)
}
  0x31   :  { %59 = dma.hbm_to_vmem [thread:$0]  %s14410_s7, 64, %s57_s15, [#allocation5]  }
  0x32   :  { %11544 = dma.done.wait [#allocation3], 512  }
  0x33   :  { %11545 = vsyncadd [#allocation3], 4294966784 }
  0x34   :  { %11546 = dma.done.wait [#allocation5], 576  }
  0x35   :  { %11547 = vsyncadd [#allocation5], 4294966720  ;;  %v71_v0 = vld [vmem:[%s14403_s0] sm:$0xff]  ;;  %v72_v1 = vld [vmem:[%s14403_s0 + $0x8] sm:$0xff]  ;;  %vm249_vm0 = vcmask 261120   ;;  %vm668_vm1 = vcmask 64512  }
  0x36   :  { %v73_v2 = vld [vmem:[%s14403_s0 + $0x10] sm:$0xff]  ;;  %v10314_v3 = vpack.c.bf16 %v72_v1, %v71_v0  ;;  %v74_v4 = vld [vmem:[%s14403_s0 + $0x18] sm:$0xff]  ;;  %v75_v6 = vld [vmem:[%s14403_s0 + $0x20] sm:$0xff]  ;;  %s11554_s21 = smov 64   ;;  %vm1375_vm3 = vcmask 130048   ;;  %s11555_s30 = smov 88  }
  0x37   :  { %v10318_v5 = vpack.c.bf16 %v74_v4, %v73_v2  ;;  %v76_v7 = vld [vmem:[%s14403_s0 + $0x28] sm:$0xff]  ;;  %v87_v9 = vld [vmem:[%s14404_s1] sm:$0xff]  ;;  %v77_v10 = vld [vmem:[%s14403_s0 + $0x30] sm:$0xff]  ;;  %s11556_s11 = smov 120   ;;  %s11557_s13 = smov 56   ;;  %vm7473_vm4 = vcmask 195584  }
  0x38   :  { %10315 = vmatprep.subr.bf16.mxu0 %v10314_v3  ;;  %v10322_v8 = vpack.c.bf16 %v76_v7, %v75_v6  ;;  %v78_v11 = vld [vmem:[%s14403_s0 + $0x38] sm:$0xff]  ;;  %9634 = vmatprep.mubr.f32.mxu0 %v87_v9  ;;  %v79_v13 = vld [vmem:[%s14403_s0 + $0x40] sm:$0xff]  ;;  %v80_v14 = vld [vmem:[%s14403_s0 + $0x48] sm:$0xff]  ;;  %s11558_s15 = smov 80   ;;  %s11559_s16 = smov 112  }
  0x39   :  { %10317 = vmatpush3.bf16.msra.mxu0 %v10314_v3  ;;  %v10326_v12 = vpack.c.bf16 %v78_v11, %v77_v10  ;;  %v10330_v15 = vpack.c.bf16 %v80_v14, %v79_v13  ;;  %v81_v16 = vld [vmem:[%s14403_s0 + $0x50] sm:$0xff]  ;;  %v82_v17 = vld [vmem:[%s14403_s0 + $0x58] sm:$0xff]  ;;  %v83_v19 = vld [vmem:[%s14403_s0 + $0x60] sm:$0xff]  ;;  %s11560_s17 = smov 48   ;;  %s11561_s20 = smov 72  }
  0x3a   :  { %10319 = vmatprep.subr.bf16.mxu0 %v10318_v5  ;;  %v10334_v18 = vpack.c.bf16 %v82_v17, %v81_v16  ;;  %v84_v20 = vld [vmem:[%s14403_s0 + $0x68] sm:$0xff]  ;;  %v85_v22 = vld [vmem:[%s14403_s0 + $0x70] sm:$0xff]  ;;  %v86_v23 = vld [vmem:[%s14403_s0 + $0x78] sm:$0xff]  ;;  %s11562_s23 = smov 104   ;;  %s11563_s24 = smov 40  }
  0x3b   :  { %v10338_v21 = vpack.c.bf16 %v84_v20, %v83_v19  ;;  %v10342_v24 = vpack.c.bf16 %v86_v23, %v85_v22  ;;  %v88_v25 = vld [vmem:[%s14404_s1 + $0x8] sm:$0xff]  ;;  %v89_v26 = vld [vmem:[%s14404_s1 + $0x10] sm:$0xff]  ;;  %v90_v27 = vld [vmem:[%s14404_s1 + $0x18] sm:$0xff] }
  0x3c   :  { %v91_v28 = vld [vmem:[%s14404_s1 + $0x20] sm:$0xff]  ;;  %v92_v29 = vld [vmem:[%s14404_s1 + $0x28] sm:$0xff]  ;;  %v93_v30 = vld [vmem:[%s14404_s1 + $0x30] sm:$0xff] }
  0x3d   :  { %10321 = vmatpush3.bf16.msra.mxu0 %v10318_v5  ;;  %v94_v31 = vld [vmem:[%s14404_s1 + $0x38] sm:$0xff]  ;;  %v95_v32 = vld [vmem:[%s14404_s1 + $0x40] sm:$0xff]  ;;  %v96_v33 = vld [vmem:[%s14404_s1 + $0x48] sm:$0xff] }
  0x3e   :  { %10323 = vmatprep.subr.bf16.mxu0 %v10322_v8  ;;  %v97_v34 = vld [vmem:[%s14404_s1 + $0x50] sm:$0xff]  ;;  %v98_v35 = vld [vmem:[%s14404_s1 + $0x58] sm:$0xff]  ;;  %v99_v36 = vld [vmem:[%s14404_s1 + $0x60] sm:$0xff] }
  0x3f   :  { %v100_v37 = vld [vmem:[%s14404_s1 + $0x68] sm:$0xff]  ;;  %v101_v38 = vld [vmem:[%s14404_s1 + $0x70] sm:$0xff]  ;;  %v102_v39 = vld [vmem:[%s14404_s1 + $0x78] sm:$0xff] }
  0x40   :  { %vm12058_vm2 = vmpackc.low %vm668_vm1, %vm668_vm1 }
  0x41   :  { %10325 = vmatpush3.bf16.msra.mxu0 %v10322_v8 }
  0x42   :  { %10327 = vmatprep.subr.bf16.mxu0 %v10326_v12 }
  0x45   :  { %10329 = vmatpush3.bf16.msra.mxu0 %v10326_v12 }
  0x46   :  { %10331 = vmatprep.subr.bf16.mxu0 %v10330_v15 }
  0x49   :  { %10333 = vmatpush3.bf16.msra.mxu0 %v10330_v15 }
  0x4a   :  { %10335 = vmatprep.subr.bf16.mxu0 %v10334_v18 }
  0x4d   :  { %10337 = vmatpush3.bf16.msra.mxu0 %v10334_v18 }
  0x4e   :  { %10339 = vmatprep.subr.bf16.mxu0 %v10338_v21 }
  0x51   :  { %10341 = vmatpush3.bf16.msra.mxu0 %v10338_v21 }
  0x52   :  { %10343 = vmatprep.subr.bf16.mxu0 %v10342_v24 }
  0x55   :  { %10345 = vmatpush3.bf16.msra.mxu0 %v10342_v24 }
  0x58   :  { %9635 = vmatmul.mubr.f32.vlgmr.msra.gmra.mrb[0].mxu0 %v88_v25 }
  0x59   :  { %9637 = vmatprep.mubr.f32.mxu0 %v89_v26 }
  0x5c   :  { %9638 = vmatmul.mubr.f32.gmra.mrb[2].mxu0 %v90_v27 }
  0x5d   :  { %9640 = vmatprep.mubr.f32.mxu0 %v91_v28 }
  0x60   :  { %9641 = vmatmul.mubr.f32.gmra.mrb[4].mxu0 %v92_v29 }
  0x61   :  { %9643 = vmatprep.mubr.f32.mxu0 %v93_v30 }
  0x64   :  { %9644 = vmatmul.mubr.f32.gmra.mrb[6].mxu0 %v94_v31 }
  0x65   :  { %9646 = vmatprep.mubr.f32.mxu0 %v95_v32 }
  0x68   :  { %9647 = vmatmul.mubr.f32.gmra.mrb[8].mxu0 %v96_v33 }
  0x69   :  { %9649 = vmatprep.mubr.f32.mxu0 %v97_v34 }
  0x6c   :  { %9650 = vmatmul.mubr.f32.gmra.mrb[10].mxu0 %v98_v35 }
  0x6d   :  { %9652 = vmatprep.mubr.f32.mxu0 %v99_v36 }
  0x70   :  { %9653 = vmatmul.mubr.f32.gmra.mrb[12].mxu0 %v100_v37 }
  0x71   :  { %9655 = vmatprep.mubr.f32.mxu0 %v101_v38 }
  0x74   :  { %9656 = vmatmul.mubr.f32.gmra.mrb[14].mxu0 %v102_v39 }
 0x12b   :  { %v11757_v40 = vpop.f32.mrb[0].mxu0 }
 0x12c   :  { %14473 = vst [vmem:[#allocation9_spill] sm:$0xff] %v11757_v40  ;;  %v11759_v41 = vpop.f32.mrb[1].mxu0  ;;  %v253_v45 = vsel %vm249_vm0, %v11757_v40, 0.0 }
 0x12d   :  { %14474 = vst [vmem:[#allocation10_spill] sm:$0xff] %v11759_v41  ;;  %v250_v42 = vsel %vm249_vm0, %v11759_v41, 0.0 }
 0x12e   :  { %251 = vadd.xlane.f32.xlu0 %v250_v42 }
 0x12f   :  { %v11763_v43 = vpop.f32.mrb[2].mxu0 }
 0x130   :  { %14475 = vst [vmem:[#allocation11_spill] sm:$0xff] %v11763_v43  ;;  %v11765_v44 = vpop.f32.mrb[3].mxu0  ;;  %v259_v48 = vsel %vm249_vm0, %v11763_v43, 0.0 }
 0x131   :  { %14476 = vst [vmem:[#allocation12_spill] sm:$0xff] %v11765_v44  ;;  %v256_v46 = vsel %vm249_vm0, %v11765_v44, 0.0 }
 0x132   :  { %254 = vadd.xlane.f32.xlu0 %v253_v45  ;;  %257 = vadd.xlane.f32.xlu1 %v256_v46 }
 0x133   :  { %v11771_v47 = vpop.f32.mrb[4].mxu0 }
 0x134   :  { %14477 = vst [vmem:[#allocation13_spill] sm:$0xff] %v11771_v47  ;;  %v11775_v49 = vpop.f32.mrb[5].mxu0  ;;  %v265_v52 = vsel %vm249_vm0, %v11771_v47, 0.0 }
 0x135   :  { %14478 = vst [vmem:[#allocation14_spill] sm:$0xff] %v11775_v49  ;;  %v262_v50 = vsel %vm249_vm0, %v11775_v49, 0.0 }
 0x136   :  { %260 = vadd.xlane.f32.xlu1 %v259_v48  ;;  %263 = vadd.xlane.f32.xlu0 %v262_v50 }
 0x137   :  { %v11779_v51 = vpop.f32.mrb[6].mxu0 }
 0x138   :  { %14479 = vst [vmem:[#allocation15_spill] sm:$0xff] %v11779_v51  ;;  %v11783_v53 = vpop.f32.mrb[7].mxu0  ;;  %v271_v56 = vsel %vm249_vm0, %v11779_v51, 0.0 }
 0x139   :  { %14480 = vst [vmem:[#allocation16_spill] sm:$0xff] %v11783_v53  ;;  %v268_v54 = vsel %vm249_vm0, %v11783_v53, 0.0 }
 0x13a   :  { %266 = vadd.xlane.f32.xlu1 %v265_v52  ;;  %269 = vadd.xlane.f32.xlu0 %v268_v54 }
 0x13b   :  { %v11787_v55 = vpop.f32.mrb[8].mxu0 }
 0x13c   :  { %14481 = vst [vmem:[#allocation17_spill] sm:$0xff] %v11787_v55  ;;  %v11791_v57 = vpop.f32.mrb[9].mxu0  ;;  %v277_v60 = vsel %vm249_vm0, %v11787_v55, 0.0 }
 0x13d   :  { %14482 = vst [vmem:[#allocation18_spill] sm:$0xff] %v11791_v57  ;;  %v274_v58 = vsel %vm249_vm0, %v11791_v57, 0.0 }
 0x13e   :  { %272 = vadd.xlane.f32.xlu1 %v271_v56  ;;  %275 = vadd.xlane.f32.xlu0 %v274_v58 }
 0x13f   :  { %v11795_v59 = vpop.f32.mrb[10].mxu0 }
 0x140   :  { %14483 = vst [vmem:[#allocation19_spill] sm:$0xff] %v11795_v59  ;;  %v11799_v61 = vpop.f32.mrb[11].mxu0  ;;  %v283_v0 = vsel %vm249_vm0, %v11795_v59, 0.0 }
 0x141   :  { %14484 = vst [vmem:[#allocation20_spill] sm:$0xff] %v11799_v61  ;;  %v280_v62 = vsel %vm249_vm0, %v11799_v61, 0.0 }
 0x142   :  { %278 = vadd.xlane.f32.xlu1 %v277_v60  ;;  %281 = vadd.xlane.f32.xlu0 %v280_v62 }
 0x143   :  { %v11803_v63 = vpop.f32.mrb[12].mxu0 }
 0x144   :  { %14485 = vst [vmem:[#allocation21_spill] sm:$0xff] %v11803_v63  ;;  %v11807_v1 = vpop.f32.mrb[13].mxu0  ;;  %v289_v4 = vsel %vm249_vm0, %v11803_v63, 0.0 }
 0x145   :  { %14486 = vst [vmem:[#allocation22_spill] sm:$0xff] %v11807_v1  ;;  %v286_v2 = vsel %vm249_vm0, %v11807_v1, 0.0 }
 0x146   :  { %284 = vadd.xlane.f32.xlu1 %v283_v0  ;;  %287 = vadd.xlane.f32.xlu0 %v286_v2 }
 0x147   :  { %v11811_v3 = vpop.f32.mrb[14].mxu0 }
 0x148   :  { %14487 = vst [vmem:[#allocation23_spill] sm:$0xff] %v11811_v3  ;;  %v11815_v5 = vpop.f32.mrb[15].mxu0  ;;  %v295_v7 = vsel %vm249_vm0, %v11811_v3, 0.0 }
 0x149   :  { %14488 = vst [vmem:[#allocation24_spill] sm:$0xff] %v11815_v5  ;;  %v292_v6 = vsel %vm249_vm0, %v11815_v5, 0.0 }
 0x14a   :  { %290 = vadd.xlane.f32.xlu1 %v289_v4  ;;  %293 = vadd.xlane.f32.xlu0 %v292_v6 }
 0x14e   :  { %296 = vadd.xlane.f32.xlu1 %v295_v7 }
 0x1bb   :  { %v252_v8 = vpop.xlane.xlu0 %251 }
 0x1bc   :  { %v299_v9 = vmul.f32 0.03125, %v252_v8 }
 0x1be   :  { %v11822_v10 = vsub.f32 %v11759_v41, %v299_v9 }
 0x1bf   :  { %v255_v11 = vpop.xlane.xlu0 %254  ;;  %v258_v12 = vpop.xlane.xlu1 %257 }
 0x1c0   :  { %v300_v13 = vmul.f32 0.03125, %v255_v11  ;;  %v301_v14 = vmul.f32 0.03125, %v258_v12  ;;  %v331_v15 = vmul.f32 %v11822_v10, %v11822_v10 }
 0x1c2   :  { %v11827_v16 = vsub.f32 %v11757_v40, %v300_v13  ;;  %v11830_v17 = vsub.f32 %v11765_v44, %v301_v14  ;;  %v347_v18 = vsel %vm249_vm0, %v331_v15, 0.0 }
 0x1c3   :  { %v261_v19 = vpop.xlane.xlu1 %260  ;;  %v264_v20 = vpop.xlane.xlu0 %263  ;;  %348 = vadd.xlane.f32.xlu0 %v347_v18 }
 0x1c4   :  { %v302_v21 = vmul.f32 0.03125, %v261_v19  ;;  %v303_v22 = vmul.f32 0.03125, %v264_v20  ;;  %v332_v23 = vmul.f32 %v11827_v16, %v11827_v16  ;;  %v333_v24 = vmul.f32 %v11830_v17, %v11830_v17 }
 0x1c6   :  { %v11838_v25 = vsub.f32 %v11763_v43, %v302_v21  ;;  %v11841_v26 = vsub.f32 %v11775_v49, %v303_v22  ;;  %v350_v27 = vsel %vm249_vm0, %v332_v23, 0.0  ;;  %v353_v28 = vsel %vm249_vm0, %v333_v24, 0.0 }
 0x1c7   :  { %v267_v29 = vpop.xlane.xlu1 %266  ;;  %v270_v30 = vpop.xlane.xlu0 %269  ;;  %351 = vadd.xlane.f32.xlu1 %v350_v27  ;;  %354 = vadd.xlane.f32.xlu0 %v353_v28 }
 0x1c8   :  { %v304_v31 = vmul.f32 0.03125, %v267_v29  ;;  %v305_v32 = vmul.f32 0.03125, %v270_v30  ;;  %v334_v33 = vmul.f32 %v11838_v25, %v11838_v25  ;;  %v335_v34 = vmul.f32 %v11841_v26, %v11841_v26 }
 0x1ca   :  { %v11850_v35 = vsub.f32 %v11771_v47, %v304_v31  ;;  %v11853_v36 = vsub.f32 %v11783_v53, %v305_v32  ;;  %v356_v37 = vsel %vm249_vm0, %v334_v33, 0.0  ;;  %v359_v38 = vsel %vm249_vm0, %v335_v34, 0.0 }
 0x1cb   :  { %v273_v39 = vpop.xlane.xlu1 %272  ;;  %v276_v42 = vpop.xlane.xlu0 %275  ;;  %357 = vadd.xlane.f32.xlu1 %v356_v37  ;;  %360 = vadd.xlane.f32.xlu0 %v359_v38 }
 0x1cc   :  { %v306_v45 = vmul.f32 0.03125, %v273_v39  ;;  %v307_v46 = vmul.f32 0.03125, %v276_v42  ;;  %v336_v48 = vmul.f32 %v11850_v35, %v11850_v35  ;;  %v337_v50 = vmul.f32 %v11853_v36, %v11853_v36 }
 0x1ce   :  { %v11862_v52 = vsub.f32 %v11779_v51, %v306_v45  ;;  %v11865_v54 = vsub.f32 %v11791_v57, %v307_v46  ;;  %v362_v56 = vsel %vm249_vm0, %v336_v48, 0.0  ;;  %v365_v58 = vsel %vm249_vm0, %v337_v50, 0.0  ;;  %v459_v46 = vld [vmem:[%s14406_s3] sm:$0xff]  ;;  %v460_v48 = vld [vmem:[%s14406_s3 + $0x8] sm:$0xff] }
 0x1cf   :  { %v279_v60 = vpop.xlane.xlu1 %278  ;;  %v282_v62 = vpop.xlane.xlu0 %281  ;;  %363 = vadd.xlane.f32.xlu1 %v362_v56  ;;  %366 = vadd.xlane.f32.xlu0 %v365_v58  ;;  %v10346_v50 = vpack.c.bf16 %v460_v48, %v459_v46 }
 0x1d0   :  { %v308_v0 = vmul.f32 0.03125, %v279_v60  ;;  %v309_v2 = vmul.f32 0.03125, %v282_v62  ;;  %v338_v4 = vmul.f32 %v11862_v52, %v11862_v52  ;;  %v339_v6 = vmul.f32 %v11865_v54, %v11865_v54 }
 0x1d1   :  { %10347 = vmatprep.subr.bf16.mxu1 %v10346_v50 }
 0x1d2   :  { %v11874_v7 = vsub.f32 %v11787_v55, %v308_v0  ;;  %v11877_v8 = vsub.f32 %v11799_v61, %v309_v2  ;;  %v368_v9 = vsel %vm249_vm0, %v338_v4, 0.0  ;;  %v371_v11 = vsel %vm249_vm0, %v339_v6, 0.0  ;;  %v461_v0 = vld [vmem:[%s14406_s3 + $0x10] sm:$0xff]  ;;  %v462_v2 = vld [vmem:[%s14406_s3 + $0x18] sm:$0xff]  ;;  %10349 = vmatpush3.bf16.msra.mxu1 %v10346_v50  ;;  %s11553_s3 = smov 96  }
 0x1d3   :  { %v285_v12 = vpop.xlane.xlu1 %284  ;;  %v288_v13 = vpop.xlane.xlu0 %287  ;;  %369 = vadd.xlane.f32.xlu1 %v368_v9  ;;  %372 = vadd.xlane.f32.xlu0 %v371_v11  ;;  %v10350_v4 = vpack.c.bf16 %v462_v2, %v461_v0 }
 0x1d4   :  { %v310_v14 = vmul.f32 0.03125, %v285_v12  ;;  %v311_v15 = vmul.f32 0.03125, %v288_v13  ;;  %v340_v18 = vmul.f32 %v11874_v7, %v11874_v7  ;;  %v341_v19 = vmul.f32 %v11877_v8, %v11877_v8 }
 0x1d5   :  { %10351 = vmatprep.subr.bf16.mxu1 %v10350_v4 }
 0x1d6   :  { %v11886_v20 = vsub.f32 %v11795_v59, %v310_v14  ;;  %v11889_v21 = vsub.f32 %v11807_v1, %v311_v15  ;;  %v374_v22 = vsel %vm249_vm0, %v340_v18, 0.0  ;;  %v377_v23 = vsel %vm249_vm0, %v341_v19, 0.0  ;;  %10353 = vmatpush3.bf16.msra.mxu1 %v10350_v4 }
 0x1d7   :  { %v291_v24 = vpop.xlane.xlu1 %290  ;;  %375 = vadd.xlane.f32.xlu1 %v374_v22  ;;  %378 = vadd.xlane.f32.xlu0 %v377_v23  ;;  %v294_v27 = vpop.xlane.xlu0 %293 }
 0x1d8   :  { %v312_v28 = vmul.f32 0.03125, %v291_v24  ;;  %v313_v29 = vmul.f32 0.03125, %v294_v27  ;;  %v342_v30 = vmul.f32 %v11886_v20, %v11886_v20  ;;  %v343_v31 = vmul.f32 %v11889_v21, %v11889_v21 }
 0x1da   :  { %v11898_v32 = vsub.f32 %v11803_v63, %v312_v28  ;;  %v11901_v33 = vsub.f32 %v11815_v5, %v313_v29  ;;  %v380_v34 = vsel %vm249_vm0, %v342_v30, 0.0  ;;  %v383_v37 = vsel %vm249_vm0, %v343_v31, 0.0 }
 0x1db   :  { %381 = vadd.xlane.f32.xlu1 %v380_v34  ;;  %v297_v38 = vpop.xlane.xlu1 %296  ;;  %384 = vadd.xlane.f32.xlu0 %v383_v37 }
 0x1dc   :  { %v314_v39 = vmul.f32 0.03125, %v297_v38  ;;  %v344_v42 = vmul.f32 %v11898_v32, %v11898_v32  ;;  %v345_v45 = vmul.f32 %v11901_v33, %v11901_v33 }
 0x1de   :  { %v11916_v56 = vsub.f32 %v11811_v3, %v314_v39  ;;  %v386_v58 = vsel %vm249_vm0, %v344_v42, 0.0  ;;  %v389_v60 = vsel %vm249_vm0, %v345_v45, 0.0 }
 0x1df   :  { %387 = vadd.xlane.f32.xlu1 %v386_v58  ;;  %390 = vadd.xlane.f32.xlu0 %v389_v60 }
 0x1e0   :  { %v346_v62 = vmul.f32 %v11916_v56, %v11916_v56 }
 0x1e2   :  { %v392_v6 = vsel %vm249_vm0, %v346_v62, 0.0 }
 0x1e3   :  { %393 = vadd.xlane.f32.xlu1 %v392_v6 }
 0x250   :  { %v349_v9 = vpop.xlane.xlu0 %348 }
 0x251   :  { %v395_v11 = vmul.f32 0.03125, %v349_v9 }
 0x253   :  { %v411_v12 = vadd.f32 1e-05, %v395_v11 }
 0x254   :  { %v352_v13 = vpop.xlane.xlu1 %351  ;;  %v355_v14 = vpop.xlane.xlu0 %354 }
 0x255   :  { %11092 = vrsqrt.f32 %v411_v12  ;;  %v396_v15 = vmul.f32 0.03125, %v352_v13  ;;  %v397_v18 = vmul.f32 0.03125, %v355_v14 }
 0x257   :  { %v412_v19 = vadd.f32 1e-05, %v396_v15  ;;  %v413_v22 = vadd.f32 1e-05, %v397_v18 }
 0x258   :  { %v358_v23 = vpop.xlane.xlu1 %357  ;;  %v361_v24 = vpop.xlane.xlu0 %360 }
 0x259   :  { %11094 = vrsqrt.f32 %v412_v19  ;;  %v398_v27 = vmul.f32 0.03125, %v358_v23  ;;  %v399_v28 = vmul.f32 0.03125, %v361_v24 }
 0x25a   :  { %11096 = vrsqrt.f32 %v413_v22 }
 0x25b   :  { %v414_v29 = vadd.f32 1e-05, %v398_v27  ;;  %v415_v30 = vadd.f32 1e-05, %v399_v28 }
 0x25c   :  { %v364_v31 = vpop.xlane.xlu1 %363  ;;  %v367_v34 = vpop.xlane.xlu0 %366 }
 0x25d   :  { %11098 = vrsqrt.f32 %v414_v29  ;;  %v400_v37 = vmul.f32 0.03125, %v364_v31  ;;  %v401_v38 = vmul.f32 0.03125, %v367_v34 }
 0x25e   :  { %11100 = vrsqrt.f32 %v415_v30 }
 0x25f   :  { %v11093_v39 = vpop.eup %11092  ;;  %v416_v42 = vadd.f32 1e-05, %v400_v37  ;;  %v417_v45 = vadd.f32 1e-05, %v401_v38 }
 0x260   :  { %v370_v46 = vpop.xlane.xlu1 %369  ;;  %v373_v48 = vpop.xlane.xlu0 %372  ;;  %v443_v50 = vmul.f32 %v11093_v39, %v11822_v10 }
 0x261   :  { %11102 = vrsqrt.f32 %v416_v42  ;;  %v402_v58 = vmul.f32 0.03125, %v370_v46  ;;  %v403_v60 = vmul.f32 0.03125, %v373_v48 }
 0x262   :  { %11104 = vrsqrt.f32 %v417_v45  ;;  %9666 = vmatprep.mubr.msk.f32.mxu1 %vm249_vm0, %v443_v50 }
 0x263   :  { %v11095_v62 = vpop.eup %11094  ;;  %v418_v0 = vadd.f32 1e-05, %v402_v58  ;;  %v419_v2 = vadd.f32 1e-05, %v403_v60 }
 0x264   :  { %v11097_v4 = vpop.eup %11096  ;;  %v376_v6 = vpop.xlane.xlu1 %375  ;;  %v444_v11 = vmul.f32 %v11095_v62, %v11827_v16 }
 0x265   :  { %v379_v9 = vpop.xlane.xlu0 %378  ;;  %11106 = vrsqrt.f32 %v418_v0  ;;  %v404_v12 = vmul.f32 0.03125, %v376_v6  ;;  %v445_v14 = vmul.f32 %v11097_v4, %v11830_v17 }
 0x266   :  { %v405_v13 = vmul.f32 0.03125, %v379_v9  ;;  %11108 = vrsqrt.f32 %v419_v2  ;;  %9667 = vmatmul.mubr.msk.f32.vlgmr.msra.gmra.mrb[0].mxu1 %vm249_vm0, %v444_v11 }
 0x267   :  { %v11099_v10 = vpop.eup %11098  ;;  %v420_v15 = vadd.f32 1e-05, %v404_v12  ;;  %9669 = vmatprep.mubr.msk.f32.mxu1 %vm249_vm0, %v445_v14 }
 0x268   :  { %v421_v18 = vadd.f32 1e-05, %v405_v13  ;;  %v11101_v19 = vpop.eup %11100  ;;  %v382_v22 = vpop.xlane.xlu1 %381  ;;  %v446_v24 = vmul.f32 %v11099_v10, %v11838_v25 }
 0x269   :  { %v385_v23 = vpop.xlane.xlu0 %384  ;;  %11110 = vrsqrt.f32 %v420_v15  ;;  %v406_v16 = vmul.f32 0.03125, %v382_v22  ;;  %v447_v28 = vmul.f32 %v11101_v19, %v11841_v26  ;;  %v248_v15 = vld [vmem:[#allocation6] sm:$0xf] }
 0x26a   :  { %v407_v27 = vmul.f32 0.03125, %v385_v23  ;;  %11112 = vrsqrt.f32 %v421_v18  ;;  %9670 = vmatmul.mubr.msk.f32.gmra.mrb[2].mxu1 %vm249_vm0, %v446_v24 }
 0x26b   :  { %v11103_v17 = vpop.eup %11102  ;;  %v422_v29 = vadd.f32 1e-05, %v406_v16  ;;  %9672 = vmatprep.mubr.msk.f32.mxu1 %vm249_vm0, %v447_v28 }
 0x26c   :  { %v423_v30 = vadd.f32 1e-05, %v407_v27  ;;  %v11105_v31 = vpop.eup %11104  ;;  %v388_v34 = vpop.xlane.xlu1 %387  ;;  %v448_v38 = vmul.f32 %v11103_v17, %v11850_v35 }
 0x26d   :  { %v391_v37 = vpop.xlane.xlu0 %390  ;;  %11114 = vrsqrt.f32 %v422_v29  ;;  %v408_v25 = vmul.f32 0.03125, %v388_v34  ;;  %v449_v42 = vmul.f32 %v11105_v31, %v11853_v36 }
 0x26e   :  { %v409_v39 = vmul.f32 0.03125, %v391_v37  ;;  %11116 = vrsqrt.f32 %v423_v30  ;;  %9673 = vmatmul.mubr.msk.f32.gmra.mrb[4].mxu1 %vm249_vm0, %v448_v38 }
 0x26f   :  { %v11107_v26 = vpop.eup %11106  ;;  %v424_v45 = vadd.f32 1e-05, %v408_v25  ;;  %9675 = vmatprep.mubr.msk.f32.mxu1 %vm249_vm0, %v449_v42 }
 0x270   :  { %v425_v46 = vadd.f32 1e-05, %v409_v39  ;;  %v11109_v48 = vpop.eup %11108  ;;  %v394_v50 = vpop.xlane.xlu1 %393  ;;  %v450_v58 = vmul.f32 %v11107_v26, %v11862_v52 }
 0x271   :  { %11118 = vrsqrt.f32 %v424_v45  ;;  %v410_v60 = vmul.f32 0.03125, %v394_v50  ;;  %v451_v35 = vmul.f32 %v11109_v48, %v11865_v54 }
 0x272   :  { %11120 = vrsqrt.f32 %v425_v46  ;;  %9676 = vmatmul.mubr.msk.f32.gmra.mrb[6].mxu1 %vm249_vm0, %v450_v58 }
 0x273   :  { %v11111_v36 = vpop.eup %11110  ;;  %v426_v62 = vadd.f32 1e-05, %v410_v60  ;;  %9678 = vmatprep.mubr.msk.f32.mxu1 %vm249_vm0, %v451_v35 }
 0x274   :  { %v11113_v0 = vpop.eup %11112  ;;  %v452_v2 = vmul.f32 %v11111_v36, %v11874_v7 }
 0x275   :  { %11122 = vrsqrt.f32 %v426_v62  ;;  %v453_v4 = vmul.f32 %v11113_v0, %v11877_v8 }
 0x276   :  { %9679 = vmatmul.mubr.msk.f32.gmra.mrb[8].mxu1 %vm249_vm0, %v452_v2 }
 0x277   :  { %v11115_v52 = vpop.eup %11114  ;;  %9681 = vmatprep.mubr.msk.f32.mxu1 %vm249_vm0, %v453_v4 }
 0x278   :  { %v11117_v6 = vpop.eup %11116  ;;  %v454_v54 = vmul.f32 %v11115_v52, %v11886_v20  ;;  %v463_v20 = vlaneseq }
 0x279   :  { %v455_v9 = vmul.f32 %v11117_v6, %v11889_v21 }
 0x27a   :  { %9682 = vmatmul.mubr.msk.f32.gmra.mrb[10].mxu1 %vm249_vm0, %v454_v54  ;;  %v11961_v21 = vshrl.u32 %v463_v20, 7 }
 0x27b   :  { %v11119_v11 = vpop.eup %11118  ;;  %9684 = vmatprep.mubr.msk.f32.mxu1 %vm249_vm0, %v455_v9 }
 0x27c   :  { %v11121_v12 = vpop.eup %11120  ;;  %v456_v7 = vmul.f32 %v11119_v11, %v11898_v32  ;;  %14489 = vst [vmem:[#allocation25_spill] sm:$0xff] %v11961_v21  ;;  %v465_v10 = vsub.s32 0, %v11961_v21 }
 0x27d   :  { %v457_v8 = vmul.f32 %v11121_v12, %v11901_v33 }
 0x27e   :  { %9685 = vmatmul.mubr.msk.f32.gmra.mrb[12].mxu1 %vm249_vm0, %v456_v7  ;;  %v466_v18 = vrot.slane %v248_v15, %v465_v10 }
 0x27f   :  { %v11123_v13 = vpop.eup %11122  ;;  %9687 = vmatprep.mubr.msk.f32.mxu1 %vm249_vm0, %v457_v8 }
 0x280   :  { %v458_v14 = vmul.f32 %v11123_v13, %v11916_v56 }
 0x282   :  { %9688 = vmatmul.mubr.msk.f32.gmra.mrb[14].mxu1 %vm249_vm0, %v458_v14 }
 0x339   :  { %v9668_v19 = vpop.f32.mrb[0].mxu1 }
 0x33a   :  { %v11964_v32 = vadd.f32 %v9668_v19, %v466_v18  ;;  %v581_v33 = vpop.f32.mrb[1].mxu1 }
 0x33b   :  { %v11966_v22 = vadd.f32 %v581_v33, %v466_v18 }
 0x33d   :  { %v9671_v23 = vpop.f32.mrb[2].mxu1  ;;  %9694 = vmatprep.mubr.msk.f32.mxu1 %vm668_vm1, %v11966_v22  ;;  %v11972_v56 = vpack.i.bf16 %v11964_v32, %v11966_v22 }
 0x33e   :  { %v11974_v24 = vadd.f32 %v9671_v23, %v466_v18  ;;  %v591_v16 = vpop.f32.mrb[3].mxu1 }
 0x33f   :  { %v11976_v27 = vadd.f32 %v591_v16, %v466_v18  ;;  %10773 = vrot.lane.b32.xlu0 %v11972_v56, %s11553_s3 }
 0x341   :  { %v9674_v28 = vpop.f32.mrb[4].mxu1  ;;  %v11982_v17 = vpack.i.bf16 %v11974_v24, %v11976_v27 }
 0x342   :  { %v11984_v29 = vadd.f32 %v9674_v28, %v466_v18  ;;  %v601_v30 = vpop.f32.mrb[5].mxu1 }
 0x343   :  { %v11986_v31 = vadd.f32 %v601_v30, %v466_v18  ;;  %10778 = vrot.lane.b32.xlu1 %v11982_v17, %s11553_s3 }
 0x344   :  { %14490 = vst [vmem:[#allocation26_spill] sm:$0xff] %v11984_v29 }
 0x345   :  { %v9677_v34 = vpop.f32.mrb[6].mxu1  ;;  %v11992_v37 = vpack.i.bf16 %v11984_v29, %v11986_v31 }
 0x346   :  { %v11994_v38 = vadd.f32 %v9677_v34, %v466_v18  ;;  %v611_v25 = vpop.f32.mrb[7].mxu1 }
 0x347   :  { %v11996_v39 = vadd.f32 %v611_v25, %v466_v18  ;;  %10783 = vrot.lane.b32.xlu1 %v11992_v37, %s11553_s3 }
 0x348   :  { %14491 = vst [vmem:[#allocation27_spill] sm:$0xff] %v11994_v38 }
 0x349   :  { %14492 = vst [vmem:[#allocation28_spill] sm:$0xff] %v11996_v39  ;;  %v9680_v42 = vpop.f32.mrb[8].mxu1  ;;  %9715 = vmatprep.mubr.msk.f32.mxu0 %vm668_vm1, %v11996_v39  ;;  %v12004_v26 = vpack.i.bf16 %v11994_v38, %v11996_v39 }
 0x34a   :  { %v12006_v45 = vadd.f32 %v9680_v42, %v466_v18  ;;  %v621_v46 = vpop.f32.mrb[9].mxu1 }
 0x34b   :  { %v12008_v48 = vadd.f32 %v621_v46, %v466_v18  ;;  %10788 = vrot.lane.b32.xlu1 %v12004_v26, %s11553_s3 }
 0x34c   :  { %14493 = vst [vmem:[#allocation29_spill] sm:$0xff] %v12006_v45 }
 0x34d   :  { %14494 = vst [vmem:[#allocation30_spill] sm:$0xff] %v12008_v48  ;;  %v9683_v50 = vpop.f32.mrb[10].mxu1  ;;  %v12014_v58 = vpack.i.bf16 %v12006_v45, %v12008_v48 }
 0x34e   :  { %v12016_v60 = vadd.f32 %v9683_v50, %v466_v18  ;;  %v631_v35 = vpop.f32.mrb[11].mxu1 }
 0x34f   :  { %v12018_v36 = vadd.f32 %v631_v35, %v466_v18  ;;  %10793 = vrot.lane.b32.xlu0 %v12014_v58, %s11553_s3 }
 0x350   :  { %14495 = vst [vmem:[#allocation31_spill] sm:$0xff] %v12016_v60 }
 0x351   :  { %14496 = vst [vmem:[#allocation32_spill] sm:$0xff] %v12018_v36  ;;  %v9686_v62 = vpop.f32.mrb[12].mxu1  ;;  %v12024_v0 = vpack.i.bf16 %v12016_v60, %v12018_v36 }
 0x352   :  { %v12026_v2 = vadd.f32 %v9686_v62, %v466_v18  ;;  %v641_v4 = vpop.f32.mrb[13].mxu1 }
 0x353   :  { %v12028_v52 = vadd.f32 %v641_v4, %v466_v18  ;;  %10798 = vrot.lane.b32.xlu1 %v12024_v0, %s11553_s3 }
 0x354   :  { %14497 = vst [vmem:[#allocation33_spill] sm:$0xff] %v12026_v2 }
 0x355   :  { %14498 = vst [vmem:[#allocation34_spill] sm:$0xff] %v12028_v52  ;;  %v9689_v6 = vpop.f32.mrb[14].mxu1  ;;  %v12034_v54 = vpack.i.bf16 %v12026_v2, %v12028_v52 }
 0x356   :  { %v12036_v9 = vadd.f32 %v9689_v6, %v466_v18  ;;  %v651_v11 = vpop.f32.mrb[15].mxu1 }
 0x357   :  { %v12038_v12 = vadd.f32 %v651_v11, %v466_v18  ;;  %10803 = vrot.lane.b32.xlu0 %v12034_v54, %s11553_s3 }
 0x358   :  { %14499 = vst [vmem:[#allocation35_spill] sm:$0xff] %v12036_v9 }
 0x359   :  { %14500 = vst [vmem:[#allocation36_spill] sm:$0xff] %v12038_v12  ;;  %v12044_v7 = vpack.i.bf16 %v12036_v9, %v12038_v12 }
 0x35b   :  { %10813 = vrot.lane.b32.xlu0 %v11972_v56, %s11554_s21  ;;  %10808 = vrot.lane.b32.xlu1 %v12044_v7, %s11553_s3 }
 0x35f   :  { %10818 = vrot.lane.b32.xlu1 %v11982_v17, %s11554_s21 }
 0x363   :  { %10823 = vrot.lane.b32.xlu1 %v11992_v37, %s11554_s21 }
 0x367   :  { %10828 = vrot.lane.b32.xlu1 %v12004_v26, %s11554_s21 }
 0x3b1   :  { %v10774_v8 = vpop.permute.xlu0 %10773 }
 0x3b2   :  { %v10776_v13 = vunpack.i.h.bf16 %v10774_v8  ;;  %v10775_v14 = vunpack.i.l.bf16 %v10774_v8 }
 0x3b4   :  { %v10354_v10 = vpack.c.bf16 %v10776_v13, %v10775_v14 }
 0x3b5   :  { %v10779_v15 = vpop.permute.xlu1 %10778 }
 0x3b6   :  { %v10781_v18 = vunpack.i.h.bf16 %v10779_v15  ;;  %v10780_v19 = vunpack.i.l.bf16 %v10779_v15  ;;  %10356 = vmatprep.subr.msk.bf16.mxu1 %vm12058_vm2, %v10354_v10 }
 0x3b7   :  { %10359 = vmatpush3.bf16.xpose.msk.msra.mxu1 %vm12058_vm2, %v10354_v10 }
 0x3b8   :  { %v10360_v33 = vpack.c.bf16 %v10781_v18, %v10780_v19 }
 0x3b9   :  { %v10784_v23 = vpop.permute.xlu1 %10783 }
 0x3ba   :  { %v10786_v16 = vunpack.i.h.bf16 %v10784_v23  ;;  %v10785_v28 = vunpack.i.l.bf16 %v10784_v23  ;;  %10362 = vmatprep.subr.msk.bf16.mxu1 %vm12058_vm2, %v10360_v33 }
 0x3bc   :  { %v10366_v34 = vpack.c.bf16 %v10786_v16, %v10785_v28 }
 0x3bd   :  { %v10789_v30 = vpop.permute.xlu1 %10788 }
 0x3be   :  { %v10791_v25 = vunpack.i.h.bf16 %v10789_v30  ;;  %v10790_v42 = vunpack.i.l.bf16 %v10789_v30  ;;  %9695 = vmatmul.mubr.msk.f32.vlgmr.msra.gmra.mrb[16].mxu1 %vm668_vm1, %v11964_v32 }
 0x3bf   :  { %10365 = vmatpush3.bf16.xpose.msk.msra.mxu1 %vm12058_vm2, %v10360_v33  ;;  %9701 = vmatprep.mubr.msk.f32.mxu1 %vm668_vm1, %v11976_v27 }
 0x3c0   :  { %v10372_v46 = vpack.c.bf16 %v10791_v25, %v10790_v42  ;;  %10368 = vmatprep.subr.msk.bf16.mxu1 %vm12058_vm2, %v10366_v34 }
 0x3c1   :  { %v10794_v50 = vpop.permute.xlu0 %10793 }
 0x3c2   :  { %v10796_v35 = vunpack.i.h.bf16 %v10794_v50  ;;  %v10795_v62 = vunpack.i.l.bf16 %v10794_v50  ;;  %10374 = vmatprep.subr.msk.bf16.mxu0 %vm12058_vm2, %v10372_v46 }
 0x3c3   :  { %10377 = vmatpush3.bf16.xpose.msk.msra.mxu0 %vm12058_vm2, %v10372_v46 }
 0x3c4   :  { %v10378_v6 = vpack.c.bf16 %v10796_v35, %v10795_v62 }
 0x3c5   :  { %v10799_v4 = vpop.permute.xlu1 %10798 }
 0x3c6   :  { %v10801_v11 = vunpack.i.h.bf16 %v10799_v4  ;;  %v10800_v8 = vunpack.i.l.bf16 %v10799_v4  ;;  %9702 = vmatmul.mubr.msk.f32.vlgmr.msra.gmra.mrb[18].mxu1 %vm668_vm1, %v11974_v24 }
 0x3c7   :  { %10371 = vmatpush3.bf16.xpose.msk.msra.mxu1 %vm12058_vm2, %v10366_v34  ;;  %9708 = vmatprep.mubr.msk.f32.mxu1 %vm668_vm1, %v11986_v31 }
 0x3c8   :  { %v10384_v13 = vpack.c.bf16 %v10801_v11, %v10800_v8  ;;  %10380 = vmatprep.subr.msk.bf16.mxu1 %vm12058_vm2, %v10378_v6  ;;  %v661_v8 = vld [vmem:[%s14411_s8 + $0x8] sm:$0xff] }
 0x3c9   :  { %v10804_v14 = vpop.permute.xlu0 %10803 }
 0x3ca   :  { %v10806_v10 = vunpack.i.h.bf16 %v10804_v14  ;;  %v10805_v15 = vunpack.i.l.bf16 %v10804_v14  ;;  %9716 = vmatmul.mubr.msk.f32.vlgmr.msra.gmra.mrb[16].mxu0 %vm668_vm1, %v11994_v38  ;;  %10386 = vmatprep.subr.msk.bf16.mxu0 %vm12058_vm2, %v10384_v13 }
 0x3cb   :  { %10389 = vmatpush3.bf16.xpose.msk.msra.mxu0 %vm12058_vm2, %v10384_v13  ;;  %9729 = vmatprep.mubr.msk.f32.mxu0 %vm668_vm1, %v12018_v36  ;;  %v660_v13 = vld [vmem:[%s14411_s8] sm:$0xff] }
 0x3cc   :  { %v10390_v19 = vpack.c.bf16 %v10806_v10, %v10805_v15 }
 0x3cd   :  { %v10809_v18 = vpop.permute.xlu1 %10808  ;;  %v10814_v16 = vpop.permute.xlu0 %10813 }
 0x3ce   :  { %v10811_v33 = vunpack.i.h.bf16 %v10809_v18  ;;  %v10810_v23 = vunpack.i.l.bf16 %v10809_v18  ;;  %9709 = vmatmul.mubr.msk.f32.vlgmr.msra.gmra.mrb[20].mxu1 %vm668_vm1, %v11984_v29  ;;  %v10816_v34 = vunpack.i.h.bf16 %v10814_v16  ;;  %v10815_v25 = vunpack.i.l.bf16 %v10814_v16 }
 0x3cf   :  { %10383 = vmatpush3.bf16.xpose.msk.msra.mxu1 %vm12058_vm2, %v10378_v6  ;;  %9722 = vmatprep.mubr.msk.f32.mxu1 %vm668_vm1, %v12008_v48 }
 0x3d0   :  { %v10396_v28 = vpack.c.bf16 %v10811_v33, %v10810_v23  ;;  %10392 = vmatprep.subr.msk.bf16.mxu1 %vm12058_vm2, %v10390_v19  ;;  %v10402_v35 = vpack.c.bf16 %v10816_v34, %v10815_v25 }
 0x3d1   :  { %v10819_v30 = vpop.permute.xlu1 %10818 }
 0x3d2   :  { %9730 = vmatmul.mubr.msk.f32.vlgmr.msra.gmra.mrb[18].mxu0 %vm668_vm1, %v12016_v60  ;;  %10398 = vmatprep.subr.msk.bf16.mxu0 %vm12058_vm2, %v10396_v28  ;;  %v10821_v4 = vunpack.i.h.bf16 %v10819_v30  ;;  %v10820_v6 = vunpack.i.l.bf16 %v10819_v30 }
 0x3d3   :  { %10401 = vmatpush3.bf16.xpose.msk.msra.mxu0 %vm12058_vm2, %v10396_v28  ;;  %9743 = vmatprep.mubr.msk.f32.mxu0 %vm668_vm1, %v12038_v12 }
 0x3d4   :  { %v12122_v11 = vpack.c.bf16 %v10821_v4, %v10820_v6 }
 0x3d5   :  { %v10824_v42 = vpop.permute.xlu1 %10823 }
 0x3d6   :  { %v10826_v46 = vunpack.i.h.bf16 %v10824_v42  ;;  %v10825_v50 = vunpack.i.l.bf16 %v10824_v42  ;;  %9723 = vmatmul.mubr.msk.f32.vlgmr.msra.gmra.mrb[22].mxu1 %vm668_vm1, %v12006_v45 }
 0x3d7   :  { %10395 = vmatpush3.bf16.xpose.msk.msra.mxu1 %vm12058_vm2, %v10390_v19  ;;  %9736 = vmatprep.mubr.msk.f32.mxu1 %vm668_vm1, %v12028_v52 }
 0x3d8   :  { %10403 = vmatprep.subr.bf16.mxu1 %v10402_v35  ;;  %v10410_v62 = vpack.c.bf16 %v10826_v46, %v10825_v50 }
 0x3da   :  { %9744 = vmatmul.mubr.msk.f32.vlgmr.msra.gmra.mrb[20].mxu0 %vm668_vm1, %v12036_v9  ;;  %10411 = vmatprep.subr.bf16.mxu0 %v10410_v62 }
 0x3db   :  { %10413 = vmatpush3.bf16.msra.mxu0 %v10410_v62 }
 0x3de   :  { %9737 = vmatmul.mubr.msk.f32.vlgmr.msra.gmra.mrb[24].mxu1 %vm668_vm1, %v12026_v2 }
 0x3df   :  { %10405 = vmatpush3.bf16.msra.mxu1 %v10402_v35 }
 0x3e0   :  { %10407 = vmatprep.subr.bf16.mxu1 %v12122_v11 }
 0x491   :  { %v9696_v14 = vpop.f32.mrb[16].mxu1 }
 0x492   :  { %v12131_v10 = vadd.f32 %v9696_v14, %v661_v8  ;;  %v743_v15 = vpop.f32.mrb[17].mxu1 }
 0x493   :  { %v12133_v18 = vadd.f32 %v743_v15, %v660_v13 }
 0x494   :  { %v1379_v19 = vsel %vm1375_vm3, %v12131_v10, -inf }
 0x495   :  { %1380 = vmax.xlane.f32.xlu1 %v1379_v19  ;;  %v1376_v33 = vsel %vm1375_vm3, %v12133_v18, -inf }
 0x496   :  { %1377 = vmax.xlane.f32.xlu0 %v1376_v33 }
 0x499   :  { %v9703_v23 = vpop.f32.mrb[18].mxu1 }
 0x49a   :  { %v12139_v16 = vadd.f32 %v9703_v23, %v661_v8  ;;  %v832_v28 = vpop.f32.mrb[19].mxu1 }
 0x49b   :  { %v12141_v30 = vadd.f32 %v832_v28, %v660_v13 }
 0x49c   :  { %v1385_v34 = vsel %vm1375_vm3, %v12139_v16, -inf }
 0x49d   :  { %v9717_v25 = vpop.f32.mrb[16].mxu0  ;;  %1386 = vmax.xlane.f32.xlu0 %v1385_v34  ;;  %v1382_v50 = vsel %vm1375_vm3, %v12141_v30, -inf }
 0x49e   :  { %v1010_v42 = vpop.f32.mrb[17].mxu0  ;;  %v12145_v46 = vadd.f32 %v9717_v25, %v661_v8 }
 0x49f   :  { %v12151_v6 = vadd.f32 %v1010_v42, %v660_v13 }
 0x4a0   :  { %v1397_v15 = vsel %vm1375_vm3, %v12145_v46, -inf }
 0x4a1   :  { %v9710_v35 = vpop.f32.mrb[20].mxu1  ;;  %1383 = vmax.xlane.f32.xlu0 %v1382_v50  ;;  %v1394_v25 = vsel %vm1375_vm3, %v12151_v6, -inf }
 0x4a2   :  { %v12149_v62 = vadd.f32 %v9710_v35, %v661_v8  ;;  %v921_v4 = vpop.f32.mrb[21].mxu1 }
 0x4a3   :  { %v12161_v34 = vadd.f32 %v921_v4, %v660_v13 }
 0x4a4   :  { %v1391_v14 = vsel %vm1375_vm3, %v12149_v62, -inf }
 0x4a5   :  { %v9731_v19 = vpop.f32.mrb[18].mxu0  ;;  %1392 = vmax.xlane.f32.xlu1 %v1391_v14  ;;  %1398 = vmax.xlane.f32.xlu0 %v1397_v15  ;;  %v1388_v14 = vsel %vm1375_vm3, %v12161_v34, -inf }
 0x4a6   :  { %v12157_v33 = vadd.f32 %v9731_v19, %v661_v8  ;;  %v1188_v23 = vpop.f32.mrb[19].mxu0 }
 0x4a7   :  { %v12159_v28 = vadd.f32 %v1188_v23, %v660_v13 }
 0x4a9   :  { %v9724_v42 = vpop.f32.mrb[22].mxu1  ;;  %1395 = vmax.xlane.f32.xlu0 %v1394_v25 }
 0x4aa   :  { %v12165_v50 = vadd.f32 %v9724_v42, %v661_v8  ;;  %v1099_v35 = vpop.f32.mrb[23].mxu1  ;;  %v1409_v42 = vsel %vm1375_vm3, %v12157_v33, -inf }
 0x4ab   :  { %v12167_v5 = vadd.f32 %v1099_v35, %v660_v13 }
 0x4ac   :  { %v1403_v35 = vsel %vm1375_vm3, %v12165_v50, -inf }
 0x4ad   :  { %v9745_v15 = vpop.f32.mrb[20].mxu0  ;;  %1389 = vmax.xlane.f32.xlu0 %v1388_v14 }
 0x4ae   :  { %v12171_v19 = vadd.f32 %v9745_v15, %v661_v8  ;;  %v1366_v23 = vpop.f32.mrb[21].mxu0 }
 0x4af   :  { %v12173_v4 = vadd.f32 %v1366_v23, %v660_v13  ;;  %v12207_v23 = vpop.permute.xlu1 %10828 }
 0x4b0   :  { %v10831_v21 = vunpack.i.h.bf16 %v12207_v23 }
 0x4b1   :  { %v9738_v3 = vpop.f32.mrb[24].mxu1 }
 0x4b2   :  { %v12175_v1 = vadd.f32 %v9738_v3, %v661_v8  ;;  %v1277_v63 = vpop.f32.mrb[25].mxu1  ;;  %v1400_v3 = vsel %vm1375_vm3, %v12167_v5, -inf  ;;  %v1421_v8 = vsel %vm1375_vm3, %v12171_v19, -inf }
 0x4b3   :  { %v12177_v25 = vadd.f32 %v1277_v63, %v660_v13  ;;  %v1406_v63 = vsel %vm1375_vm3, %v12159_v28, -inf  ;;  %v1418_v13 = vsel %vm1375_vm3, %v12173_v4, -inf }
 0x4b4   :  { %v1415_v14 = vsel %vm1375_vm3, %v12175_v1, -inf }
 0x4b5   :  { %v1412_v15 = vsel %vm1375_vm3, %v12177_v25, -inf }
 0x4b6   :  { %10838 = vrot.lane.b32.xlu1 %v12024_v0, %s11554_s21 }
 0x4c3   :  { %10833 = vrot.lane.b32.xlu0 %v12014_v58, %s11554_s21 }
 0x4da   :  { %1410 = vmax.xlane.f32.xlu1 %v1409_v42 }
 0x4de   :  { %1404 = vmax.xlane.f32.xlu1 %v1403_v35 }
 0x4e2   :  { %1401 = vmax.xlane.f32.xlu1 %v1400_v3  ;;  %1407 = vmax.xlane.f32.xlu0 %v1406_v63 }
 0x4e6   :  { %1422 = vmax.xlane.f32.xlu1 %v1421_v8  ;;  %1419 = vmax.xlane.f32.xlu0 %v1418_v13 }
 0x4ea   :  { %1416 = vmax.xlane.f32.xlu1 %v1415_v14  ;;  %1413 = vmax.xlane.f32.xlu0 %v1412_v15 }
 0x4fb   :  { %10848 = vrot.lane.b32.xlu1 %v12044_v7, %s11554_s21 }
 0x4ff   :  { %10858 = vrot.lane.b32.xlu1 %v11982_v17, %s11555_s30 }
 0x500   :  { %10843 = vrot.lane.b32.xlu0 %v12034_v54, %s11554_s21 }
 0x504   :  { %10853 = vrot.lane.b32.xlu0 %v11972_v56, %s11555_s30 }
 0x522   :  { %v1381_v42 = vpop.xlane.xlu1 %1380 }
 0x523   :  { %v1425_v35 = vsub.f32 %v12131_v10, %v1381_v42  ;;  %v1378_v3 = vpop.xlane.xlu0 %1377 }
 0x524   :  { %v1424_v63 = vsub.f32 %v12133_v18, %v1378_v3 }
 0x525   :  { %v1442_v8 = vmul.f32 1.442695, %v1425_v35 }
 0x526   :  { %v1440_v13 = vmul.f32 1.442695, %v1424_v63 }
 0x527   :  { %11124 = vpow2.f32 %v1442_v8 }
 0x528   :  { %11126 = vpow2.f32 %v1440_v13 }
 0x52a   :  { %v1387_v14 = vpop.xlane.xlu0 %1386 }
 0x52b   :  { %v1427_v15 = vsub.f32 %v12139_v16, %v1387_v14 }
 0x52d   :  { %v1446_v61 = vmul.f32 1.442695, %v1427_v15 }
 0x52e   :  { %v1384_v59 = vpop.xlane.xlu0 %1383 }
 0x52f   :  { %11128 = vpow2.f32 %v1446_v61  ;;  %v1426_v57 = vsub.f32 %v12141_v30, %v1384_v59 }
 0x531   :  { %v12213_v55 = vpop.eup %11124  ;;  %v1444_v53 = vmul.f32 1.442695, %v1426_v57 }
 0x532   :  { %v12215_v51 = vpop.eup %11126  ;;  %v1393_v10 = vpop.xlane.xlu1 %1392  ;;  %v1475_v18 = vsel %vm1375_vm3, %v12213_v55, 0.0 }
 0x533   :  { %v1399_v42 = vpop.xlane.xlu0 %1398  ;;  %11130 = vpow2.f32 %v1444_v53  ;;  %v1429_v35 = vsub.f32 %v12149_v62, %v1393_v10  ;;  %1476 = vadd.xlane.f32.xlu1 %v1475_v18  ;;  %v1472_v61 = vsel %vm1375_vm3, %v12215_v51, 0.0 }
 0x534   :  { %v1431_v16 = vsub.f32 %v12145_v46, %v1399_v42  ;;  %1473 = vadd.xlane.f32.xlu0 %v1472_v61 }
 0x535   :  { %v1450_v59 = vmul.f32 1.442695, %v1429_v35 }
 0x536   :  { %v1454_v30 = vmul.f32 1.442695, %v1431_v16 }
 0x537   :  { %v1396_v57 = vpop.xlane.xlu0 %1395  ;;  %11132 = vpow2.f32 %v1450_v59 }
 0x538   :  { %v1430_v3 = vsub.f32 %v12151_v6, %v1396_v57  ;;  %11134 = vpow2.f32 %v1454_v30 }
 0x539   :  { %v12224_v63 = vpop.eup %11128 }
 0x53a   :  { %v1452_v8 = vmul.f32 1.442695, %v1430_v3  ;;  %v1481_v62 = vsel %vm1375_vm3, %v12224_v63, 0.0 }
 0x53b   :  { %v1390_v53 = vpop.xlane.xlu0 %1389  ;;  %1482 = vadd.xlane.f32.xlu0 %v1481_v62 }
 0x53c   :  { %11136 = vpow2.f32 %v1452_v8  ;;  %v1428_v46 = vsub.f32 %v12161_v34, %v1390_v53  ;;  %v12252_v8 = vpop.permute.xlu1 %10838 }
 0x53d   :  { %v12229_v13 = vpop.eup %11130 }
 0x53e   :  { %v1448_v14 = vmul.f32 1.442695, %v1428_v46  ;;  %v1478_v10 = vsel %vm1375_vm3, %v12229_v13, 0.0 }
 0x53f   :  { %v10834_v15 = vpop.permute.xlu0 %10833  ;;  %1479 = vadd.xlane.f32.xlu0 %v1478_v10 }
 0x540   :  { %11138 = vpow2.f32 %v1448_v14  ;;  %v10836_v6 = vunpack.i.h.bf16 %v10834_v15  ;;  %v10835_v42 = vunpack.i.l.bf16 %v10834_v15 }
 0x541   :  { %v12233_v18 = vpop.eup %11132 }
 0x542   :  { %v12235_v35 = vpack.c.bf16 %v10836_v6, %v10835_v42  ;;  %v12237_v16 = vpop.eup %11134  ;;  %v1487_v34 = vsel %vm1375_vm3, %v12233_v18, 0.0 }
 0x543   :  { %1488 = vadd.xlane.f32.xlu1 %v1487_v34  ;;  %v1493_v61 = vsel %vm1375_vm3, %v12237_v16, 0.0 }
 0x544   :  { %10419 = vmatprep.subr.bf16.mxu0 %v12235_v35  ;;  %1494 = vadd.xlane.f32.xlu0 %v1493_v61 }
 0x546   :  { %v12244_v59 = vpop.eup %11136 }
 0x547   :  { %v1490_v30 = vsel %vm1375_vm3, %v12244_v59, 0.0 }
 0x548   :  { %1491 = vadd.xlane.f32.xlu0 %v1490_v30 }
 0x54a   :  { %v12248_v57 = vpop.eup %11138 }
 0x54b   :  { %v1484_v3 = vsel %vm1375_vm3, %v12248_v57, 0.0 }
 0x54c   :  { %1485 = vadd.xlane.f32.xlu1 %v1484_v3 }
 0x567   :  { %v1411_v53 = vpop.xlane.xlu1 %1410 }
 0x568   :  { %v1435_v62 = vsub.f32 %v12157_v33, %v1411_v53 }
 0x56a   :  { %v1462_v46 = vmul.f32 1.442695, %v1435_v62 }
 0x56b   :  { %v1405_v14 = vpop.xlane.xlu1 %1404 }
 0x56c   :  { %11140 = vpow2.f32 %v1462_v46  ;;  %v1433_v15 = vsub.f32 %v12165_v50, %v1405_v14 }
 0x56e   :  { %v1458_v10 = vmul.f32 1.442695, %v1433_v15 }
 0x56f   :  { %v1402_v6 = vpop.xlane.xlu1 %1401  ;;  %v1408_v42 = vpop.xlane.xlu0 %1407 }
 0x570   :  { %11142 = vpow2.f32 %v1458_v10  ;;  %v1432_v34 = vsub.f32 %v12167_v5, %v1402_v6  ;;  %v1434_v61 = vsub.f32 %v12159_v28, %v1408_v42 }
 0x572   :  { %v1456_v30 = vmul.f32 1.442695, %v1432_v34  ;;  %v1460_v3 = vmul.f32 1.442695, %v1434_v61 }
 0x573   :  { %v1423_v49 = vpop.xlane.xlu1 %1422  ;;  %v1420_v47 = vpop.xlane.xlu0 %1419 }
 0x574   :  { %11144 = vpow2.f32 %v1456_v30  ;;  %v1439_v33 = vsub.f32 %v12171_v19, %v1423_v49  ;;  %v1438_v53 = vsub.f32 %v12173_v4, %v1420_v47 }
 0x575   :  { %11146 = vpow2.f32 %v1460_v3 }
 0x576   :  { %v12260_v62 = vpop.eup %11140  ;;  %v1470_v50 = vmul.f32 1.442695, %v1439_v33  ;;  %v1468_v46 = vmul.f32 1.442695, %v1438_v53 }
 0x577   :  { %v1417_v14 = vpop.xlane.xlu1 %1416  ;;  %v1414_v15 = vpop.xlane.xlu0 %1413  ;;  %v1505_v5 = vsel %vm1375_vm3, %v12260_v62, 0.0 }
 0x578   :  { %11148 = vpow2.f32 %v1470_v50  ;;  %v1437_v28 = vsub.f32 %v12175_v1, %v1417_v14  ;;  %v1436_v10 = vsub.f32 %v12177_v25, %v1414_v15  ;;  %1506 = vadd.xlane.f32.xlu1 %v1505_v5 }
 0x579   :  { %11150 = vpow2.f32 %v1468_v46 }
 0x57a   :  { %v12266_v49 = vpop.eup %11142  ;;  %v1466_v47 = vmul.f32 1.442695, %v1437_v28  ;;  %v1464_v19 = vmul.f32 1.442695, %v1436_v10 }
 0x57b   :  { %v1499_v4 = vsel %vm1375_vm3, %v12266_v49, 0.0  ;;  %v12322_v14 = vpop.permute.xlu1 %10848  ;;  %v12324_v15 = vpop.permute.xlu0 %10843 }
 0x57c   :  { %11152 = vpow2.f32 %v1466_v47  ;;  %1500 = vadd.xlane.f32.xlu1 %v1499_v4 }
 0x57d   :  { %11154 = vpow2.f32 %v1464_v19 }
 0x57e   :  { %v12270_v6 = vpop.eup %11144 }
 0x57f   :  { %v12272_v42 = vpop.eup %11146  ;;  %v1496_v1 = vsel %vm1375_vm3, %v12270_v6, 0.0  ;;  %v12330_v5 = vpop.permute.xlu1 %10858 }
 0x580   :  { %1497 = vadd.xlane.f32.xlu1 %v1496_v1  ;;  %v1502_v25 = vsel %vm1375_vm3, %v12272_v42, 0.0  ;;  %v12334_v28 = vpop.permute.xlu0 %10853 }
 0x581   :  { %1503 = vadd.xlane.f32.xlu0 %v1502_v25 }
 0x582   :  { %v12278_v34 = vpop.eup %11148 }
 0x583   :  { %v12280_v61 = vpop.eup %11150  ;;  %v1517_v30 = vsel %vm1375_vm3, %v12278_v34, 0.0 }
 0x584   :  { %1518 = vadd.xlane.f32.xlu1 %v1517_v30  ;;  %v1514_v3 = vsel %vm1375_vm3, %v12280_v61, 0.0 }
 0x585   :  { %1515 = vadd.xlane.f32.xlu0 %v1514_v3 }
 0x586   :  { %v12286_v33 = vpop.eup %11152 }
 0x587   :  { %v12288_v53 = vpop.eup %11154  ;;  %v1511_v50 = vsel %vm1375_vm3, %v12286_v33, 0.0 }
 0x588   :  { %1512 = vadd.xlane.f32.xlu1 %v1511_v50  ;;  %v1508_v46 = vsel %vm1375_vm3, %v12288_v53, 0.0 }
 0x589   :  { %1509 = vadd.xlane.f32.xlu0 %v1508_v46 }
 0x599   :  { %2299 = vrot.lane.b32.xlu1 %v11966_v22, %s11556_s11 }
 0x59d   :  { %10868 = vrot.lane.b32.xlu1 %v12004_v26, %s11555_s30 }
 0x59f   :  { %10863 = vrot.lane.b32.xlu0 %v11992_v37, %s11555_s30 }
 0x5a1   :  { %2392 = vrot.lane.b32.xlu1 %v11974_v24, %s11556_s11 }
 0x5a3   :  { %2301 = vrot.lane.b32.xlu0 %v11964_v32, %s11556_s11 }
 0x5a5   :  { %2481 = vrot.lane.b32.xlu1 %v11986_v31, %s11556_s11 }
 0x5a7   :  { %2390 = vrot.lane.b32.xlu0 %v11976_v27, %s11556_s11 }
 0x5a9   :  { %10878 = vrot.lane.b32.xlu1 %v12024_v0, %s11555_s30 }
 0x5ab   :  { %10873 = vrot.lane.b32.xlu0 %v12014_v58, %s11555_s30 }
 0x5ad   :  { %2574 = vrot.lane.b32.xlu1 %v11994_v38, %s11556_s11 }
 0x5af   :  { %2483 = vrot.lane.b32.xlu0 %v11984_v29, %s11556_s11 }
 0x5b1   :  { %10883 = vrot.lane.b32.xlu1 %v12034_v54, %s11555_s30 }
 0x5b3   :  { %2572 = vrot.lane.b32.xlu0 %v11996_v39, %s11556_s11 }
 0x5b5   :  { %2754 = vrot.lane.b32.xlu1 %v12018_v36, %s11556_s11 }
 0x5b7   :  { %2663 = vrot.lane.b32.xlu0 %v12008_v48, %s11556_s11 }
 0x5b9   :  { %2756 = vrot.lane.b32.xlu1 %v12016_v60, %s11556_s11 }
 0x5bb   :  { %2665 = vrot.lane.b32.xlu0 %v12006_v45, %s11556_s11 }
 0x5bd   :  { %2847 = vrot.lane.b32.xlu1 %v12026_v2, %s11556_s11 }
 0x5bf   :  { %10888 = vrot.lane.b32.xlu0 %v12044_v7, %s11555_s30 }
 0x5c0   :  { %v1477_v10 = vpop.xlane.xlu1 %1476 }
 0x5c1   :  { %11156 = vrcp.f32 %v1477_v10  ;;  %2938 = vrot.lane.b32.xlu1 %v12036_v9, %s11556_s11  ;;  %v1474_v47 = vpop.xlane.xlu0 %1473 }
 0x5c2   :  { %11158 = vrcp.f32 %v1474_v47 }
 0x5c3   :  { %2845 = vrot.lane.b32.xlu0 %v12028_v52, %s11556_s11 }
 0x5c5   :  { %10898 = vrot.lane.b32.xlu1 %v11982_v17, %s11557_s13 }
 0x5c7   :  { %2936 = vrot.lane.b32.xlu0 %v12038_v12, %s11556_s11 }
 0x5c8   :  { %v1483_v19 = vpop.xlane.xlu0 %1482 }
 0x5c9   :  { %11160 = vrcp.f32 %v1483_v19  ;;  %10903 = vrot.lane.b32.xlu1 %v11992_v37, %s11557_s13 }
 0x5cb   :  { %v11157_v4 = vpop.eup %11156  ;;  %10893 = vrot.lane.b32.xlu0 %v11972_v56, %s11557_s13 }
 0x5cc   :  { %v11159_v1 = vpop.eup %11158  ;;  %v1537_v25 = vmul.f32 %v11157_v4, %v1477_v10  ;;  %v1480_v30 = vpop.xlane.xlu0 %1479  ;;  %v10830_v10 = vunpack.i.l.bf16 %v12207_v23 }
 0x5cd   :  { %v1536_v3 = vmul.f32 %v11159_v1, %v1474_v47  ;;  %11162 = vrcp.f32 %v1480_v30  ;;  %10908 = vrot.lane.b32.xlu1 %v12004_v26, %s11557_s13 }
 0x5ce   :  { %v1553_v50 = vsub.f32 2.0, %v1537_v25 }
 0x5cf   :  { %v1552_v46 = vsub.f32 2.0, %v1536_v3 }
 0x5d0   :  { %v1569_v44 = vmul.f32 %v11157_v4, %v1553_v50  ;;  %v1489_v43 = vpop.xlane.xlu1 %1488  ;;  %v10414_v4 = vpack.c.bf16 %v10831_v21, %v10830_v10 }
 0x5d1   :  { %v1568_v41 = vmul.f32 %v11159_v1, %v1552_v46  ;;  %11164 = vrcp.f32 %v1489_v43  ;;  %v1495_v40 = vpop.xlane.xlu0 %1494 }
 0x5d2   :  { %11166 = vrcp.f32 %v1495_v40  ;;  %v1585_v47 = vmul.f32 %v12213_v55, %v1569_v44 }
 0x5d3   :  { %v11161_v12 = vpop.eup %11160  ;;  %v1584_v52 = vmul.f32 %v12215_v51, %v1568_v41 }
 0x5d4   :  { %v1539_v9 = vmul.f32 %v11161_v12, %v1483_v19  ;;  %v10841_v19 = vunpack.i.h.bf16 %v12252_v8 }
 0x5d5   :  { %v1492_v45 = vpop.xlane.xlu0 %1491  ;;  %9750 = vmatprep.mubr.msk.f32.mxu1 %vm1375_vm3, %v1584_v52  ;;  %v10840_v52 = vunpack.i.l.bf16 %v12252_v8 }
 0x5d6   :  { %11168 = vrcp.f32 %v1492_v45  ;;  %9751 = vmatmul.mubr.msk.f32.vlgmr.msra.gmra.mrb[26].mxu1 %vm1375_vm3, %v1585_v47  ;;  %v1555_v25 = vsub.f32 2.0, %v1539_v9 }
 0x5d7   :  { %v11163_v1 = vpop.eup %11162  ;;  %10409 = vmatpush3.bf16.msra.mxu1 %v12122_v11 }
 0x5d8   :  { %v1538_v3 = vmul.f32 %v11163_v1, %v1480_v30  ;;  %10415 = vmatprep.subr.bf16.mxu1 %v10414_v4  ;;  %v1571_v51 = vmul.f32 %v11161_v12, %v1555_v25  ;;  %v10422_v12 = vpack.c.bf16 %v10841_v19, %v10840_v52  ;;  %v10845_v19 = vunpack.i.l.bf16 %v12324_v15 }
 0x5d9   :  { %v1486_v23 = vpop.xlane.xlu1 %1485 }
 0x5da   :  { %11170 = vrcp.f32 %v1486_v23  ;;  %v1554_v50 = vsub.f32 2.0, %v1538_v3  ;;  %v1587_v9 = vmul.f32 %v12224_v63, %v1571_v51 }
 0x5db   :  { %v11165_v41 = vpop.eup %11164 }
 0x5dc   :  { %v11167_v44 = vpop.eup %11166  ;;  %v1570_v55 = vmul.f32 %v11163_v1, %v1554_v50  ;;  %v1541_v10 = vmul.f32 %v11165_v41, %v1489_v43  ;;  %v10850_v43 = vunpack.i.l.bf16 %v12322_v14 }
 0x5dd   :  { %v1543_v46 = vmul.f32 %v11167_v44, %v1495_v40 }
 0x5de   :  { %v1586_v21 = vmul.f32 %v12229_v13, %v1570_v55  ;;  %v1557_v25 = vsub.f32 2.0, %v1541_v10  ;;  %v10851_v13 = vunpack.i.h.bf16 %v12322_v14 }
 0x5df   :  { %v1559_v30 = vsub.f32 2.0, %v1543_v46 }
 0x5e0   :  { %v11169_v11 = vpop.eup %11168  ;;  %9757 = vmatprep.mubr.msk.f32.mxu1 %vm1375_vm3, %v1586_v21  ;;  %v1573_v51 = vmul.f32 %v11165_v41, %v1557_v25 }
 0x5e1   :  { %v1542_v47 = vmul.f32 %v11169_v11, %v1492_v45  ;;  %9758 = vmatmul.mubr.msk.f32.vlgmr.msra.gmra.mrb[28].mxu1 %vm1375_vm3, %v1587_v9  ;;  %v1575_v8 = vmul.f32 %v11167_v44, %v1559_v30 }
 0x5e2   :  { %10417 = vmatpush3.bf16.msra.mxu1 %v10414_v4  ;;  %v10846_v4 = vunpack.i.h.bf16 %v12324_v15  ;;  %v1589_v14 = vmul.f32 %v12233_v18, %v1573_v51 }
 0x5e3   :  { %v1558_v3 = vsub.f32 2.0, %v1542_v47  ;;  %10423 = vmatprep.subr.bf16.mxu1 %v10422_v12  ;;  %v1591_v45 = vmul.f32 %v12237_v16, %v1575_v8 }
 0x5e4   :  { %v11171_v1 = vpop.eup %11170  ;;  %v12382_v16 = vpack.c.bf16 %v10846_v4, %v10845_v19  ;;  %v10856_v19 = vunpack.i.h.bf16 %v12334_v28 }
 0x5e5   :  { %v1540_v40 = vmul.f32 %v11171_v1, %v1486_v23  ;;  %v1574_v50 = vmul.f32 %v11169_v11, %v1558_v3  ;;  %v12375_v23 = vpack.c.bf16 %v10851_v13, %v10850_v43 }
 0x5e7   :  { %v1556_v63 = vsub.f32 2.0, %v1540_v40  ;;  %v1590_v55 = vmul.f32 %v12244_v59, %v1574_v50 }
 0x5e9   :  { %v1572_v46 = vmul.f32 %v11171_v1, %v1556_v63  ;;  %9771 = vmatprep.mubr.msk.f32.mxu1 %vm1375_vm3, %v1590_v55 }
 0x5ea   :  { %9772 = vmatmul.mubr.msk.f32.vlgmr.msra.gmra.mrb[30].mxu1 %vm1375_vm3, %v1591_v45 }
 0x5eb   :  { %v1588_v44 = vmul.f32 %v12248_v57, %v1572_v46  ;;  %10425 = vmatpush3.bf16.msra.mxu1 %v10422_v12 }
 0x5ec   :  { %10431 = vmatprep.subr.bf16.mxu1 %v12375_v23 }
 0x5ed   :  { %9764 = vmatprep.mubr.msk.f32.mxu0 %vm1375_vm3, %v1588_v44  ;;  %v10855_v44 = vunpack.i.l.bf16 %v12334_v28 }
 0x5ee   :  { %9765 = vmatmul.mubr.msk.f32.vlgmr.msra.gmra.mrb[22].mxu0 %vm1375_vm3, %v1589_v14 }
 0x5ef   :  { %10421 = vmatpush3.bf16.msra.mxu0 %v12235_v35 }
 0x5f0   :  { %10427 = vmatprep.subr.bf16.mxu0 %v12382_v16 }
 0x605   :  { %v1507_v59 = vpop.xlane.xlu1 %1506 }
 0x606   :  { %11172 = vrcp.f32 %v1507_v59 }
 0x609   :  { %v1501_v15 = vpop.xlane.xlu1 %1500 }
 0x60a   :  { %11174 = vrcp.f32 %v1501_v15 }
 0x60d   :  { %v1498_v57 = vpop.xlane.xlu1 %1497 }
 0x60e   :  { %11176 = vrcp.f32 %v1498_v57  ;;  %v1504_v18 = vpop.xlane.xlu0 %1503 }
 0x60f   :  { %11178 = vrcp.f32 %v1504_v18 }
 0x610   :  { %v11173_v52 = vpop.eup %11172 }
 0x611   :  { %v1519_v41 = vpop.xlane.xlu1 %1518  ;;  %v1547_v30 = vmul.f32 %v11173_v52, %v1507_v59 }
 0x612   :  { %11180 = vrcp.f32 %v1519_v41  ;;  %v1516_v21 = vpop.xlane.xlu0 %1515 }
 0x613   :  { %11182 = vrcp.f32 %v1516_v21  ;;  %v1563_v8 = vsub.f32 2.0, %v1547_v30 }
 0x614   :  { %v11175_v9 = vpop.eup %11174 }
 0x615   :  { %v1545_v10 = vmul.f32 %v11175_v9, %v1501_v15  ;;  %v1513_v11 = vpop.xlane.xlu1 %1512  ;;  %v1579_v14 = vmul.f32 %v11173_v52, %v1563_v8 }
 0x616   :  { %11184 = vrcp.f32 %v1513_v11  ;;  %v1510_v35 = vpop.xlane.xlu0 %1509 }
 0x617   :  { %v1561_v12 = vsub.f32 2.0, %v1545_v10  ;;  %11186 = vrcp.f32 %v1510_v35  ;;  %v1595_v8 = vmul.f32 %v12260_v62, %v1579_v14 }
 0x618   :  { %v11177_v47 = vpop.eup %11176 }
 0x619   :  { %v1544_v1 = vmul.f32 %v11177_v47, %v1498_v57  ;;  %v12386_v25 = vpop.permute.xlu1 %2299  ;;  %v11179_v3 = vpop.eup %11178  ;;  %v1577_v63 = vmul.f32 %v11175_v9, %v1561_v12  ;;  %v10860_v9 = vunpack.i.l.bf16 %v12330_v5 }
 0x61a   :  { %v1546_v50 = vmul.f32 %v11179_v3, %v1504_v18  ;;  %v10864_v13 = vpop.permute.xlu0 %10863 }
 0x61b   :  { %v1560_v40 = vsub.f32 2.0, %v1544_v1  ;;  %v10861_v1 = vunpack.i.h.bf16 %v12330_v5 }
 0x61c   :  { %v11181_v43 = vpop.eup %11180  ;;  %v1562_v55 = vsub.f32 2.0, %v1546_v50 }
 0x61d   :  { %v1576_v51 = vmul.f32 %v11177_v47, %v1560_v40  ;;  %v1551_v45 = vmul.f32 %v11181_v43, %v1519_v41  ;;  %v10869_v46 = vpop.permute.xlu1 %10868  ;;  %v11183_v4 = vpop.eup %11182  ;;  %v1593_v41 = vmul.f32 %v12266_v49, %v1577_v63  ;;  %v10440_v5 = vpack.c.bf16 %v10861_v1, %v10860_v9 }
 0x61e   :  { %v1578_v59 = vmul.f32 %v11179_v3, %v1562_v55  ;;  %v1550_v57 = vmul.f32 %v11183_v4, %v1516_v21  ;;  %v2302_v10 = vpop.permute.xlu0 %2301  ;;  %v10434_v21 = vpack.c.bf16 %v10856_v19, %v10855_v44  ;;  %v10866_v55 = vunpack.i.h.bf16 %v10864_v13 }
 0x61f   :  { %v1567_v15 = vsub.f32 2.0, %v1551_v45  ;;  %v1592_v30 = vmul.f32 %v12270_v6, %v1576_v51  ;;  %v10865_v45 = vunpack.i.l.bf16 %v10864_v13  ;;  %v10870_v19 = vunpack.i.l.bf16 %v10869_v46 }
 0x620   :  { %v11185_v18 = vpop.eup %11184  ;;  %v1566_v12 = vsub.f32 2.0, %v1550_v57  ;;  %v1594_v52 = vmul.f32 %v12272_v42, %v1578_v59 }
 0x621   :  { %v1583_v47 = vmul.f32 %v11181_v43, %v1567_v15  ;;  %v1549_v40 = vmul.f32 %v11185_v18, %v1513_v11  ;;  %9778 = vmatprep.mubr.msk.f32.mxu0 %vm1375_vm3, %v1592_v30  ;;  %v2393_v28 = vpop.permute.xlu1 %2392  ;;  %v11187_v3 = vpop.eup %11186  ;;  %v10446_v14 = vpack.c.bf16 %v10866_v55, %v10865_v45 }
 0x622   :  { %9779 = vmatmul.mubr.msk.f32.vlgmr.msra.gmra.mrb[24].mxu0 %vm1375_vm3, %v1593_v41  ;;  %v1582_v6 = vmul.f32 %v11183_v4, %v1566_v12  ;;  %v1548_v51 = vmul.f32 %v11187_v3, %v1510_v35  ;;  %9785 = vmatprep.mubr.msk.f32.mxu1 %vm1375_vm3, %v1594_v52  ;;  %v2391_v49 = vpop.permute.xlu0 %2390  ;;  %v10871_v4 = vunpack.i.h.bf16 %v10869_v46 }
 0x623   :  { %v1565_v50 = vsub.f32 2.0, %v1549_v40  ;;  %10429 = vmatpush3.bf16.msra.mxu0 %v12382_v16  ;;  %v1599_v11 = vmul.f32 %v12278_v34, %v1583_v47  ;;  %9786 = vmatmul.mubr.msk.f32.vlgmr.msra.gmra.mrb[32].mxu1 %vm1375_vm3, %v1595_v8 }
 0x624   :  { %10436 = vmatprep.subr.msk.bf16.mxu0 %vm12058_vm2, %v10434_v21  ;;  %v1564_v62 = vsub.f32 2.0, %v1548_v51  ;;  %10433 = vmatpush3.bf16.msra.mxu1 %v12375_v23  ;;  %v1598_v35 = vmul.f32 %v12280_v61, %v1582_v6  ;;  %v10452_v59 = vpack.c.bf16 %v10871_v4, %v10870_v19 }
 0x625   :  { %v1581_v42 = vmul.f32 %v11185_v18, %v1565_v50  ;;  %v2482_v43 = vpop.permute.xlu1 %2481  ;;  %10442 = vmatprep.subr.msk.bf16.mxu1 %vm12058_vm2, %v10440_v5 }
 0x626   :  { %v1580_v63 = vmul.f32 %v11187_v3, %v1564_v62  ;;  %9799 = vmatprep.mubr.msk.f32.mxu1 %vm1375_vm3, %v1598_v35  ;;  %v10874_v16 = vpop.permute.xlu0 %10873 }
 0x627   :  { %v1597_v34 = vmul.f32 %v12286_v33, %v1581_v42  ;;  %9800 = vmatmul.mubr.msk.f32.vlgmr.msra.gmra.mrb[34].mxu1 %vm1375_vm3, %v1599_v11  ;;  %v10876_v13 = vunpack.i.h.bf16 %v10874_v16  ;;  %v10875_v46 = vunpack.i.l.bf16 %v10874_v16 }
 0x628   :  { %9813 = vmatprep.mubr.msk.f32.mxu1 %vm668_vm1, %v2391_v49  ;;  %v1596_v61 = vmul.f32 %v12288_v53, %v1580_v63 }
 0x629   :  { %v10879_v23 = vpop.permute.xlu1 %10878 }
 0x62a   :  { %v2484_v44 = vpop.permute.xlu0 %2483  ;;  %9792 = vmatprep.mubr.msk.f32.mxu0 %vm1375_vm3, %v1596_v61  ;;  %v10881_v57 = vunpack.i.h.bf16 %v10879_v23  ;;  %v10880_v30 = vunpack.i.l.bf16 %v10879_v23 }
 0x62b   :  { %9793 = vmatmul.mubr.msk.f32.vlgmr.msra.gmra.mrb[26].mxu0 %vm1375_vm3, %v1597_v34 }
 0x62c   :  { %10439 = vmatpush3.bf16.xpose.msk.msra.mxu0 %vm12058_vm2, %v10434_v21  ;;  %9806 = vmatprep.mubr.msk.f32.mxu0 %vm668_vm1, %v12386_v25  ;;  %v10458_v25 = vpack.c.bf16 %v10876_v13, %v10875_v46  ;;  %v10464_v9 = vpack.c.bf16 %v10881_v57, %v10880_v30 }
 0x62d   :  { %v2575_v33 = vpop.permute.xlu1 %2574  ;;  %10445 = vmatpush3.bf16.xpose.msk.msra.mxu1 %vm12058_vm2, %v10440_v5  ;;  %10448 = vmatprep.subr.msk.bf16.mxu0 %vm12058_vm2, %v10446_v14 }
 0x62e   :  { %10454 = vmatprep.subr.msk.bf16.mxu1 %vm12058_vm2, %v10452_v59  ;;  %v2573_v53 = vpop.permute.xlu0 %2572 }
 0x631   :  { %v10884_v15 = vpop.permute.xlu1 %10883 }
 0x632   :  { %v2664_v18 = vpop.permute.xlu0 %2663  ;;  %v10885_v47 = vunpack.i.l.bf16 %v10884_v15 }
 0x633   :  { %9807 = vmatmul.mubr.msk.f32.vlgmr.msra.gmra.mrb[28].mxu0 %vm668_vm1, %v2302_v10  ;;  %v10886_v10 = vunpack.i.h.bf16 %v10884_v15 }
 0x634   :  { %9814 = vmatmul.mubr.msk.f32.vlgmr.msra.gmra.mrb[36].mxu1 %vm668_vm1, %v2393_v28  ;;  %10451 = vmatpush3.bf16.xpose.msk.msra.mxu0 %vm12058_vm2, %v10446_v14 }
 0x635   :  { %v2755_v1 = vpop.permute.xlu1 %2754  ;;  %9820 = vmatprep.mubr.msk.f32.mxu0 %vm668_vm1, %v2482_v43  ;;  %10457 = vmatpush3.bf16.xpose.msk.msra.mxu1 %vm12058_vm2, %v10452_v59  ;;  %v10470_v3 = vpack.c.bf16 %v10886_v10, %v10885_v47  ;;  %v8977_v47 = vld [vmem:[%s14411_s8 + $0x18] sm:$0xff] }
 0x636   :  { %9827 = vmatprep.mubr.msk.f32.mxu1 %vm668_vm1, %v2573_v53  ;;  %10460 = vmatprep.subr.msk.bf16.mxu0 %vm12058_vm2, %v10458_v25  ;;  %v2666_v41 = vpop.permute.xlu0 %2665 }
 0x637   :  { %10466 = vmatprep.subr.msk.bf16.mxu1 %vm12058_vm2, %v10464_v9 }
 0x639   :  { %v2757_v12 = vpop.permute.xlu1 %2756 }
 0x63a   :  { %v10889_v40 = vpop.permute.xlu0 %10888 }
 0x63b   :  { %v10891_v28 = vunpack.i.h.bf16 %v10889_v40  ;;  %v10890_v52 = vunpack.i.l.bf16 %v10889_v40  ;;  %9821 = vmatmul.mubr.msk.f32.vlgmr.msra.gmra.mrb[30].mxu0 %vm668_vm1, %v2484_v44 }
 0x63c   :  { %9828 = vmatmul.mubr.msk.f32.vlgmr.msra.gmra.mrb[38].mxu1 %vm668_vm1, %v2575_v33  ;;  %10463 = vmatpush3.bf16.xpose.msk.msra.mxu0 %vm12058_vm2, %v10458_v25 }
 0x63d   :  { %v2848_v21 = vpop.permute.xlu1 %2847  ;;  %v10476_v8 = vpack.c.bf16 %v10891_v28, %v10890_v52  ;;  %9834 = vmatprep.mubr.msk.f32.mxu0 %vm668_vm1, %v2664_v18  ;;  %10469 = vmatpush3.bf16.xpose.msk.msra.mxu1 %vm12058_vm2, %v10464_v9 }
 0x63e   :  { %9841 = vmatprep.mubr.msk.f32.mxu1 %vm668_vm1, %v2755_v1  ;;  %10472 = vmatprep.subr.msk.bf16.mxu0 %vm12058_vm2, %v10470_v3  ;;  %v2846_v6 = vpop.permute.xlu0 %2845 }
 0x63f   :  { %10478 = vmatprep.subr.msk.bf16.mxu1 %vm12058_vm2, %v10476_v8 }
 0x641   :  { %v2939_v50 = vpop.permute.xlu1 %2938 }
 0x642   :  { %v2937_v51 = vpop.permute.xlu0 %2936 }
 0x643   :  { %9835 = vmatmul.mubr.msk.f32.vlgmr.msra.gmra.mrb[32].mxu0 %vm668_vm1, %v2666_v41 }
 0x644   :  { %9842 = vmatmul.mubr.msk.f32.vlgmr.msra.gmra.mrb[40].mxu1 %vm668_vm1, %v2757_v12  ;;  %10475 = vmatpush3.bf16.xpose.msk.msra.mxu0 %vm12058_vm2, %v10470_v3  ;;  %v8976_v3 = vld [vmem:[%s14411_s8 + $0x10] sm:$0xff] }
 0x645   :  { %v10899_v49 = vpop.permute.xlu1 %10898  ;;  %9848 = vmatprep.mubr.msk.f32.mxu0 %vm668_vm1, %v2846_v6  ;;  %10481 = vmatpush3.bf16.xpose.msk.msra.mxu1 %vm12058_vm2, %v10476_v8 }
 0x646   :  { %v10901_v5 = vunpack.i.h.bf16 %v10899_v49  ;;  %v10900_v11 = vunpack.i.l.bf16 %v10899_v49  ;;  %9855 = vmatprep.mubr.msk.f32.mxu1 %vm668_vm1, %v2937_v51  ;;  %v10894_v42 = vpop.permute.xlu0 %10893 }
 0x647   :  { %v10896_v62 = vunpack.i.h.bf16 %v10894_v42  ;;  %v10895_v43 = vunpack.i.l.bf16 %v10894_v42 }
 0x648   :  { %v10486_v35 = vpack.c.bf16 %v10901_v5, %v10900_v11 }
 0x649   :  { %v10904_v63 = vpop.permute.xlu1 %10903  ;;  %v10482_v55 = vpack.c.bf16 %v10896_v62, %v10895_v43 }
 0x64a   :  { %v10906_v16 = vunpack.i.h.bf16 %v10904_v63  ;;  %v10905_v34 = vunpack.i.l.bf16 %v10904_v63  ;;  %10487 = vmatprep.subr.bf16.mxu1 %v10486_v35 }
 0x64b   :  { %9849 = vmatmul.mubr.msk.f32.vlgmr.msra.gmra.mrb[34].mxu0 %vm668_vm1, %v2848_v21  ;;  %10483 = vmatprep.subr.bf16.mxu0 %v10482_v55 }
 0x64c   :  { %v12458_v45 = vpack.c.bf16 %v10906_v16, %v10905_v34  ;;  %9856 = vmatmul.mubr.msk.f32.vlgmr.msra.gmra.mrb[42].mxu1 %vm668_vm1, %v2939_v50  ;;  %10485 = vmatpush3.bf16.msra.mxu0 %v10482_v55 }
 0x64d   :  { %v10909_v4 = vpop.permute.xlu1 %10908  ;;  %10489 = vmatpush3.bf16.msra.mxu1 %v10486_v35 }
 0x64e   :  { %v10911_v19 = vunpack.i.h.bf16 %v10909_v4  ;;  %v10910_v23 = vunpack.i.l.bf16 %v10909_v4  ;;  %10491 = vmatprep.subr.bf16.mxu0 %v12458_v45 }
 0x650   :  { %v12462_v61 = vpack.c.bf16 %v10911_v19, %v10910_v23 }
 0x652   :  { %10495 = vmatprep.subr.bf16.mxu1 %v12462_v61 }
 0x6a9   :  { %v12465_v44 = vpop.f32.mrb[26].mxu1 }
 0x6aa   :  { %14503 = vst [vmem:[#allocation37_spill] sm:$0xff] %v12465_v44  ;;  %v12467_v14 = vpop.f32.mrb[27].mxu1 }
 0x6ab   :  { %14504 = vst [vmem:[#allocation38_spill] sm:$0xff] %v12467_v14 }
 0x6b4   :  { %v12469_v59 = vpop.f32.mrb[28].mxu1 }
 0x6b5   :  { %14505 = vst [vmem:[#allocation39_spill] sm:$0xff] %v12469_v59  ;;  %v12471_v33 = vpop.f32.mrb[29].mxu1 }
 0x6b6   :  { %14506 = vst [vmem:[#allocation40_spill] sm:$0xff] %v12471_v33 }
 0x6bd   :  { %v12473_v53 = vpop.f32.mrb[30].mxu1 }
 0x6be   :  { %14507 = vst [vmem:[#allocation41_spill] sm:$0xff] %v12473_v53  ;;  %v12475_v13 = vpop.f32.mrb[31].mxu1 }
 0x6bf   :  { %14508 = vst [vmem:[#allocation42_spill] sm:$0xff] %v12475_v13 }
 0x6c1   :  { %v12477_v46 = vpop.f32.mrb[22].mxu0 }
 0x6c2   :  { %14509 = vst [vmem:[#allocation43_spill] sm:$0xff] %v12477_v46  ;;  %v12479_v15 = vpop.f32.mrb[23].mxu0 }
 0x6c3   :  { %14510 = vst [vmem:[#allocation44_spill] sm:$0xff] %v12479_v15 }
 0x6f5   :  { %v12481_v57 = vpop.f32.mrb[24].mxu0 }
 0x6f6   :  { %14511 = vst [vmem:[#allocation45_spill] sm:$0xff] %v12481_v57  ;;  %v12483_v30 = vpop.f32.mrb[25].mxu0  ;;  %v12485_v18 = vpop.f32.mrb[32].mxu1 }
 0x6f7   :  { %14512 = vst [vmem:[#allocation46_spill] sm:$0xff] %v12483_v30  ;;  %14513 = vst [vmem:[#allocation47_spill] sm:$0xff] %v12485_v18  ;;  %v12487_v25 = vpop.f32.mrb[33].mxu1 }
 0x6f8   :  { %14514 = vst [vmem:[#allocation48_spill] sm:$0xff] %v12487_v25 }
 0x6fa   :  { %v12489_v1 = vpop.f32.mrb[34].mxu1 }
 0x6fb   :  { %14515 = vst [vmem:[#allocation49_spill] sm:$0xff] %v12489_v1  ;;  %v12491_v9 = vpop.f32.mrb[35].mxu1 }
 0x6fc   :  { %14516 = vst [vmem:[#allocation50_spill] sm:$0xff] %v12491_v9 }
 0x6fe   :  { %v12493_v41 = vpop.f32.mrb[26].mxu0 }
 0x6ff   :  { %14517 = vst [vmem:[#allocation51_spill] sm:$0xff] %v12493_v41  ;;  %v12495_v10 = vpop.f32.mrb[27].mxu0 }
 0x700   :  { %14518 = vst [vmem:[#allocation52_spill] sm:$0xff] %v12495_v10 }
 0x706   :  { %v9808_v12 = vpop.f32.mrb[28].mxu0 }
 0x707   :  { %v12500_v40 = vadd.f32 %v9808_v12, %v8977_v47  ;;  %v9815_v28 = vpop.f32.mrb[36].mxu1  ;;  %v2381_v52 = vpop.f32.mrb[29].mxu0 }
 0x708   :  { %v12505_v21 = vadd.f32 %v9815_v28, %v8977_v47  ;;  %v2472_v8 = vpop.f32.mrb[37].mxu1  ;;  %v12513_v49 = vadd.f32 %v8976_v3, %v2381_v52 }
 0x709   :  { %v3030_v6 = vsel %vm1375_vm3, %v12500_v40, -inf  ;;  %v12509_v50 = vadd.f32 %v8976_v3, %v2472_v8 }
 0x70a   :  { %v3036_v51 = vsel %vm1375_vm3, %v12505_v21, -inf  ;;  %3031 = vmax.xlane.f32.xlu1 %v3030_v6  ;;  %v3027_v34 = vsel %vm1375_vm3, %v12513_v49, -inf }
 0x70b   :  { %3037 = vmax.xlane.f32.xlu0 %v3036_v51  ;;  %v3033_v5 = vsel %vm1375_vm3, %v12509_v50, -inf }
 0x70e   :  { %v9822_v11 = vpop.f32.mrb[30].mxu0 }
 0x70f   :  { %3034 = vmax.xlane.f32.xlu0 %v3033_v5  ;;  %v12517_v42 = vadd.f32 %v9822_v11, %v8977_v47  ;;  %v9829_v62 = vpop.f32.mrb[38].mxu1  ;;  %v2563_v43 = vpop.f32.mrb[31].mxu0 }
 0x710   :  { %v2654_v35 = vpop.f32.mrb[39].mxu1  ;;  %v12521_v16 = vadd.f32 %v9829_v62, %v8977_v47  ;;  %v12535_v51 = vadd.f32 %v8976_v3, %v2563_v43 }
 0x711   :  { %v3042_v63 = vsel %vm1375_vm3, %v12517_v42, -inf  ;;  %v12525_v55 = vadd.f32 %v8976_v3, %v2654_v35 }
 0x712   :  { %3043 = vmax.xlane.f32.xlu1 %v3042_v63  ;;  %v3048_v19 = vsel %vm1375_vm3, %v12521_v16, -inf  ;;  %v3039_v62 = vsel %vm1375_vm3, %v12535_v51, -inf }
 0x713   :  { %3028 = vmax.xlane.f32.xlu0 %v3027_v34  ;;  %v3045_v5 = vsel %vm1375_vm3, %v12525_v55, -inf }
 0x716   :  { %v9836_v4 = vpop.f32.mrb[32].mxu0 }
 0x717   :  { %v12529_v23 = vadd.f32 %v9836_v4, %v8977_v47  ;;  %v9843_v12 = vpop.f32.mrb[40].mxu1  ;;  %3049 = vmax.xlane.f32.xlu0 %v3048_v19  ;;  %v2745_v28 = vpop.f32.mrb[33].mxu0 }
 0x718   :  { %v12531_v52 = vadd.f32 %v8976_v3, %v2745_v28  ;;  %v2836_v8 = vpop.f32.mrb[41].mxu1 }
 0x719   :  { %v12533_v6 = vadd.f32 %v8976_v3, %v2836_v8  ;;  %v12553_v8 = vadd.f32 %v9843_v12, %v8977_v47 }
 0x71b   :  { %3046 = vmax.xlane.f32.xlu0 %v3045_v5  ;;  %v3060_v5 = vsel %vm1375_vm3, %v12553_v8, -inf }
 0x71e   :  { %v9850_v11 = vpop.f32.mrb[34].mxu0 }
 0x71f   :  { %v12541_v35 = vadd.f32 %v9850_v11, %v8977_v47  ;;  %v9857_v63 = vpop.f32.mrb[42].mxu1  ;;  %3040 = vmax.xlane.f32.xlu0 %v3039_v62  ;;  %v2927_v34 = vpop.f32.mrb[35].mxu0  ;;  %v3054_v11 = vsel %vm1375_vm3, %v12529_v23, -inf }
 0x720   :  { %v12543_v4 = vadd.f32 %v9857_v63, %v8977_v47  ;;  %v12545_v19 = vadd.f32 %v8976_v3, %v2927_v34  ;;  %v3018_v28 = vpop.f32.mrb[43].mxu1  ;;  %v3057_v47 = vsel %vm1375_vm3, %v12533_v6, -inf }
 0x721   :  { %v12547_v43 = vadd.f32 %v8976_v3, %v3018_v28  ;;  %v3051_v3 = vsel %vm1375_vm3, %v12531_v52, -inf  ;;  %v3066_v12 = vsel %vm1375_vm3, %v12541_v35, -inf }
 0x722   :  { %v3072_v62 = vsel %vm1375_vm3, %v12543_v4, -inf  ;;  %v3063_v34 = vsel %vm1375_vm3, %v12545_v19, -inf }
 0x723   :  { %10918 = vrot.lane.b32.xlu1 %v12024_v0, %s11557_s13  ;;  %v3069_v63 = vsel %vm1375_vm3, %v12547_v43, -inf }
 0x735   :  { %10913 = vrot.lane.b32.xlu0 %v12014_v58, %s11557_s13 }
 0x747   :  { %3061 = vmax.xlane.f32.xlu1 %v3060_v5 }
 0x74b   :  { %3055 = vmax.xlane.f32.xlu1 %v3054_v11 }
 0x74f   :  { %3052 = vmax.xlane.f32.xlu1 %v3051_v3 }
 0x753   :  { %3073 = vmax.xlane.f32.xlu1 %v3072_v62 }
 0x754   :  { %3058 = vmax.xlane.f32.xlu0 %v3057_v47 }
 0x757   :  { %3067 = vmax.xlane.f32.xlu1 %v3066_v12 }
 0x758   :  { %3070 = vmax.xlane.f32.xlu0 %v3069_v63 }
 0x75c   :  { %3064 = vmax.xlane.f32.xlu0 %v3063_v34 }
 0x768   :  { %10928 = vrot.lane.b32.xlu1 %v12044_v7, %s11557_s13 }
 0x76c   :  { %10938 = vrot.lane.b32.xlu1 %v11982_v17, %s11558_s15 }
 0x772   :  { %10923 = vrot.lane.b32.xlu0 %v12034_v54, %s11557_s13 }
 0x776   :  { %10933 = vrot.lane.b32.xlu0 %v11972_v56, %s11558_s15 }
 0x797   :  { %v3032_v28 = vpop.xlane.xlu1 %3031 }
 0x798   :  { %v3038_v5 = vpop.xlane.xlu0 %3037  ;;  %v3076_v11 = vsub.f32 %v12500_v40, %v3032_v28 }
 0x799   :  { %v3078_v3 = vsub.f32 %v12505_v21, %v3038_v5 }
 0x79a   :  { %v3093_v62 = vmul.f32 1.442695, %v3076_v11 }
 0x79b   :  { %v3097_v47 = vmul.f32 1.442695, %v3078_v3 }
 0x79c   :  { %11188 = vpow2.f32 %v3093_v62  ;;  %v3035_v12 = vpop.xlane.xlu0 %3034 }
 0x79d   :  { %11190 = vpow2.f32 %v3097_v47  ;;  %v3077_v63 = vsub.f32 %v12509_v50, %v3035_v12 }
 0x79f   :  { %v3095_v34 = vmul.f32 1.442695, %v3077_v63  ;;  %v3044_v1 = vpop.xlane.xlu1 %3043 }
 0x7a0   :  { %v3080_v9 = vsub.f32 %v12517_v42, %v3044_v1  ;;  %v3029_v41 = vpop.xlane.xlu0 %3028 }
 0x7a1   :  { %11192 = vpow2.f32 %v3095_v34  ;;  %v3075_v10 = vsub.f32 %v12513_v49, %v3029_v41 }
 0x7a2   :  { %v3101_v18 = vmul.f32 1.442695, %v3080_v9 }
 0x7a3   :  { %v3091_v25 = vmul.f32 1.442695, %v3075_v10 }
 0x7a4   :  { %11194 = vpow2.f32 %v3101_v18  ;;  %v3050_v40 = vpop.xlane.xlu0 %3049 }
 0x7a5   :  { %11196 = vpow2.f32 %v3091_v25  ;;  %v3082_v21 = vsub.f32 %v12521_v16, %v3050_v40 }
 0x7a6   :  { %v12585_v28 = vpop.eup %11188 }
 0x7a7   :  { %v12587_v5 = vpop.eup %11190  ;;  %v3105_v50 = vmul.f32 1.442695, %v3082_v21  ;;  %v3126_v11 = vsel %vm1375_vm3, %v12585_v28, 0.0 }
 0x7a8   :  { %v3047_v1 = vpop.xlane.xlu0 %3046  ;;  %3127 = vadd.xlane.f32.xlu1 %v3126_v11  ;;  %v3132_v41 = vsel %vm1375_vm3, %v12587_v5, 0.0 }
 0x7a9   :  { %11198 = vpow2.f32 %v3105_v50  ;;  %v3081_v18 = vsub.f32 %v12525_v55, %v3047_v1  ;;  %3133 = vadd.xlane.f32.xlu0 %v3132_v41  ;;  %v12619_v50 = vpop.permute.xlu1 %10918 }
 0x7ab   :  { %v12594_v25 = vpop.eup %11192  ;;  %v3103_v9 = vmul.f32 1.442695, %v3081_v18 }
 0x7ac   :  { %v3041_v10 = vpop.xlane.xlu0 %3040  ;;  %v3129_v49 = vsel %vm1375_vm3, %v12594_v25, 0.0 }
 0x7ad   :  { %11200 = vpow2.f32 %v3103_v9  ;;  %v3079_v42 = vsub.f32 %v12535_v51, %v3041_v10  ;;  %3130 = vadd.xlane.f32.xlu0 %v3129_v49 }
 0x7ae   :  { %v12599_v16 = vpop.eup %11194 }
 0x7af   :  { %v12601_v3 = vpop.eup %11196  ;;  %v3099_v62 = vmul.f32 1.442695, %v3079_v42  ;;  %v3138_v55 = vsel %vm1375_vm3, %v12599_v16, 0.0 }
 0x7b0   :  { %3139 = vadd.xlane.f32.xlu1 %v3138_v55  ;;  %v3123_v47 = vsel %vm1375_vm3, %v12601_v3, 0.0  ;;  %v12623_v42 = vpop.permute.xlu0 %10913 }
 0x7b1   :  { %11202 = vpow2.f32 %v3099_v62  ;;  %3124 = vadd.xlane.f32.xlu0 %v3123_v47 }
 0x7b3   :  { %v12607_v12 = vpop.eup %11198 }
 0x7b4   :  { %v3144_v51 = vsel %vm1375_vm3, %v12607_v12, 0.0 }
 0x7b5   :  { %3145 = vadd.xlane.f32.xlu0 %v3144_v51 }
 0x7b7   :  { %v12611_v63 = vpop.eup %11200 }
 0x7b8   :  { %v3141_v34 = vsel %vm1375_vm3, %v12611_v63, 0.0 }
 0x7b9   :  { %3142 = vadd.xlane.f32.xlu0 %v3141_v34 }
 0x7bb   :  { %v12615_v40 = vpop.eup %11202 }
 0x7bc   :  { %v3135_v21 = vsel %vm1375_vm3, %v12615_v40, 0.0 }
 0x7bd   :  { %3136 = vadd.xlane.f32.xlu1 %v3135_v21 }
 0x7d4   :  { %v3062_v11 = vpop.xlane.xlu1 %3061 }
 0x7d5   :  { %v3086_v1 = vsub.f32 %v12553_v8, %v3062_v11 }
 0x7d7   :  { %v3113_v41 = vmul.f32 1.442695, %v3086_v1 }
 0x7d8   :  { %v3056_v18 = vpop.xlane.xlu1 %3055 }
 0x7d9   :  { %11204 = vpow2.f32 %v3113_v41  ;;  %v3084_v9 = vsub.f32 %v12529_v23, %v3056_v18 }
 0x7db   :  { %v3109_v10 = vmul.f32 1.442695, %v3084_v9 }
 0x7dc   :  { %v3053_v49 = vpop.xlane.xlu1 %3052 }
 0x7dd   :  { %11206 = vpow2.f32 %v3109_v10  ;;  %v3083_v62 = vsub.f32 %v12531_v52, %v3053_v49 }
 0x7df   :  { %v3107_v55 = vmul.f32 1.442695, %v3083_v62 }
 0x7e0   :  { %v3074_v47 = vpop.xlane.xlu1 %3073 }
 0x7e1   :  { %11208 = vpow2.f32 %v3107_v55  ;;  %v3090_v51 = vsub.f32 %v12543_v4, %v3074_v47  ;;  %v3059_v34 = vpop.xlane.xlu0 %3058 }
 0x7e2   :  { %v3085_v8 = vsub.f32 %v12533_v6, %v3059_v34 }
 0x7e3   :  { %v12628_v21 = vpop.eup %11204  ;;  %v3121_v11 = vmul.f32 1.442695, %v3090_v51 }
 0x7e4   :  { %v3111_v1 = vmul.f32 1.442695, %v3085_v8  ;;  %v3068_v23 = vpop.xlane.xlu1 %3067  ;;  %v3156_v41 = vsel %vm1375_vm3, %v12628_v21, 0.0 }
 0x7e5   :  { %11210 = vpow2.f32 %v3121_v11  ;;  %v3088_v18 = vsub.f32 %v12541_v35, %v3068_v23  ;;  %v3071_v52 = vpop.xlane.xlu0 %3070  ;;  %3157 = vadd.xlane.f32.xlu1 %v3156_v41 }
 0x7e6   :  { %11212 = vpow2.f32 %v3111_v1  ;;  %v3089_v9 = vsub.f32 %v12547_v43, %v3071_v52 }
 0x7e7   :  { %v12634_v4 = vpop.eup %11206  ;;  %v3117_v10 = vmul.f32 1.442695, %v3088_v18 }
 0x7e8   :  { %v3119_v6 = vmul.f32 1.442695, %v3089_v9  ;;  %v3150_v49 = vsel %vm1375_vm3, %v12634_v4, 0.0  ;;  %v12697_v9 = vpop.permute.xlu1 %10928 }
 0x7e9   :  { %11214 = vpow2.f32 %v3117_v10  ;;  %v3065_v62 = vpop.xlane.xlu0 %3064  ;;  %3151 = vadd.xlane.f32.xlu1 %v3150_v49  ;;  %v14520_v49 = vld [vmem:[#allocation35_spill] sm:$0xff] }
 0x7ea   :  { %11216 = vpow2.f32 %v3119_v6  ;;  %v3087_v55 = vsub.f32 %v12545_v19, %v3065_v62  ;;  %v14519_v6 = vld [vmem:[#allocation29_spill] sm:$0xff] }
 0x7eb   :  { %v12639_v47 = vpop.eup %11208 }
 0x7ec   :  { %v3115_v35 = vmul.f32 1.442695, %v3087_v55  ;;  %v3147_v51 = vsel %vm1375_vm3, %v12639_v47, 0.0  ;;  %v12707_v62 = vpop.permute.xlu1 %10938 }
 0x7ed   :  { %3148 = vadd.xlane.f32.xlu1 %v3147_v51  ;;  %v12699_v10 = vpop.permute.xlu0 %10923 }
 0x7ee   :  { %11218 = vpow2.f32 %v3115_v35  ;;  %v14521_v35 = vld [vmem:[#allocation34_spill] sm:$0xff] }
 0x7ef   :  { %v12643_v43 = vpop.eup %11210 }
 0x7f0   :  { %v12645_v34 = vpop.eup %11212  ;;  %v3168_v8 = vsel %vm1375_vm3, %v12643_v43, 0.0 }
 0x7f1   :  { %3169 = vadd.xlane.f32.xlu1 %v3168_v8  ;;  %v3153_v11 = vsel %vm1375_vm3, %v12645_v34, 0.0  ;;  %v12709_v55 = vpop.permute.xlu0 %10933 }
 0x7f2   :  { %3154 = vadd.xlane.f32.xlu0 %v3153_v11  ;;  %v14522_v11 = vld [vmem:[#allocation36_spill] sm:$0xff] }
 0x7f3   :  { %v12651_v19 = vpop.eup %11214 }
 0x7f4   :  { %v12653_v1 = vpop.eup %11216  ;;  %v3162_v23 = vsel %vm1375_vm3, %v12651_v19, 0.0 }
 0x7f5   :  { %3163 = vadd.xlane.f32.xlu1 %v3162_v23  ;;  %v3165_v41 = vsel %vm1375_vm3, %v12653_v1, 0.0 }
 0x7f6   :  { %3166 = vadd.xlane.f32.xlu0 %v3165_v41 }
 0x7f8   :  { %v12659_v18 = vpop.eup %11218 }
 0x7f9   :  { %v3159_v52 = vsel %vm1375_vm3, %v12659_v18, 0.0 }
 0x7fa   :  { %3160 = vadd.xlane.f32.xlu0 %v3159_v52 }
 0x806   :  { %3950 = vrot.lane.b32.xlu1 %v11966_v22, %s11559_s16 }
 0x80a   :  { %10948 = vrot.lane.b32.xlu1 %v12004_v26, %s11558_s15 }
 0x80e   :  { %4043 = vrot.lane.b32.xlu1 %v11974_v24, %s11559_s16 }
 0x810   :  { %10943 = vrot.lane.b32.xlu0 %v11992_v37, %s11558_s15 }
 0x812   :  { %4132 = vrot.lane.b32.xlu1 %v11986_v31, %s11559_s16 }
 0x814   :  { %3952 = vrot.lane.b32.xlu0 %v11964_v32, %s11559_s16 }
 0x816   :  { %10958 = vrot.lane.b32.xlu1 %v12024_v0, %s11558_s15 }
 0x818   :  { %4041 = vrot.lane.b32.xlu0 %v11976_v27, %s11559_s16 }
 0x81a   :  { %4225 = vrot.lane.b32.xlu1 %v11994_v38, %s11559_s16 }
 0x81c   :  { %10953 = vrot.lane.b32.xlu0 %v12014_v58, %s11558_s15 }
 0x81e   :  { %10963 = vrot.lane.b32.xlu1 %v12034_v54, %s11558_s15 }
 0x820   :  { %4134 = vrot.lane.b32.xlu0 %v11984_v29, %s11559_s16 }
 0x822   :  { %4405 = vrot.lane.b32.xlu1 %v12018_v36, %s11559_s16 }
 0x824   :  { %4223 = vrot.lane.b32.xlu0 %v11996_v39, %s11559_s16 }
 0x826   :  { %4407 = vrot.lane.b32.xlu1 %v12016_v60, %s11559_s16  ;;  %v10921_v60 = vunpack.i.h.bf16 %v12619_v50 }
 0x828   :  { %4314 = vrot.lane.b32.xlu0 %v12008_v48, %s11559_s16 }
 0x82a   :  { %4498 = vrot.lane.b32.xlu1 %v12026_v2, %s11559_s16 }
 0x82c   :  { %4316 = vrot.lane.b32.xlu0 %v14519_v6, %s11559_s16 }
 0x82e   :  { %4589 = vrot.lane.b32.xlu1 %v14520_v49, %s11559_s16 }
 0x830   :  { %10968 = vrot.lane.b32.xlu0 %v12044_v7, %s11558_s15 }
 0x832   :  { %10978 = vrot.lane.b32.xlu1 %v11982_v17, %s11560_s17 }
 0x834   :  { %4496 = vrot.lane.b32.xlu0 %v14521_v35, %s11559_s16 }
 0x835   :  { %v3128_v51 = vpop.xlane.xlu1 %3127 }
 0x836   :  { %v3134_v8 = vpop.xlane.xlu0 %3133  ;;  %10983 = vrot.lane.b32.xlu1 %v11992_v37, %s11560_s17 }
 0x837   :  { %11220 = vrcp.f32 %v3134_v8 }
 0x838   :  { %11222 = vrcp.f32 %v3128_v51  ;;  %4587 = vrot.lane.b32.xlu0 %v14522_v11, %s11559_s16 }
 0x83a   :  { %v3131_v23 = vpop.xlane.xlu0 %3130  ;;  %10988 = vrot.lane.b32.xlu1 %v12004_v26, %s11560_s17 }
 0x83b   :  { %11224 = vrcp.f32 %v3131_v23 }
 0x83c   :  { %10973 = vrot.lane.b32.xlu0 %v11972_v56, %s11560_s17 }
 0x83d   :  { %v3140_v57 = vpop.xlane.xlu1 %3139 }
 0x83e   :  { %v3125_v41 = vpop.xlane.xlu0 %3124 }
 0x83f   :  { %11226 = vrcp.f32 %v3125_v41 }
 0x841   :  { %v11221_v52 = vpop.eup %11220 }
 0x842   :  { %v11223_v30 = vpop.eup %11222  ;;  %v3190_v53 = vmul.f32 %v11221_v52, %v3134_v8  ;;  %v3146_v13 = vpop.xlane.xlu0 %3145  ;;  %v10920_v8 = vunpack.i.l.bf16 %v12619_v50 }
 0x843   :  { %11228 = vrcp.f32 %v3146_v13  ;;  %v3188_v15 = vmul.f32 %v11223_v30, %v3128_v51 }
 0x844   :  { %11230 = vrcp.f32 %v3140_v57  ;;  %v3206_v59 = vsub.f32 2.0, %v3190_v53 }
 0x845   :  { %v11225_v46 = vpop.eup %11224  ;;  %v3204_v35 = vsub.f32 2.0, %v3188_v15 }
 0x846   :  { %v3189_v33 = vmul.f32 %v11225_v46, %v3131_v23  ;;  %v3143_v44 = vpop.xlane.xlu0 %3142  ;;  %v3222_v36 = vmul.f32 %v11221_v52, %v3206_v59  ;;  %v10915_v59 = vunpack.i.l.bf16 %v12623_v42 }
 0x847   :  { %11232 = vrcp.f32 %v3143_v44  ;;  %v3220_v53 = vmul.f32 %v11223_v30, %v3204_v35 }
 0x848   :  { %v3205_v14 = vsub.f32 2.0, %v3189_v33  ;;  %v3238_v23 = vmul.f32 %v12587_v5, %v3222_v36 }
 0x849   :  { %v11227_v11 = vpop.eup %11226  ;;  %v3236_v30 = vmul.f32 %v12585_v28, %v3220_v53  ;;  %v10931_v28 = vunpack.i.h.bf16 %v12697_v9 }
 0x84a   :  { %v3221_v49 = vmul.f32 %v11225_v46, %v3205_v14  ;;  %v3187_v6 = vmul.f32 %v11227_v11, %v3125_v41  ;;  %v3137_v2 = vpop.xlane.xlu1 %3136  ;;  %v10916_v14 = vunpack.i.h.bf16 %v12623_v42  ;;  %v10502_v46 = vpack.c.bf16 %v10921_v60, %v10920_v8 }
 0x84b   :  { %11234 = vrcp.f32 %v3137_v2 }
 0x84c   :  { %v3203_v39 = vsub.f32 2.0, %v3187_v6  ;;  %v3237_v29 = vmul.f32 %v12594_v25, %v3221_v49 }
 0x84d   :  { %v11229_v51 = vpop.eup %11228 }
 0x84e   :  { %v11231_v48 = vpop.eup %11230  ;;  %v3219_v33 = vmul.f32 %v11227_v11, %v3203_v39  ;;  %v3194_v38 = vmul.f32 %v11229_v51, %v3146_v13  ;;  %9869 = vmatprep.mubr.msk.f32.mxu1 %vm1375_vm3, %v3237_v29  ;;  %v10498_v29 = vpack.c.bf16 %v10916_v14, %v10915_v59  ;;  %v10925_v11 = vunpack.i.l.bf16 %v12699_v10 }
 0x84f   :  { %9870 = vmatmul.mubr.msk.f32.vlgmr.msra.gmra.mrb[44].mxu1 %vm1375_vm3, %v3238_v23  ;;  %v3192_v36 = vmul.f32 %v11231_v48, %v3140_v57 }
 0x850   :  { %10497 = vmatpush3.bf16.msra.mxu1 %v12462_v61  ;;  %v3235_v15 = vmul.f32 %v12601_v3, %v3219_v33  ;;  %v3210_v5 = vsub.f32 2.0, %v3194_v38  ;;  %v10930_v38 = vunpack.i.l.bf16 %v12697_v9 }
 0x851   :  { %v11233_v25 = vpop.eup %11232  ;;  %10503 = vmatprep.subr.bf16.mxu1 %v10502_v46  ;;  %v3208_v50 = vsub.f32 2.0, %v3192_v36 }
 0x852   :  { %v3193_v39 = vmul.f32 %v11233_v25, %v3143_v44  ;;  %9862 = vmatprep.mubr.msk.f32.mxu0 %vm1375_vm3, %v3235_v15  ;;  %v3226_v61 = vmul.f32 %v11229_v51, %v3210_v5 }
 0x853   :  { %9863 = vmatmul.mubr.msk.f32.vlgmr.msra.gmra.mrb[36].mxu0 %vm1375_vm3, %v3236_v30  ;;  %v3224_v6 = vmul.f32 %v11231_v48, %v3208_v50 }
 0x854   :  { %v3209_v13 = vsub.f32 2.0, %v3193_v39  ;;  %10493 = vmatpush3.bf16.msra.mxu0 %v12458_v45  ;;  %v3242_v49 = vmul.f32 %v12607_v12, %v3226_v61  ;;  %v10926_v45 = vunpack.i.h.bf16 %v12699_v10  ;;  %v10936_v61 = vunpack.i.h.bf16 %v12709_v55 }
 0x855   :  { %v11235_v60 = vpop.eup %11234  ;;  %10499 = vmatprep.subr.bf16.mxu0 %v10498_v29  ;;  %v3240_v41 = vmul.f32 %v12599_v16, %v3224_v6 }
 0x856   :  { %v3225_v3 = vmul.f32 %v11233_v25, %v3209_v13  ;;  %v3191_v42 = vmul.f32 %v11235_v60, %v3137_v2  ;;  %v12745_v2 = vpack.c.bf16 %v10931_v28, %v10930_v38  ;;  %v10506_v48 = vpack.c.bf16 %v10926_v45, %v10925_v11 }
 0x858   :  { %v3207_v57 = vsub.f32 2.0, %v3191_v42  ;;  %v3241_v44 = vmul.f32 %v12611_v63, %v3225_v3  ;;  %v10935_v3 = vunpack.i.l.bf16 %v12709_v55 }
 0x85a   :  { %v3223_v35 = vmul.f32 %v11235_v60, %v3207_v57  ;;  %9883 = vmatprep.mubr.msk.f32.mxu1 %vm1375_vm3, %v3241_v44 }
 0x85b   :  { %9884 = vmatmul.mubr.msk.f32.vlgmr.msra.gmra.mrb[46].mxu1 %vm1375_vm3, %v3242_v49 }
 0x85c   :  { %10505 = vmatpush3.bf16.msra.mxu1 %v10502_v46  ;;  %v3239_v9 = vmul.f32 %v12615_v40, %v3223_v35 }
 0x85d   :  { %10511 = vmatprep.subr.bf16.mxu1 %v12745_v2 }
 0x85e   :  { %9876 = vmatprep.mubr.msk.f32.mxu0 %vm1375_vm3, %v3239_v9 }
 0x85f   :  { %9877 = vmatmul.mubr.msk.f32.vlgmr.msra.gmra.mrb[38].mxu0 %vm1375_vm3, %v3240_v41  ;;  %v10514_v41 = vpack.c.bf16 %v10936_v61, %v10935_v3 }
 0x860   :  { %10501 = vmatpush3.bf16.msra.mxu0 %v10498_v29 }
 0x861   :  { %10507 = vmatprep.subr.bf16.mxu0 %v10506_v48 }
 0x872   :  { %v3158_v12 = vpop.xlane.xlu1 %3157 }
 0x876   :  { %v3152_v63 = vpop.xlane.xlu1 %3151 }
 0x877   :  { %11236 = vrcp.f32 %v3152_v63 }
 0x878   :  { %11238 = vrcp.f32 %v3158_v12 }
 0x87a   :  { %v3149_v10 = vpop.xlane.xlu1 %3148 }
 0x87b   :  { %11240 = vrcp.f32 %v3149_v10 }
 0x87e   :  { %v3170_v52 = vpop.xlane.xlu1 %3169 }
 0x87f   :  { %11242 = vrcp.f32 %v3170_v52  ;;  %v3155_v40 = vpop.xlane.xlu0 %3154 }
 0x880   :  { %11244 = vrcp.f32 %v3155_v40 }
 0x881   :  { %v11237_v16 = vpop.eup %11236 }
 0x882   :  { %v3196_v8 = vmul.f32 %v11237_v16, %v3152_v63  ;;  %v3164_v51 = vpop.xlane.xlu1 %3163  ;;  %v11239_v53 = vpop.eup %11238 }
 0x883   :  { %11246 = vrcp.f32 %v3164_v51  ;;  %v3167_v23 = vpop.xlane.xlu0 %3166  ;;  %v3198_v59 = vmul.f32 %v11239_v53, %v3158_v12 }
 0x884   :  { %11248 = vrcp.f32 %v3167_v23  ;;  %v3212_v14 = vsub.f32 2.0, %v3196_v8 }
 0x885   :  { %v11241_v33 = vpop.eup %11240  ;;  %v3214_v29 = vsub.f32 2.0, %v3198_v59 }
 0x886   :  { %v3195_v46 = vmul.f32 %v11241_v33, %v3149_v10  ;;  %v12752_v15 = vpop.permute.xlu1 %3950  ;;  %v3228_v5 = vmul.f32 %v11237_v16, %v3212_v14  ;;  %v10940_v10 = vunpack.i.l.bf16 %v12707_v62 }
 0x887   :  { %v3161_v25 = vpop.xlane.xlu0 %3160  ;;  %v3230_v35 = vmul.f32 %v11239_v53, %v3214_v29 }
 0x888   :  { %v3211_v30 = vsub.f32 2.0, %v3195_v46  ;;  %11250 = vrcp.f32 %v3161_v25  ;;  %v3244_v44 = vmul.f32 %v12634_v4, %v3228_v5 }
 0x889   :  { %v11243_v36 = vpop.eup %11242  ;;  %v3246_v16 = vmul.f32 %v12628_v21, %v3230_v35 }
 0x88a   :  { %v11245_v39 = vpop.eup %11244  ;;  %v3227_v13 = vmul.f32 %v11241_v33, %v3211_v30  ;;  %v3202_v60 = vmul.f32 %v11243_v36, %v3170_v52  ;;  %v10949_v50 = vpop.permute.xlu1 %10948 }
 0x88b   :  { %v3197_v42 = vmul.f32 %v11245_v39, %v3155_v40  ;;  %v10944_v28 = vpop.permute.xlu0 %10943  ;;  %v10950_v29 = vunpack.i.l.bf16 %v10949_v50 }
 0x88c   :  { %v3243_v38 = vmul.f32 %v12639_v47, %v3227_v13  ;;  %v3218_v45 = vsub.f32 2.0, %v3202_v60  ;;  %v10941_v47 = vunpack.i.h.bf16 %v12707_v62  ;;  %v10945_v5 = vunpack.i.l.bf16 %v10944_v28 }
 0x88d   :  { %v11247_v57 = vpop.eup %11246  ;;  %v3213_v6 = vsub.f32 2.0, %v3197_v42 }
 0x88e   :  { %v11249_v49 = vpop.eup %11248  ;;  %v3200_v11 = vmul.f32 %v11247_v57, %v3164_v51  ;;  %v12758_v9 = vpop.permute.xlu1 %4043  ;;  %9890 = vmatprep.mubr.msk.f32.mxu0 %vm1375_vm3, %v3243_v38  ;;  %v3234_v8 = vmul.f32 %v11243_v36, %v3218_v45  ;;  %v10520_v59 = vpack.c.bf16 %v10941_v47, %v10940_v10  ;;  %v10946_v36 = vunpack.i.h.bf16 %v10944_v28 }
 0x88f   :  { %v3229_v12 = vmul.f32 %v11245_v39, %v3213_v6  ;;  %v3201_v63 = vmul.f32 %v11249_v49, %v3167_v23  ;;  %v3953_v55 = vpop.permute.xlu0 %3952  ;;  %9891 = vmatmul.mubr.msk.f32.vlgmr.msra.gmra.mrb[40].mxu0 %vm1375_vm3, %v3244_v44  ;;  %v10951_v39 = vunpack.i.h.bf16 %v10949_v50 }
 0x890   :  { %10509 = vmatpush3.bf16.msra.mxu0 %v10506_v48  ;;  %v3216_v51 = vsub.f32 2.0, %v3200_v11  ;;  %v10526_v60 = vpack.c.bf16 %v10946_v36, %v10945_v5 }
 0x891   :  { %v3217_v4 = vsub.f32 2.0, %v3201_v63  ;;  %10516 = vmatprep.subr.msk.bf16.mxu0 %vm12058_vm2, %v10514_v41  ;;  %v3245_v52 = vmul.f32 %v12645_v34, %v3229_v12  ;;  %v3250_v34 = vmul.f32 %v12643_v43, %v3234_v8  ;;  %v10532_v61 = vpack.c.bf16 %v10951_v39, %v10950_v29 }
 0x892   :  { %v11251_v40 = vpop.eup %11250  ;;  %v4133_v53 = vpop.permute.xlu1 %4132  ;;  %v3232_v46 = vmul.f32 %v11247_v57, %v3216_v51 }
 0x893   :  { %v3233_v23 = vmul.f32 %v11249_v49, %v3217_v4  ;;  %v3199_v33 = vmul.f32 %v11251_v40, %v3161_v25  ;;  %9897 = vmatprep.mubr.msk.f32.mxu1 %vm1375_vm3, %v3245_v52  ;;  %v4042_v14 = vpop.permute.xlu0 %4041 }
 0x894   :  { %9898 = vmatmul.mubr.msk.f32.vlgmr.msra.gmra.mrb[48].mxu1 %vm1375_vm3, %v3246_v16  ;;  %v3248_v43 = vmul.f32 %v12651_v19, %v3232_v46 }
 0x895   :  { %v3215_v62 = vsub.f32 2.0, %v3199_v33  ;;  %10513 = vmatpush3.bf16.msra.mxu1 %v12745_v2  ;;  %v3249_v48 = vmul.f32 %v12653_v1, %v3233_v23 }
 0x896   :  { %10522 = vmatprep.subr.msk.bf16.mxu1 %vm12058_vm2, %v10520_v59  ;;  %v10959_v21 = vpop.permute.xlu1 %10958 }
 0x897   :  { %v3231_v30 = vmul.f32 %v11251_v40, %v3215_v62  ;;  %9911 = vmatprep.mubr.msk.f32.mxu1 %vm1375_vm3, %v3249_v48  ;;  %v10954_v25 = vpop.permute.xlu0 %10953  ;;  %v10961_v42 = vunpack.i.h.bf16 %v10959_v21  ;;  %v10960_v28 = vunpack.i.l.bf16 %v10959_v21 }
 0x898   :  { %9912 = vmatmul.mubr.msk.f32.vlgmr.msra.gmra.mrb[50].mxu1 %vm1375_vm3, %v3250_v34  ;;  %v10956_v50 = vunpack.i.h.bf16 %v10954_v25  ;;  %v10955_v3 = vunpack.i.l.bf16 %v10954_v25 }
 0x899   :  { %9925 = vmatprep.mubr.msk.f32.mxu1 %vm668_vm1, %v4042_v14  ;;  %v3247_v1 = vmul.f32 %v12659_v18, %v3231_v30  ;;  %v10544_v44 = vpack.c.bf16 %v10961_v42, %v10960_v28  ;;  %v9027_v28 = vld [vmem:[%s14411_s8 + $0x28] sm:$0xff] }
 0x89a   :  { %v4226_v2 = vpop.permute.xlu1 %4225 }
 0x89b   :  { %v4135_v13 = vpop.permute.xlu0 %4134  ;;  %9904 = vmatprep.mubr.msk.f32.mxu0 %vm1375_vm3, %v3247_v1 }
 0x89c   :  { %9905 = vmatmul.mubr.msk.f32.vlgmr.msra.gmra.mrb[42].mxu0 %vm1375_vm3, %v3248_v43 }
 0x89d   :  { %10519 = vmatpush3.bf16.xpose.msk.msra.mxu0 %vm12058_vm2, %v10514_v41  ;;  %9918 = vmatprep.mubr.msk.f32.mxu0 %vm668_vm1, %v12752_v15  ;;  %v10538_v15 = vpack.c.bf16 %v10956_v50, %v10955_v3 }
 0x89e   :  { %10525 = vmatpush3.bf16.xpose.msk.msra.mxu1 %vm12058_vm2, %v10520_v59  ;;  %10528 = vmatprep.subr.msk.bf16.mxu0 %vm12058_vm2, %v10526_v60  ;;  %v10964_v19 = vpop.permute.xlu1 %10963 }
 0x89f   :  { %10534 = vmatprep.subr.msk.bf16.mxu1 %vm12058_vm2, %v10532_v61  ;;  %v4224_v18 = vpop.permute.xlu0 %4223  ;;  %v10966_v35 = vunpack.i.h.bf16 %v10964_v19  ;;  %v10965_v45 = vunpack.i.l.bf16 %v10964_v19 }
 0x8a1   :  { %v10550_v63 = vpack.c.bf16 %v10966_v35, %v10965_v45 }
 0x8a2   :  { %v4406_v38 = vpop.permute.xlu1 %4405 }
 0x8a3   :  { %v4315_v57 = vpop.permute.xlu0 %4314 }
 0x8a4   :  { %9919 = vmatmul.mubr.msk.f32.vlgmr.msra.gmra.mrb[44].mxu0 %vm668_vm1, %v3953_v55 }
 0x8a5   :  { %9926 = vmatmul.mubr.msk.f32.vlgmr.msra.gmra.mrb[52].mxu1 %vm668_vm1, %v12758_v9  ;;  %10531 = vmatpush3.bf16.xpose.msk.msra.mxu0 %vm12058_vm2, %v10526_v60 }
 0x8a6   :  { %9932 = vmatprep.mubr.msk.f32.mxu0 %vm668_vm1, %v4133_v53  ;;  %10537 = vmatpush3.bf16.xpose.msk.msra.mxu1 %vm12058_vm2, %v10532_v61  ;;  %v4408_v6 = vpop.permute.xlu1 %4407 }
 0x8a7   :  { %9939 = vmatprep.mubr.msk.f32.mxu1 %vm668_vm1, %v4224_v18  ;;  %10540 = vmatprep.subr.msk.bf16.mxu0 %vm12058_vm2, %v10538_v15  ;;  %v4317_v49 = vpop.permute.xlu0 %4316 }
 0x8a8   :  { %10546 = vmatprep.subr.msk.bf16.mxu1 %vm12058_vm2, %v10544_v44 }
 0x8aa   :  { %v4499_v11 = vpop.permute.xlu1 %4498 }
 0x8ab   :  { %v10969_v9 = vpop.permute.xlu0 %10968 }
 0x8ac   :  { %v10971_v41 = vunpack.i.h.bf16 %v10969_v9  ;;  %v10970_v12 = vunpack.i.l.bf16 %v10969_v9  ;;  %9933 = vmatmul.mubr.msk.f32.vlgmr.msra.gmra.mrb[46].mxu0 %vm668_vm1, %v4135_v13 }
 0x8ad   :  { %9940 = vmatmul.mubr.msk.f32.vlgmr.msra.gmra.mrb[54].mxu1 %vm668_vm1, %v4226_v2  ;;  %10543 = vmatpush3.bf16.xpose.msk.msra.mxu0 %vm12058_vm2, %v10538_v15 }
 0x8ae   :  { %v10556_v55 = vpack.c.bf16 %v10971_v41, %v10970_v12  ;;  %9946 = vmatprep.mubr.msk.f32.mxu0 %vm668_vm1, %v4315_v57  ;;  %10549 = vmatpush3.bf16.xpose.msk.msra.mxu1 %vm12058_vm2, %v10544_v44  ;;  %v4590_v47 = vpop.permute.xlu1 %4589  ;;  %v9026_v44 = vld [vmem:[%s14411_s8 + $0x20] sm:$0xff] }
 0x8af   :  { %9953 = vmatprep.mubr.msk.f32.mxu1 %vm668_vm1, %v4406_v38  ;;  %10552 = vmatprep.subr.msk.bf16.mxu0 %vm12058_vm2, %v10550_v63  ;;  %v4497_v10 = vpop.permute.xlu0 %4496 }
 0x8b0   :  { %10558 = vmatprep.subr.msk.bf16.mxu1 %vm12058_vm2, %v10556_v55 }
 0x8b2   :  { %v10979_v4 = vpop.permute.xlu1 %10978 }
 0x8b3   :  { %v10981_v52 = vunpack.i.h.bf16 %v10979_v4  ;;  %v10980_v40 = vunpack.i.l.bf16 %v10979_v4  ;;  %v4588_v16 = vpop.permute.xlu0 %4587 }
 0x8b4   :  { %9947 = vmatmul.mubr.msk.f32.vlgmr.msra.gmra.mrb[48].mxu0 %vm668_vm1, %v4317_v49 }
 0x8b5   :  { %9954 = vmatmul.mubr.msk.f32.vlgmr.msra.gmra.mrb[56].mxu1 %vm668_vm1, %v4408_v6  ;;  %10555 = vmatpush3.bf16.xpose.msk.msra.mxu0 %vm12058_vm2, %v10550_v63  ;;  %v10566_v8 = vpack.c.bf16 %v10981_v52, %v10980_v40 }
 0x8b6   :  { %9960 = vmatprep.mubr.msk.f32.mxu0 %vm668_vm1, %v4497_v10  ;;  %10561 = vmatpush3.bf16.xpose.msk.msra.mxu1 %vm12058_vm2, %v10556_v55  ;;  %v10984_v51 = vpop.permute.xlu1 %10983 }
 0x8b7   :  { %9967 = vmatprep.mubr.msk.f32.mxu1 %vm668_vm1, %v4588_v16  ;;  %v10974_v53 = vpop.permute.xlu0 %10973  ;;  %10567 = vmatprep.subr.bf16.mxu1 %v10566_v8  ;;  %v10986_v23 = vunpack.i.h.bf16 %v10984_v51  ;;  %v10985_v33 = vunpack.i.l.bf16 %v10984_v51 }
 0x8b8   :  { %v10976_v14 = vunpack.i.h.bf16 %v10974_v53  ;;  %v10975_v59 = vunpack.i.l.bf16 %v10974_v53 }
 0x8b9   :  { %v12826_v21 = vpack.c.bf16 %v10986_v23, %v10985_v33 }
 0x8ba   :  { %v10989_v62 = vpop.permute.xlu1 %10988  ;;  %v10562_v48 = vpack.c.bf16 %v10976_v14, %v10975_v59 }
 0x8bb   :  { %v10991_v34 = vunpack.i.h.bf16 %v10989_v62  ;;  %v10990_v46 = vunpack.i.l.bf16 %v10989_v62 }
 0x8bc   :  { %9961 = vmatmul.mubr.msk.f32.vlgmr.msra.gmra.mrb[50].mxu0 %vm668_vm1, %v4499_v11  ;;  %10563 = vmatprep.subr.bf16.mxu0 %v10562_v48 }
 0x8bd   :  { %9968 = vmatmul.mubr.msk.f32.vlgmr.msra.gmra.mrb[58].mxu1 %vm668_vm1, %v4590_v47  ;;  %10565 = vmatpush3.bf16.msra.mxu0 %v10562_v48  ;;  %v12829_v30 = vpack.c.bf16 %v10991_v34, %v10990_v46 }
 0x8be   :  { %10569 = vmatpush3.bf16.msra.mxu1 %v10566_v8  ;;  %10571 = vmatprep.subr.bf16.mxu0 %v12826_v21 }
 0x8bf   :  { %10575 = vmatprep.subr.bf16.mxu1 %v12829_v30 }
 0x922   :  { %v12833_v25 = vpop.f32.mrb[44].mxu1 }
 0x923   :  { %v12835_v36 = vpop.f32.mrb[45].mxu1 }
 0x926   :  { %v12837_v5 = vpop.f32.mrb[36].mxu0 }
 0x927   :  { %v12839_v39 = vpop.f32.mrb[37].mxu0 }
 0x92e   :  { %v12841_v29 = vpop.f32.mrb[46].mxu1 }
 0x92f   :  { %v12843_v1 = vpop.f32.mrb[47].mxu1 }
 0x930   :  { %14523 = vst [vmem:[#allocation53_spill] sm:$0xff] %v12843_v1 }
 0x932   :  { %v12845_v43 = vpop.f32.mrb[38].mxu0 }
 0x933   :  { %v12847_v2 = vpop.f32.mrb[39].mxu0 }
 0x934   :  { %14524 = vst [vmem:[#allocation54_spill] sm:$0xff] %v12847_v2 }
 0x962   :  { %v12849_v13 = vpop.f32.mrb[40].mxu0 }
 0x963   :  { %14525 = vst [vmem:[#allocation55_spill] sm:$0xff] %v12849_v13  ;;  %v12851_v60 = vpop.f32.mrb[41].mxu0 }
 0x964   :  { %14526 = vst [vmem:[#allocation56_spill] sm:$0xff] %v12851_v60 }
 0x967   :  { %v12853_v61 = vpop.f32.mrb[48].mxu1 }
 0x968   :  { %14527 = vst [vmem:[#allocation57_spill] sm:$0xff] %v12853_v61  ;;  %v12855_v19 = vpop.f32.mrb[49].mxu1 }
 0x969   :  { %14528 = vst [vmem:[#allocation58_spill] sm:$0xff] %v12855_v19 }
 0x96b   :  { %v12857_v18 = vpop.f32.mrb[50].mxu1 }
 0x96c   :  { %14529 = vst [vmem:[#allocation59_spill] sm:$0xff] %v12857_v18  ;;  %v12859_v50 = vpop.f32.mrb[51].mxu1 }
 0x96d   :  { %14530 = vst [vmem:[#allocation60_spill] sm:$0xff] %v12859_v50 }
 0x96f   :  { %v12861_v3 = vpop.f32.mrb[42].mxu0 }
 0x970   :  { %14531 = vst [vmem:[#allocation61_spill] sm:$0xff] %v12861_v3  ;;  %v12863_v42 = vpop.f32.mrb[43].mxu0 }
 0x971   :  { %14532 = vst [vmem:[#allocation62_spill] sm:$0xff] %v12863_v42 }
 0x977   :  { %v9920_v38 = vpop.f32.mrb[44].mxu0 }
 0x978   :  { %v12868_v57 = vadd.f32 %v9920_v38, %v9027_v28  ;;  %v4032_v15 = vpop.f32.mrb[45].mxu0  ;;  %v9927_v6 = vpop.f32.mrb[52].mxu1 }
 0x979   :  { %v12873_v49 = vadd.f32 %v9927_v6, %v9027_v28  ;;  %v4123_v35 = vpop.f32.mrb[53].mxu1  ;;  %v12881_v41 = vadd.f32 %v9026_v44, %v4032_v15 }
 0x97a   :  { %v4681_v45 = vsel %vm1375_vm3, %v12868_v57, -inf  ;;  %v12877_v11 = vadd.f32 %v9026_v44, %v4123_v35 }
 0x97b   :  { %4682 = vmax.xlane.f32.xlu1 %v4681_v45  ;;  %v4687_v9 = vsel %vm1375_vm3, %v12873_v49, -inf  ;;  %v4678_v16 = vsel %vm1375_vm3, %v12881_v41, -inf }
 0x97c   :  { %4688 = vmax.xlane.f32.xlu0 %v4687_v9  ;;  %v4684_v63 = vsel %vm1375_vm3, %v12877_v11, -inf }
 0x97f   :  { %v9934_v12 = vpop.f32.mrb[46].mxu0 }
 0x980   :  { %v12885_v55 = vadd.f32 %v9934_v12, %v9027_v28  ;;  %4685 = vmax.xlane.f32.xlu0 %v4684_v63  ;;  %v4214_v47 = vpop.f32.mrb[47].mxu0  ;;  %v9941_v10 = vpop.f32.mrb[54].mxu1 }
 0x981   :  { %v4305_v4 = vpop.f32.mrb[55].mxu1  ;;  %v12889_v40 = vadd.f32 %v9941_v10, %v9027_v28  ;;  %v12903_v34 = vadd.f32 %v9026_v44, %v4214_v47 }
 0x982   :  { %v4693_v52 = vsel %vm1375_vm3, %v12885_v55, -inf  ;;  %v12893_v8 = vadd.f32 %v9026_v44, %v4305_v4 }
 0x983   :  { %4694 = vmax.xlane.f32.xlu1 %v4693_v52  ;;  %v4699_v53 = vsel %vm1375_vm3, %v12889_v40, -inf  ;;  %v4690_v15 = vsel %vm1375_vm3, %v12903_v34, -inf }
 0x984   :  { %4679 = vmax.xlane.f32.xlu0 %v4678_v16  ;;  %v4696_v46 = vsel %vm1375_vm3, %v12893_v8, -inf }
 0x987   :  { %v9948_v51 = vpop.f32.mrb[48].mxu0 }
 0x988   :  { %v12897_v23 = vadd.f32 %v9948_v51, %v9027_v28  ;;  %v4396_v33 = vpop.f32.mrb[49].mxu0  ;;  %v9955_v14 = vpop.f32.mrb[56].mxu1  ;;  %4700 = vmax.xlane.f32.xlu0 %v4699_v53 }
 0x989   :  { %v12899_v59 = vadd.f32 %v9026_v44, %v4396_v33  ;;  %v4487_v62 = vpop.f32.mrb[57].mxu1  ;;  %v12921_v10 = vadd.f32 %v9955_v14, %v9027_v28 }
 0x98a   :  { %v12901_v48 = vadd.f32 %v9026_v44, %v4487_v62  ;;  %v4705_v52 = vsel %vm1375_vm3, %v12897_v23, -inf }
 0x98b   :  { %v4711_v4 = vsel %vm1375_vm3, %v12921_v10, -inf }
 0x98c   :  { %4697 = vmax.xlane.f32.xlu0 %v4696_v46 }
 0x98f   :  { %v9962_v38 = vpop.f32.mrb[50].mxu0 }
 0x990   :  { %v12909_v6 = vadd.f32 %v9962_v38, %v9027_v28  ;;  %v4578_v35 = vpop.f32.mrb[51].mxu0  ;;  %v9969_v45 = vpop.f32.mrb[58].mxu1  ;;  %4691 = vmax.xlane.f32.xlu0 %v4690_v15 }
 0x991   :  { %v12911_v9 = vadd.f32 %v9026_v44, %v4578_v35  ;;  %v12913_v12 = vadd.f32 %v9969_v45, %v9027_v28  ;;  %v4669_v63 = vpop.f32.mrb[59].mxu1  ;;  %v4708_v28 = vsel %vm1375_vm3, %v12901_v48, -inf }
 0x992   :  { %v12915_v47 = vadd.f32 %v9026_v44, %v4669_v63  ;;  %v4702_v44 = vsel %vm1375_vm3, %v12899_v59, -inf  ;;  %v4717_v51 = vsel %vm1375_vm3, %v12909_v6, -inf }
 0x993   :  { %v4723_v16 = vsel %vm1375_vm3, %v12913_v12, -inf  ;;  %v4714_v33 = vsel %vm1375_vm3, %v12911_v9, -inf }
 0x994   :  { %10998 = vrot.lane.b32.xlu1 %v12024_v0, %s11560_s17  ;;  %v4720_v53 = vsel %vm1375_vm3, %v12915_v47, -inf }
 0x9a6   :  { %10993 = vrot.lane.b32.xlu0 %v12014_v58, %s11560_s17 }
 0x9b8   :  { %4712 = vmax.xlane.f32.xlu1 %v4711_v4 }
 0x9bc   :  { %4706 = vmax.xlane.f32.xlu1 %v4705_v52 }
 0x9c0   :  { %4703 = vmax.xlane.f32.xlu1 %v4702_v44 }
 0x9c4   :  { %4724 = vmax.xlane.f32.xlu1 %v4723_v16 }
 0x9c5   :  { %4709 = vmax.xlane.f32.xlu0 %v4708_v28 }
 0x9c8   :  { %4718 = vmax.xlane.f32.xlu1 %v4717_v51 }
 0x9c9   :  { %4721 = vmax.xlane.f32.xlu0 %v4720_v53 }
 0x9cd   :  { %4715 = vmax.xlane.f32.xlu0 %v4714_v33 }
 0x9d9   :  { %11008 = vrot.lane.b32.xlu1 %v12044_v7, %s11560_s17 }
 0x9dd   :  { %11018 = vrot.lane.b32.xlu1 %v11982_v17, %s11561_s20 }
 0x9e3   :  { %11003 = vrot.lane.b32.xlu0 %v12034_v54, %s11560_s17 }
 0x9e7   :  { %11013 = vrot.lane.b32.xlu0 %v11972_v56, %s11561_s20 }
 0xa08   :  { %v4683_v14 = vpop.xlane.xlu1 %4682 }
 0xa09   :  { %v4727_v62 = vsub.f32 %v12868_v57, %v4683_v14  ;;  %v4689_v46 = vpop.xlane.xlu0 %4688 }
 0xa0a   :  { %v4729_v38 = vsub.f32 %v12873_v49, %v4689_v46 }
 0xa0b   :  { %v4744_v15 = vmul.f32 1.442695, %v4727_v62 }
 0xa0c   :  { %v4748_v35 = vmul.f32 1.442695, %v4729_v38 }
 0xa0d   :  { %11252 = vpow2.f32 %v4744_v15  ;;  %v4686_v45 = vpop.xlane.xlu0 %4685 }
 0xa0e   :  { %11254 = vpow2.f32 %v4748_v35  ;;  %v4728_v63 = vsub.f32 %v12877_v11, %v4686_v45 }
 0xa10   :  { %v4746_v4 = vmul.f32 1.442695, %v4728_v63  ;;  %v4695_v52 = vpop.xlane.xlu1 %4694 }
 0xa11   :  { %v4731_v44 = vsub.f32 %v12885_v55, %v4695_v52  ;;  %v4680_v16 = vpop.xlane.xlu0 %4679 }
 0xa12   :  { %11256 = vpow2.f32 %v4746_v4  ;;  %v4726_v28 = vsub.f32 %v12881_v41, %v4680_v16 }
 0xa13   :  { %v4752_v51 = vmul.f32 1.442695, %v4731_v44 }
 0xa14   :  { %v4742_v57 = vmul.f32 1.442695, %v4726_v28 }
 0xa15   :  { %11258 = vpow2.f32 %v4752_v51  ;;  %v4701_v53 = vpop.xlane.xlu0 %4700 }
 0xa16   :  { %11260 = vpow2.f32 %v4742_v57  ;;  %v4733_v49 = vsub.f32 %v12889_v40, %v4701_v53 }
 0xa17   :  { %v12953_v33 = vpop.eup %11252 }
 0xa18   :  { %v12955_v14 = vpop.eup %11254  ;;  %v4756_v11 = vmul.f32 1.442695, %v4733_v49  ;;  %v4777_v62 = vsel %vm1375_vm3, %v12953_v33, 0.0  ;;  %v12987_v49 = vpop.permute.xlu1 %10998 }
 0xa19   :  { %4778 = vadd.xlane.f32.xlu1 %v4777_v62  ;;  %v4698_v55 = vpop.xlane.xlu0 %4697  ;;  %v4783_v41 = vsel %vm1375_vm3, %v12955_v14, 0.0  ;;  %v11001_v60 = vunpack.i.h.bf16 %v12987_v49 }
 0xa1a   :  { %11262 = vpow2.f32 %v4756_v11  ;;  %v4732_v46 = vsub.f32 %v12893_v8, %v4698_v55  ;;  %4784 = vadd.xlane.f32.xlu0 %v4783_v41 }
 0xa1c   :  { %v12962_v38 = vpop.eup %11256  ;;  %v4754_v40 = vmul.f32 1.442695, %v4732_v46 }
 0xa1d   :  { %v4692_v15 = vpop.xlane.xlu0 %4691  ;;  %v4780_v35 = vsel %vm1375_vm3, %v12962_v38, 0.0 }
 0xa1e   :  { %11264 = vpow2.f32 %v4754_v40  ;;  %v4730_v45 = vsub.f32 %v12903_v34, %v4692_v15  ;;  %4781 = vadd.xlane.f32.xlu0 %v4780_v35 }
 0xa1f   :  { %v12967_v63 = vpop.eup %11258 }
 0xa20   :  { %v12969_v4 = vpop.eup %11260  ;;  %v4750_v52 = vmul.f32 1.442695, %v4730_v45  ;;  %v4789_v8 = vsel %vm1375_vm3, %v12967_v63, 0.0 }
 0xa21   :  { %4790 = vadd.xlane.f32.xlu1 %v4789_v8  ;;  %v4774_v44 = vsel %vm1375_vm3, %v12969_v4, 0.0  ;;  %v12991_v35 = vpop.permute.xlu0 %10993 }
 0xa22   :  { %11266 = vpow2.f32 %v4750_v52  ;;  %4775 = vadd.xlane.f32.xlu0 %v4774_v44 }
 0xa24   :  { %v12975_v16 = vpop.eup %11262 }
 0xa25   :  { %v4795_v34 = vsel %vm1375_vm3, %v12975_v16, 0.0 }
 0xa26   :  { %4796 = vadd.xlane.f32.xlu0 %v4795_v34 }
 0xa28   :  { %v12979_v28 = vpop.eup %11264 }
 0xa29   :  { %v4792_v51 = vsel %vm1375_vm3, %v12979_v28, 0.0 }
 0xa2a   :  { %4793 = vadd.xlane.f32.xlu0 %v4792_v51 }
 0xa2c   :  { %v12983_v57 = vpop.eup %11266 }
 0xa2d   :  { %v4786_v53 = vsel %vm1375_vm3, %v12983_v57, 0.0 }
 0xa2e   :  { %4787 = vadd.xlane.f32.xlu1 %v4786_v53 }
 0xa45   :  { %v4713_v11 = vpop.xlane.xlu1 %4712 }
 0xa46   :  { %v4737_v62 = vsub.f32 %v12921_v10, %v4713_v11 }
 0xa48   :  { %v4764_v55 = vmul.f32 1.442695, %v4737_v62 }
 0xa49   :  { %v4707_v41 = vpop.xlane.xlu1 %4706 }
 0xa4a   :  { %11268 = vpow2.f32 %v4764_v55  ;;  %v4735_v46 = vsub.f32 %v12897_v23, %v4707_v41 }
 0xa4c   :  { %v4760_v40 = vmul.f32 1.442695, %v4735_v46 }
 0xa4d   :  { %v4704_v15 = vpop.xlane.xlu1 %4703 }
 0xa4e   :  { %11270 = vpow2.f32 %v4760_v40  ;;  %v4734_v45 = vsub.f32 %v12899_v59, %v4704_v15 }
 0xa50   :  { %v4758_v52 = vmul.f32 1.442695, %v4734_v45 }
 0xa51   :  { %v4725_v8 = vpop.xlane.xlu1 %4724 }
 0xa52   :  { %11272 = vpow2.f32 %v4758_v52  ;;  %v4741_v44 = vsub.f32 %v12913_v12, %v4725_v8  ;;  %v4710_v34 = vpop.xlane.xlu0 %4709 }
 0xa53   :  { %v4736_v10 = vsub.f32 %v12901_v48, %v4710_v34 }
 0xa54   :  { %v12996_v51 = vpop.eup %11268  ;;  %v4772_v53 = vmul.f32 1.442695, %v4741_v44 }
 0xa55   :  { %v4762_v11 = vmul.f32 1.442695, %v4736_v10  ;;  %v4719_v23 = vpop.xlane.xlu1 %4718  ;;  %v4807_v62 = vsel %vm1375_vm3, %v12996_v51, 0.0 }
 0xa56   :  { %11274 = vpow2.f32 %v4772_v53  ;;  %v4739_v55 = vsub.f32 %v12909_v6, %v4719_v23  ;;  %4808 = vadd.xlane.f32.xlu1 %v4807_v62  ;;  %v4722_v59 = vpop.xlane.xlu0 %4721 }
 0xa57   :  { %11276 = vpow2.f32 %v4762_v11  ;;  %v4740_v41 = vsub.f32 %v12915_v47, %v4722_v59  ;;  %v14538_v59 = vld [vmem:[#allocation33_spill] sm:$0xff] }
 0xa58   :  { %v13002_v12 = vpop.eup %11270  ;;  %v4768_v46 = vmul.f32 1.442695, %v4739_v55 }
 0xa59   :  { %v4770_v48 = vmul.f32 1.442695, %v4740_v41  ;;  %v4801_v40 = vsel %vm1375_vm3, %v13002_v12, 0.0  ;;  %v13065_v41 = vpop.permute.xlu1 %11008 }
 0xa5a   :  { %11278 = vpow2.f32 %v4768_v46  ;;  %4802 = vadd.xlane.f32.xlu1 %v4801_v40  ;;  %v4716_v15 = vpop.xlane.xlu0 %4715  ;;  %v14540_v40 = vld [vmem:[#allocation35_spill] sm:$0xff] }
 0xa5b   :  { %11280 = vpow2.f32 %v4770_v48  ;;  %v4738_v45 = vsub.f32 %v12911_v9, %v4716_v15  ;;  %v14539_v48 = vld [vmem:[#allocation29_spill] sm:$0xff]  ;;  %v14541_v15 = vld [vmem:[#allocation32_spill] sm:$0xff] }
 0xa5c   :  { %v13007_v52 = vpop.eup %11272 }
 0xa5d   :  { %v4766_v6 = vmul.f32 1.442695, %v4738_v45  ;;  %v4798_v8 = vsel %vm1375_vm3, %v13007_v52, 0.0  ;;  %v13075_v45 = vpop.permute.xlu1 %11018 }
 0xa5e   :  { %4799 = vadd.xlane.f32.xlu1 %v4798_v8  ;;  %v13067_v46 = vpop.permute.xlu0 %11003  ;;  %v14542_v8 = vld [vmem:[#allocation34_spill] sm:$0xff] }
 0xa5f   :  { %11282 = vpow2.f32 %v4766_v6 }
 0xa60   :  { %v13011_v47 = vpop.eup %11274 }
 0xa61   :  { %v13013_v44 = vpop.eup %11276  ;;  %v4819_v34 = vsel %vm1375_vm3, %v13011_v47, 0.0 }
 0xa62   :  { %4820 = vadd.xlane.f32.xlu1 %v4819_v34  ;;  %v4804_v10 = vsel %vm1375_vm3, %v13013_v44, 0.0  ;;  %v13077_v6 = vpop.permute.xlu0 %11013 }
 0xa63   :  { %4805 = vadd.xlane.f32.xlu0 %v4804_v10 }
 0xa64   :  { %v13019_v9 = vpop.eup %11278 }
 0xa65   :  { %v13021_v53 = vpop.eup %11280  ;;  %v4813_v11 = vsel %vm1375_vm3, %v13019_v9, 0.0 }
 0xa66   :  { %4814 = vadd.xlane.f32.xlu1 %v4813_v11  ;;  %v4816_v23 = vsel %vm1375_vm3, %v13021_v53, 0.0  ;;  %v14543_v11 = vld [vmem:[#allocation36_spill] sm:$0xff] }
 0xa67   :  { %4817 = vadd.xlane.f32.xlu0 %v4816_v23 }
 0xa69   :  { %v13027_v62 = vpop.eup %11282 }
 0xa6a   :  { %v4810_v55 = vsel %vm1375_vm3, %v13027_v62, 0.0 }
 0xa6b   :  { %4811 = vadd.xlane.f32.xlu0 %v4810_v55 }
 0xa77   :  { %5601 = vrot.lane.b32.xlu1 %v11966_v22, %s11562_s23  ;;  %v14533_v22 = vld [vmem:[#allocation27_spill] sm:$0xff] }
 0xa7b   :  { %11028 = vrot.lane.b32.xlu1 %v12004_v26, %s11561_s20 }
 0xa7f   :  { %5694 = vrot.lane.b32.xlu1 %v11974_v24, %s11562_s23  ;;  %v14534_v24 = vld [vmem:[#allocation30_spill] sm:$0xff] }
 0xa81   :  { %11023 = vrot.lane.b32.xlu0 %v11992_v37, %s11561_s20 }
 0xa83   :  { %5783 = vrot.lane.b32.xlu1 %v11986_v31, %s11562_s23  ;;  %v14535_v31 = vld [vmem:[#allocation26_spill] sm:$0xff] }
 0xa85   :  { %5603 = vrot.lane.b32.xlu0 %v11964_v32, %s11562_s23  ;;  %v14536_v32 = vld [vmem:[#allocation28_spill] sm:$0xff] }
 0xa87   :  { %11038 = vrot.lane.b32.xlu1 %v12024_v0, %s11561_s20 }
 0xa89   :  { %5692 = vrot.lane.b32.xlu0 %v11976_v27, %s11562_s23  ;;  %v14537_v27 = vld [vmem:[#allocation31_spill] sm:$0xff] }
 0xa8b   :  { %5876 = vrot.lane.b32.xlu1 %v14533_v22, %s11562_s23 }
 0xa8d   :  { %11033 = vrot.lane.b32.xlu0 %v12014_v58, %s11561_s20 }
 0xa8f   :  { %5965 = vrot.lane.b32.xlu1 %v14534_v24, %s11562_s23 }
 0xa91   :  { %5785 = vrot.lane.b32.xlu0 %v14535_v31, %s11562_s23 }
 0xa93   :  { %11048 = vrot.lane.b32.xlu1 %v12044_v7, %s11561_s20 }
 0xa95   :  { %5874 = vrot.lane.b32.xlu0 %v14536_v32, %s11562_s23 }
 0xa97   :  { %6058 = vrot.lane.b32.xlu1 %v14537_v27, %s11562_s23 }
 0xa99   :  { %11043 = vrot.lane.b32.xlu0 %v12034_v54, %s11561_s20 }
 0xa9b   :  { %6149 = vrot.lane.b32.xlu1 %v14538_v59, %s11562_s23 }
 0xa9d   :  { %5967 = vrot.lane.b32.xlu0 %v14539_v48, %s11562_s23 }
 0xa9f   :  { %6240 = vrot.lane.b32.xlu1 %v14540_v40, %s11562_s23 }
 0xaa1   :  { %6056 = vrot.lane.b32.xlu0 %v14541_v15, %s11562_s23 }
 0xaa3   :  { %11053 = vrot.lane.b32.xlu1 %v11972_v56, %s11563_s24 }
 0xaa5   :  { %6147 = vrot.lane.b32.xlu0 %v14542_v8, %s11562_s23 }
 0xaa6   :  { %v4779_v34 = vpop.xlane.xlu1 %4778 }
 0xaa7   :  { %v4785_v10 = vpop.xlane.xlu0 %4784 }
 0xaa8   :  { %11284 = vrcp.f32 %v4785_v10 }
 0xaa9   :  { %11286 = vrcp.f32 %v4779_v34  ;;  %6238 = vrot.lane.b32.xlu0 %v14543_v11, %s11562_s23 }
 0xaab   :  { %v4782_v23 = vpop.xlane.xlu0 %4781 }
 0xaac   :  { %11288 = vrcp.f32 %v4782_v23 }
 0xaae   :  { %v4791_v24 = vpop.xlane.xlu1 %4790 }
 0xaaf   :  { %v4776_v55 = vpop.xlane.xlu0 %4775 }
 0xab0   :  { %11290 = vrcp.f32 %v4776_v55 }
 0xab2   :  { %v11285_v22 = vpop.eup %11284 }
 0xab3   :  { %v11287_v31 = vpop.eup %11286  ;;  %v4841_v32 = vmul.f32 %v11285_v22, %v4785_v10  ;;  %v4797_v27 = vpop.xlane.xlu0 %4796  ;;  %v11000_v10 = vunpack.i.l.bf16 %v12987_v49 }
 0xab4   :  { %11292 = vrcp.f32 %v4797_v27  ;;  %v4839_v59 = vmul.f32 %v11287_v31, %v4779_v34 }
 0xab5   :  { %11294 = vrcp.f32 %v4791_v24  ;;  %v4857_v48 = vsub.f32 2.0, %v4841_v32  ;;  %v10582_v49 = vpack.c.bf16 %v11001_v60, %v11000_v10 }
 0xab6   :  { %v11289_v56 = vpop.eup %11288  ;;  %v4855_v11 = vsub.f32 2.0, %v4839_v59 }
 0xab7   :  { %v4840_v40 = vmul.f32 %v11289_v56, %v4782_v23  ;;  %v4794_v15 = vpop.xlane.xlu0 %4793  ;;  %v4873_v42 = vmul.f32 %v11285_v22, %v4857_v48  ;;  %v10995_v22 = vunpack.i.l.bf16 %v12991_v35 }
 0xab8   :  { %11296 = vrcp.f32 %v4794_v15  ;;  %v4871_v32 = vmul.f32 %v11287_v31, %v4855_v11 }
 0xab9   :  { %v4856_v8 = vsub.f32 2.0, %v4840_v40  ;;  %v4889_v23 = vmul.f32 %v12955_v14, %v4873_v42 }
 0xaba   :  { %v11291_v50 = vpop.eup %11290 }
 0xabb   :  { %v4872_v18 = vmul.f32 %v11289_v56, %v4856_v8  ;;  %v4838_v19 = vmul.f32 %v11291_v50, %v4776_v55  ;;  %v4788_v3 = vpop.xlane.xlu1 %4787  ;;  %v10996_v55 = vunpack.i.h.bf16 %v12991_v35 }
 0xabc   :  { %11298 = vrcp.f32 %v4788_v3 }
 0xabd   :  { %v4854_v61 = vsub.f32 2.0, %v4838_v19  ;;  %v4888_v1 = vmul.f32 %v12962_v38, %v4872_v18  ;;  %v4887_v38 = vmul.f32 %v12953_v33, %v4871_v32  ;;  %v11011_v33 = vunpack.i.h.bf16 %v13065_v41 }
 0xabe   :  { %v11293_v34 = vpop.eup %11292 }
 0xabf   :  { %v11295_v13 = vpop.eup %11294  ;;  %v4870_v40 = vmul.f32 %v11291_v50, %v4854_v61  ;;  %v4845_v2 = vmul.f32 %v11293_v34, %v4797_v27  ;;  %9981 = vmatprep.mubr.msk.f32.mxu1 %vm1375_vm3, %v4888_v1  ;;  %v10578_v1 = vpack.c.bf16 %v10996_v55, %v10995_v22 }
 0xac0   :  { %9982 = vmatmul.mubr.msk.f32.vlgmr.msra.gmra.mrb[60].mxu1 %vm1375_vm3, %v4889_v23  ;;  %v4843_v42 = vmul.f32 %v11295_v13, %v4791_v24 }
 0xac1   :  { %10577 = vmatpush3.bf16.msra.mxu1 %v12829_v30  ;;  %v4886_v19 = vmul.f32 %v12969_v4, %v4870_v40  ;;  %v4861_v14 = vsub.f32 2.0, %v4845_v2  ;;  %v11010_v2 = vunpack.i.l.bf16 %v13065_v41 }
 0xac2   :  { %v11297_v18 = vpop.eup %11296  ;;  %10583 = vmatprep.subr.bf16.mxu1 %v10582_v49  ;;  %v4859_v35 = vsub.f32 2.0, %v4843_v42 }
 0xac3   :  { %v4844_v61 = vmul.f32 %v11297_v18, %v4794_v15  ;;  %9974 = vmatprep.mubr.msk.f32.mxu0 %vm1375_vm3, %v4886_v19  ;;  %v4877_v30 = vmul.f32 %v11293_v34, %v4861_v14  ;;  %v11005_v15 = vunpack.i.l.bf16 %v13067_v46 }
 0xac4   :  { %9975 = vmatmul.mubr.msk.f32.vlgmr.msra.gmra.mrb[52].mxu0 %vm1375_vm3, %v4887_v38  ;;  %v4875_v56 = vmul.f32 %v11295_v13, %v4859_v35 }
 0xac5   :  { %v4860_v50 = vsub.f32 2.0, %v4844_v61  ;;  %10573 = vmatpush3.bf16.msra.mxu0 %v12826_v21  ;;  %v4893_v59 = vmul.f32 %v12975_v16, %v4877_v30  ;;  %v11006_v21 = vunpack.i.h.bf16 %v13067_v46  ;;  %v11016_v30 = vunpack.i.h.bf16 %v13077_v6 }
 0xac6   :  { %v11299_v60 = vpop.eup %11298  ;;  %10579 = vmatprep.subr.bf16.mxu0 %v10578_v1  ;;  %v4891_v8 = vmul.f32 %v12967_v63, %v4875_v56 }
 0xac7   :  { %v4876_v4 = vmul.f32 %v11297_v18, %v4860_v50  ;;  %v4842_v31 = vmul.f32 %v11299_v60, %v4788_v3  ;;  %v13107_v3 = vpack.c.bf16 %v11011_v33, %v11010_v2  ;;  %v10586_v13 = vpack.c.bf16 %v11006_v21, %v11005_v15 }
 0xac9   :  { %v4858_v24 = vsub.f32 2.0, %v4842_v31  ;;  %v4892_v27 = vmul.f32 %v12979_v28, %v4876_v4  ;;  %v11015_v4 = vunpack.i.l.bf16 %v13077_v6 }
 0xacb   :  { %v4874_v48 = vmul.f32 %v11299_v60, %v4858_v24  ;;  %9995 = vmatprep.mubr.msk.f32.mxu1 %vm1375_vm3, %v4892_v27 }
 0xacc   :  { %9996 = vmatmul.mubr.msk.f32.vlgmr.msra.gmra.mrb[62].mxu1 %vm1375_vm3, %v4893_v59 }
 0xacd   :  { %10585 = vmatpush3.bf16.msra.mxu1 %v10582_v49  ;;  %v4890_v41 = vmul.f32 %v12983_v57, %v4874_v48 }
 0xace   :  { %10591 = vmatprep.subr.bf16.mxu1 %v13107_v3 }
 0xacf   :  { %9988 = vmatprep.mubr.msk.f32.mxu0 %vm1375_vm3, %v4890_v41 }
 0xad0   :  { %9989 = vmatmul.mubr.msk.f32.vlgmr.msra.gmra.mrb[54].mxu0 %vm1375_vm3, %v4891_v8  ;;  %v10594_v8 = vpack.c.bf16 %v11016_v30, %v11015_v4 }
 0xad1   :  { %10581 = vmatpush3.bf16.msra.mxu0 %v10578_v1 }
 0xad2   :  { %10587 = vmatprep.subr.bf16.mxu0 %v10586_v13 }
 0xae3   :  { %v4809_v16 = vpop.xlane.xlu1 %4808 }
 0xae7   :  { %v4803_v28 = vpop.xlane.xlu1 %4802 }
 0xae8   :  { %11300 = vrcp.f32 %v4803_v28 }
 0xae9   :  { %11302 = vrcp.f32 %v4809_v16 }
 0xaeb   :  { %v4800_v46 = vpop.xlane.xlu1 %4799 }
 0xaec   :  { %11304 = vrcp.f32 %v4800_v46 }
 0xaef   :  { %v4821_v11 = vpop.xlane.xlu1 %4820 }
 0xaf0   :  { %11306 = vrcp.f32 %v4821_v11  ;;  %v4806_v57 = vpop.xlane.xlu0 %4805 }
 0xaf1   :  { %11308 = vrcp.f32 %v4806_v57 }
 0xaf2   :  { %v11301_v63 = vpop.eup %11300 }
 0xaf3   :  { %v4847_v10 = vmul.f32 %v11301_v63, %v4803_v28  ;;  %v4815_v34 = vpop.xlane.xlu1 %4814  ;;  %v11303_v32 = vpop.eup %11302 }
 0xaf4   :  { %11310 = vrcp.f32 %v4815_v34  ;;  %v4818_v23 = vpop.xlane.xlu0 %4817  ;;  %v4849_v22 = vmul.f32 %v11303_v32, %v4809_v16 }
 0xaf5   :  { %11312 = vrcp.f32 %v4818_v23  ;;  %v4863_v55 = vsub.f32 2.0, %v4847_v10 }
 0xaf6   :  { %v11305_v40 = vpop.eup %11304  ;;  %v4865_v1 = vsub.f32 2.0, %v4849_v22 }
 0xaf7   :  { %v4846_v49 = vmul.f32 %v11305_v40, %v4800_v46  ;;  %v13114_v19 = vpop.permute.xlu1 %5601  ;;  %v4879_v14 = vmul.f32 %v11301_v63, %v4863_v55  ;;  %v11020_v46 = vunpack.i.l.bf16 %v13075_v45 }
 0xaf8   :  { %v4812_v18 = vpop.xlane.xlu0 %4811  ;;  %v4881_v48 = vmul.f32 %v11303_v32, %v4865_v1 }
 0xaf9   :  { %v4862_v38 = vsub.f32 2.0, %v4846_v49  ;;  %11314 = vrcp.f32 %v4812_v18  ;;  %v4895_v27 = vmul.f32 %v13002_v12, %v4879_v14 }
 0xafa   :  { %v11307_v42 = vpop.eup %11306  ;;  %v4897_v63 = vmul.f32 %v12996_v51, %v4881_v48 }
 0xafb   :  { %v11309_v61 = vpop.eup %11308  ;;  %v4878_v50 = vmul.f32 %v11305_v40, %v4862_v38  ;;  %v4853_v60 = vmul.f32 %v11307_v42, %v4821_v11  ;;  %v11029_v35 = vpop.permute.xlu1 %11028 }
 0xafc   :  { %v4848_v31 = vmul.f32 %v11309_v61, %v4806_v57  ;;  %v11024_v33 = vpop.permute.xlu0 %11023  ;;  %v11030_v1 = vunpack.i.l.bf16 %v11029_v35 }
 0xafd   :  { %v4894_v2 = vmul.f32 %v13007_v52, %v4878_v50  ;;  %v4869_v21 = vsub.f32 2.0, %v4853_v60  ;;  %v11021_v52 = vunpack.i.h.bf16 %v13075_v45  ;;  %v11025_v14 = vunpack.i.l.bf16 %v11024_v33 }
 0xafe   :  { %v11311_v24 = vpop.eup %11310  ;;  %v4864_v56 = vsub.f32 2.0, %v4848_v31 }
 0xaff   :  { %v11313_v59 = vpop.eup %11312  ;;  %v4851_v15 = vmul.f32 %v11311_v24, %v4815_v34  ;;  %v13120_v41 = vpop.permute.xlu1 %5694  ;;  %10002 = vmatprep.mubr.msk.f32.mxu0 %vm1375_vm3, %v4894_v2  ;;  %v4885_v10 = vmul.f32 %v11307_v42, %v4869_v21  ;;  %v10600_v22 = vpack.c.bf16 %v11021_v52, %v11020_v46  ;;  %v11026_v42 = vunpack.i.h.bf16 %v11024_v33 }
 0xb00   :  { %v4880_v16 = vmul.f32 %v11309_v61, %v4864_v56  ;;  %v4852_v28 = vmul.f32 %v11313_v59, %v4818_v23  ;;  %v5604_v6 = vpop.permute.xlu0 %5603  ;;  %10003 = vmatmul.mubr.msk.f32.vlgmr.msra.gmra.mrb[56].mxu0 %vm1375_vm3, %v4895_v27  ;;  %v11031_v61 = vunpack.i.h.bf16 %v11029_v35 }
 0xb01   :  { %10589 = vmatpush3.bf16.msra.mxu0 %v10586_v13  ;;  %v4867_v34 = vsub.f32 2.0, %v4851_v15  ;;  %v10606_v60 = vpack.c.bf16 %v11026_v42, %v11025_v14 }
 0xb02   :  { %v4868_v12 = vsub.f32 2.0, %v4852_v28  ;;  %10596 = vmatprep.subr.msk.bf16.mxu0 %vm12058_vm2, %v10594_v8  ;;  %v4896_v11 = vmul.f32 %v13013_v44, %v4880_v16  ;;  %v4901_v44 = vmul.f32 %v13011_v47, %v4885_v10  ;;  %v10612_v30 = vpack.c.bf16 %v11031_v61, %v11030_v1  ;;  %v9077_v61 = vld [vmem:[%s14411_s8 + $0x38] sm:$0xff] }
 0xb03   :  { %v11315_v57 = vpop.eup %11314  ;;  %v5784_v32 = vpop.permute.xlu1 %5783  ;;  %v4883_v49 = vmul.f32 %v11311_v24, %v4867_v34 }
 0xb04   :  { %v4884_v23 = vmul.f32 %v11313_v59, %v4868_v12  ;;  %v4850_v40 = vmul.f32 %v11315_v57, %v4812_v18  ;;  %10009 = vmatprep.mubr.msk.f32.mxu1 %vm1375_vm3, %v4896_v11  ;;  %v5693_v55 = vpop.permute.xlu0 %5692 }
 0xb05   :  { %10010 = vmatmul.mubr.msk.f32.vlgmr.msra.gmra.mrb[64].mxu1 %vm1375_vm3, %v4897_v63  ;;  %v4899_v47 = vmul.f32 %v13019_v9, %v4883_v49 }
 0xb06   :  { %v4866_v45 = vsub.f32 2.0, %v4850_v40  ;;  %10593 = vmatpush3.bf16.msra.mxu1 %v13107_v3  ;;  %v4900_v13 = vmul.f32 %v13021_v53, %v4884_v23 }
 0xb07   :  { %10602 = vmatprep.subr.msk.bf16.mxu1 %vm12058_vm2, %v10600_v22  ;;  %v11039_v51 = vpop.permute.xlu1 %11038 }
 0xb08   :  { %v4882_v38 = vmul.f32 %v11315_v57, %v4866_v45  ;;  %10023 = vmatprep.mubr.msk.f32.mxu1 %vm1375_vm3, %v4900_v13  ;;  %v11034_v18 = vpop.permute.xlu0 %11033  ;;  %v11041_v31 = vunpack.i.h.bf16 %v11039_v51  ;;  %v11040_v33 = vunpack.i.l.bf16 %v11039_v51 }
 0xb09   :  { %10024 = vmatmul.mubr.msk.f32.vlgmr.msra.gmra.mrb[66].mxu1 %vm1375_vm3, %v4901_v44  ;;  %v11036_v35 = vunpack.i.h.bf16 %v11034_v18  ;;  %v11035_v4 = vunpack.i.l.bf16 %v11034_v18 }
 0xb0a   :  { %10037 = vmatprep.mubr.msk.f32.mxu1 %vm668_vm1, %v5693_v55  ;;  %v4898_v53 = vmul.f32 %v13027_v62, %v4882_v38  ;;  %v10624_v27 = vpack.c.bf16 %v11041_v31, %v11040_v33 }
 0xb0b   :  { %v5877_v3 = vpop.permute.xlu1 %5876 }
 0xb0c   :  { %v5786_v50 = vpop.permute.xlu0 %5785  ;;  %10016 = vmatprep.mubr.msk.f32.mxu0 %vm1375_vm3, %v4898_v53 }
 0xb0d   :  { %10017 = vmatmul.mubr.msk.f32.vlgmr.msra.gmra.mrb[58].mxu0 %vm1375_vm3, %v4899_v47 }
 0xb0e   :  { %10599 = vmatpush3.bf16.xpose.msk.msra.mxu0 %vm12058_vm2, %v10594_v8  ;;  %10030 = vmatprep.mubr.msk.f32.mxu0 %vm668_vm1, %v13114_v19  ;;  %v10618_v19 = vpack.c.bf16 %v11036_v35, %v11035_v4 }
 0xb0f   :  { %10605 = vmatpush3.bf16.xpose.msk.msra.mxu1 %vm12058_vm2, %v10600_v22  ;;  %10608 = vmatprep.subr.msk.bf16.mxu0 %vm12058_vm2, %v10606_v60  ;;  %v5966_v9 = vpop.permute.xlu1 %5965 }
 0xb10   :  { %10614 = vmatprep.subr.msk.bf16.mxu1 %vm12058_vm2, %v10612_v30  ;;  %v5875_v62 = vpop.permute.xlu0 %5874 }
 0xb13   :  { %v11049_v2 = vpop.permute.xlu1 %11048 }
 0xb14   :  { %v11044_v24 = vpop.permute.xlu0 %11043  ;;  %v11051_v15 = vunpack.i.h.bf16 %v11049_v2 }
 0xb15   :  { %10031 = vmatmul.mubr.msk.f32.vlgmr.msra.gmra.mrb[60].mxu0 %vm668_vm1, %v5604_v6  ;;  %v11046_v48 = vunpack.i.h.bf16 %v11044_v24  ;;  %v11045_v21 = vunpack.i.l.bf16 %v11044_v24 }
 0xb16   :  { %10038 = vmatmul.mubr.msk.f32.vlgmr.msra.gmra.mrb[68].mxu1 %vm668_vm1, %v13120_v41  ;;  %10611 = vmatpush3.bf16.xpose.msk.msra.mxu0 %vm12058_vm2, %v10606_v60  ;;  %v11050_v41 = vunpack.i.l.bf16 %v11049_v2 }
 0xb17   :  { %10044 = vmatprep.mubr.msk.f32.mxu0 %vm668_vm1, %v5784_v32  ;;  %10617 = vmatpush3.bf16.xpose.msk.msra.mxu1 %vm12058_vm2, %v10612_v30  ;;  %v6059_v56 = vpop.permute.xlu1 %6058  ;;  %v10630_v28 = vpack.c.bf16 %v11046_v48, %v11045_v21 }
 0xb18   :  { %10051 = vmatprep.mubr.msk.f32.mxu1 %vm668_vm1, %v5875_v62  ;;  %10620 = vmatprep.subr.msk.bf16.mxu0 %vm12058_vm2, %v10618_v19  ;;  %v5968_v59 = vpop.permute.xlu0 %5967  ;;  %v10636_v6 = vpack.c.bf16 %v11051_v15, %v11050_v41 }
 0xb19   :  { %10626 = vmatprep.subr.msk.bf16.mxu1 %vm12058_vm2, %v10624_v27 }
 0xb1b   :  { %v6150_v8 = vpop.permute.xlu1 %6149 }
 0xb1c   :  { %v6057_v16 = vpop.permute.xlu0 %6056 }
 0xb1d   :  { %10045 = vmatmul.mubr.msk.f32.vlgmr.msra.gmra.mrb[62].mxu0 %vm668_vm1, %v5786_v50 }
 0xb1e   :  { %10052 = vmatmul.mubr.msk.f32.vlgmr.msra.gmra.mrb[70].mxu1 %vm668_vm1, %v5877_v3  ;;  %10623 = vmatpush3.bf16.xpose.msk.msra.mxu0 %vm12058_vm2, %v10618_v19  ;;  %v9076_v3 = vld [vmem:[%s14411_s8 + $0x30] sm:$0xff]  ;;  %s11564_s8 = smov 16  }
 0xb1f   :  { %10058 = vmatprep.mubr.msk.f32.mxu0 %vm668_vm1, %v5966_v9  ;;  %10629 = vmatpush3.bf16.xpose.msk.msra.mxu1 %vm12058_vm2, %v10624_v27  ;;  %v6241_v52 = vpop.permute.xlu1 %6240 }
 0xb20   :  { %10065 = vmatprep.mubr.msk.f32.mxu1 %vm668_vm1, %v6057_v16  ;;  %10632 = vmatprep.subr.msk.bf16.mxu0 %vm12058_vm2, %v10630_v28  ;;  %v6148_v46 = vpop.permute.xlu0 %6147 }
 0xb21   :  { %10638 = vmatprep.subr.msk.bf16.mxu1 %vm12058_vm2, %v10636_v6 }
 0xb23   :  { %v11054_v12 = vpop.permute.xlu1 %11053 }
 0xb24   :  { %v11056_v11 = vunpack.i.h.bf16 %v11054_v12  ;;  %v11055_v57 = vunpack.i.l.bf16 %v11054_v12  ;;  %v6239_v63 = vpop.permute.xlu0 %6238 }
 0xb25   :  { %10059 = vmatmul.mubr.msk.f32.vlgmr.msra.gmra.mrb[64].mxu0 %vm668_vm1, %v5968_v59 }
 0xb26   :  { %10066 = vmatmul.mubr.msk.f32.vlgmr.msra.gmra.mrb[72].mxu1 %vm668_vm1, %v6059_v56  ;;  %10635 = vmatpush3.bf16.xpose.msk.msra.mxu0 %vm12058_vm2, %v10630_v28  ;;  %v10642_v10 = vpack.c.bf16 %v11056_v11, %v11055_v57 }
 0xb27   :  { %10072 = vmatprep.mubr.msk.f32.mxu0 %vm668_vm1, %v6148_v46  ;;  %10641 = vmatpush3.bf16.xpose.msk.msra.mxu1 %vm12058_vm2, %v10636_v6 }
 0xb28   :  { %10079 = vmatprep.mubr.msk.f32.mxu1 %vm668_vm1, %v6239_v63  ;;  %10643 = vmatprep.subr.bf16.mxu0 %v10642_v10 }
 0xb2d   :  { %10073 = vmatmul.mubr.msk.f32.vlgmr.msra.gmra.mrb[66].mxu0 %vm668_vm1, %v6150_v8 }
 0xb2e   :  { %10080 = vmatmul.mubr.msk.f32.vlgmr.msra.gmra.mrb[74].mxu1 %vm668_vm1, %v6241_v52  ;;  %10645 = vmatpush3.bf16.msra.mxu0 %v10642_v10 }
 0xb93   :  { %v13189_v34 = vpop.f32.mrb[60].mxu1 }
 0xb94   :  { %v13191_v32 = vpop.f32.mrb[61].mxu1 }
 0xb97   :  { %v13193_v23 = vpop.f32.mrb[52].mxu0 }
 0xb98   :  { %v13195_v40 = vpop.f32.mrb[53].mxu0 }
 0xb9f   :  { %v13197_v55 = vpop.f32.mrb[62].mxu1 }
 0xba0   :  { %v13199_v20 = vpop.f32.mrb[63].mxu1 }
 0xba3   :  { %v13201_v22 = vpop.f32.mrb[54].mxu0 }
 0xba4   :  { %v13203_v45 = vpop.f32.mrb[55].mxu0 }
 0xbd3   :  { %v13205_v13 = vpop.f32.mrb[56].mxu0 }
 0xbd4   :  { %v13207_v44 = vpop.f32.mrb[57].mxu0 }
 0xbd8   :  { %v13209_v49 = vpop.f32.mrb[64].mxu1 }
 0xbd9   :  { %v13211_v51 = vpop.f32.mrb[65].mxu1 }
 0xbdc   :  { %v13213_v38 = vpop.f32.mrb[66].mxu1 }
 0xbdd   :  { %v13215_v18 = vpop.f32.mrb[67].mxu1 }
 0xbe0   :  { %v13217_v42 = vpop.f32.mrb[58].mxu0 }
 0xbe1   :  { %v13219_v14 = vpop.f32.mrb[59].mxu0 }
 0xbe8   :  { %v10032_v1 = vpop.f32.mrb[60].mxu0 }
 0xbe9   :  { %v13224_v53 = vadd.f32 %v10032_v1, %v9077_v61  ;;  %v5683_v47 = vpop.f32.mrb[61].mxu0  ;;  %v10039_v50 = vpop.f32.mrb[68].mxu1 }
 0xbea   :  { %v13229_v60 = vadd.f32 %v10039_v50, %v9077_v61  ;;  %v5774_v30 = vpop.f32.mrb[69].mxu1  ;;  %v13237_v4 = vadd.f32 %v9076_v3, %v5683_v47 }
 0xbeb   :  { %v6332_v9 = vsel %vm1375_vm3, %v13224_v53, -inf  ;;  %v13233_v62 = vadd.f32 %v9076_v3, %v5774_v30 }
 0xbec   :  { %6333 = vmax.xlane.f32.xlu1 %v6332_v9  ;;  %v6338_v35 = vsel %vm1375_vm3, %v13229_v60, -inf  ;;  %v6329_v21 = vsel %vm1375_vm3, %v13237_v4, -inf }
 0xbed   :  { %6339 = vmax.xlane.f32.xlu0 %v6338_v35  ;;  %v6335_v33 = vsel %vm1375_vm3, %v13233_v62, -inf }
 0xbf0   :  { %v10046_v31 = vpop.f32.mrb[62].mxu0 }
 0xbf1   :  { %6336 = vmax.xlane.f32.xlu0 %v6335_v33  ;;  %v5865_v2 = vpop.f32.mrb[63].mxu0  ;;  %v10053_v24 = vpop.f32.mrb[70].mxu1  ;;  %v13243_v56 = vadd.f32 %v10046_v31, %v9077_v61 }
 0xbf2   :  { %v13241_v19 = vadd.f32 %v10053_v24, %v9077_v61  ;;  %v5956_v27 = vpop.f32.mrb[71].mxu1  ;;  %v13251_v15 = vadd.f32 %v9076_v3, %v5865_v2 }
 0xbf3   :  { %v13245_v59 = vadd.f32 %v9076_v3, %v5956_v27  ;;  %v6344_v8 = vsel %vm1375_vm3, %v13243_v56, -inf }
 0xbf4   :  { %v6350_v48 = vsel %vm1375_vm3, %v13241_v19, -inf  ;;  %v6341_v63 = vsel %vm1375_vm3, %v13251_v15, -inf }
 0xbf5   :  { %6351 = vmax.xlane.f32.xlu1 %v6350_v48  ;;  %6330 = vmax.xlane.f32.xlu0 %v6329_v21  ;;  %v6347_v16 = vsel %vm1375_vm3, %v13245_v59, -inf }
 0xbf8   :  { %v10060_v41 = vpop.f32.mrb[64].mxu0 }
 0xbf9   :  { %v10067_v28 = vpop.f32.mrb[72].mxu1  ;;  %6345 = vmax.xlane.f32.xlu1 %v6344_v8  ;;  %v6047_v6 = vpop.f32.mrb[65].mxu0  ;;  %6348 = vmax.xlane.f32.xlu0 %v6347_v16  ;;  %v13259_v12 = vadd.f32 %v10060_v41, %v9077_v61 }
 0xbfa   :  { %v13257_v52 = vadd.f32 %v10067_v28, %v9077_v61  ;;  %v6138_v46 = vpop.f32.mrb[73].mxu1  ;;  %v13267_v10 = vadd.f32 %v9076_v3, %v6047_v6 }
 0xbfb   :  { %v13261_v11 = vadd.f32 %v9076_v3, %v6138_v46  ;;  %v6356_v47 = vsel %vm1375_vm3, %v13259_v12, -inf }
 0xbfc   :  { %v6362_v57 = vsel %vm1375_vm3, %v13257_v52, -inf  ;;  %v6353_v27 = vsel %vm1375_vm3, %v13267_v10, -inf }
 0xbfd   :  { %6363 = vmax.xlane.f32.xlu1 %v6362_v57  ;;  %6342 = vmax.xlane.f32.xlu0 %v6341_v63  ;;  %v6359_v50 = vsel %vm1375_vm3, %v13261_v11, -inf }
 0xc00   :  { %v10074_v1 = vpop.f32.mrb[66].mxu0 }
 0xc01   :  { %v10081_v30 = vpop.f32.mrb[74].mxu1  ;;  %6357 = vmax.xlane.f32.xlu1 %v6356_v47  ;;  %v6229_v9 = vpop.f32.mrb[67].mxu0  ;;  %6360 = vmax.xlane.f32.xlu0 %v6359_v50  ;;  %v13275_v33 = vadd.f32 %v10074_v1, %v9077_v61 }
 0xc02   :  { %v13273_v35 = vadd.f32 %v10081_v30, %v9077_v61  ;;  %v6320_v31 = vpop.f32.mrb[75].mxu1  ;;  %v13283_v48 = vadd.f32 %v9076_v3, %v6229_v9 }
 0xc03   :  { %v13277_v2 = vadd.f32 %v9076_v3, %v6320_v31  ;;  %v6368_v21 = vsel %vm1375_vm3, %v13275_v33, -inf }
 0xc04   :  { %v6374_v24 = vsel %vm1375_vm3, %v13273_v35, -inf  ;;  %v6365_v61 = vsel %vm1375_vm3, %v13283_v48, -inf }
 0xc05   :  { %6375 = vmax.xlane.f32.xlu1 %v6374_v24  ;;  %6354 = vmax.xlane.f32.xlu0 %v6353_v27  ;;  %v6371_v41 = vsel %vm1375_vm3, %v13277_v2, -inf }
 0xc09   :  { %6369 = vmax.xlane.f32.xlu1 %v6368_v21  ;;  %6372 = vmax.xlane.f32.xlu0 %v6371_v41 }
 0xc0d   :  { %6366 = vmax.xlane.f32.xlu0 %v6365_v61 }
 0xc1a   :  { %11063 = vrot.lane.b32.xlu1 %v11992_v37, %s11563_s24 }
 0xc1e   :  { %11068 = vrot.lane.b32.xlu1 %v12004_v26, %s11563_s24 }
 0xc22   :  { %11073 = vrot.lane.b32.xlu1 %v12014_v58, %s11563_s24 }
 0xc23   :  { %11058 = vrot.lane.b32.xlu0 %v11982_v17, %s11563_s24 }
 0xc26   :  { %11078 = vrot.lane.b32.xlu1 %v12024_v0, %s11563_s24 }
 0xc79   :  { %v6334_v3 = vpop.xlane.xlu1 %6333 }
 0xc7a   :  { %v6378_v8 = vsub.f32 %v13224_v53, %v6334_v3  ;;  %v6340_v16 = vpop.xlane.xlu0 %6339 }
 0xc7b   :  { %v6380_v28 = vsub.f32 %v13229_v60, %v6340_v16 }
 0xc7c   :  { %v6395_v6 = vmul.f32 1.442695, %v6378_v8 }
 0xc7d   :  { %v6399_v37 = vmul.f32 1.442695, %v6380_v28 }
 0xc7e   :  { %v6337_v46 = vpop.xlane.xlu0 %6336 }
 0xc7f   :  { %11316 = vpow2.f32 %v6399_v37  ;;  %v6379_v26 = vsub.f32 %v13233_v62, %v6337_v46 }
 0xc80   :  { %11318 = vpow2.f32 %v6395_v6 }
 0xc81   :  { %v6397_v58 = vmul.f32 1.442695, %v6379_v26 }
 0xc82   :  { %v6352_v57 = vpop.xlane.xlu1 %6351  ;;  %v6331_v63 = vpop.xlane.xlu0 %6330 }
 0xc83   :  { %11320 = vpow2.f32 %v6397_v58  ;;  %v6384_v17 = vsub.f32 %v13241_v19, %v6352_v57  ;;  %v6377_v0 = vsub.f32 %v13237_v4, %v6331_v63 }
 0xc85   :  { %v6407_v1 = vmul.f32 1.442695, %v6384_v17  ;;  %v6393_v53 = vmul.f32 1.442695, %v6377_v0 }
 0xc86   :  { %v6346_v47 = vpop.xlane.xlu1 %6345  ;;  %v6349_v50 = vpop.xlane.xlu0 %6348 }
 0xc87   :  { %11322 = vpow2.f32 %v6407_v1  ;;  %v6382_v60 = vsub.f32 %v13243_v56, %v6346_v47  ;;  %v6383_v30 = vsub.f32 %v13245_v59, %v6349_v50 }
 0xc88   :  { %11324 = vpow2.f32 %v6393_v53 }
 0xc89   :  { %v13308_v62 = vpop.eup %11316  ;;  %v6403_v9 = vmul.f32 1.442695, %v6382_v60  ;;  %v6405_v31 = vmul.f32 1.442695, %v6383_v30 }
 0xc8a   :  { %v6364_v24 = vpop.xlane.xlu1 %6363  ;;  %v6343_v27 = vpop.xlane.xlu0 %6342  ;;  %v6434_v19 = vsel %vm1375_vm3, %v13308_v62, 0.0 }
 0xc8b   :  { %v13312_v4 = vpop.eup %11318  ;;  %11326 = vpow2.f32 %v6403_v9  ;;  %v6388_v21 = vsub.f32 %v13257_v52, %v6364_v24  ;;  %v6381_v41 = vsub.f32 %v13251_v15, %v6343_v27  ;;  %6435 = vadd.xlane.f32.xlu1 %v6434_v19 }
 0xc8c   :  { %11328 = vpow2.f32 %v6405_v31  ;;  %v6428_v16 = vsel %vm1375_vm3, %v13312_v4, 0.0 }
 0xc8d   :  { %v13316_v56 = vpop.eup %11320  ;;  %v6415_v59 = vmul.f32 1.442695, %v6388_v21  ;;  %v6401_v61 = vmul.f32 1.442695, %v6381_v41 }
 0xc8e   :  { %v6358_v3 = vpop.xlane.xlu1 %6357  ;;  %v6361_v8 = vpop.xlane.xlu0 %6360  ;;  %v6431_v28 = vsel %vm1375_vm3, %v13316_v56, 0.0 }
 0xc8f   :  { %11330 = vpow2.f32 %v6415_v59  ;;  %v6386_v6 = vsub.f32 %v13259_v12, %v6358_v3  ;;  %v6387_v52 = vsub.f32 %v13261_v11, %v6361_v8  ;;  %6429 = vadd.xlane.f32.xlu1 %v6428_v16  ;;  %6432 = vadd.xlane.f32.xlu0 %v6431_v28 }
 0xc90   :  { %11332 = vpow2.f32 %v6401_v61 }
 0xc91   :  { %v13324_v15 = vpop.eup %11322  ;;  %v6411_v37 = vmul.f32 1.442695, %v6386_v6  ;;  %v6413_v46 = vmul.f32 1.442695, %v6387_v52 }
 0xc92   :  { %v13326_v26 = vpop.eup %11324  ;;  %v6376_v58 = vpop.xlane.xlu1 %6375  ;;  %v6446_v63 = vsel %vm1375_vm3, %v13324_v15, 0.0 }
 0xc93   :  { %v6355_v57 = vpop.xlane.xlu0 %6354  ;;  %11334 = vpow2.f32 %v6411_v37  ;;  %v6392_v17 = vsub.f32 %v13273_v35, %v6376_v58  ;;  %6447 = vadd.xlane.f32.xlu1 %v6446_v63  ;;  %v6425_v11 = vsel %vm1375_vm3, %v13326_v26, 0.0 }
 0xc94   :  { %v6385_v12 = vsub.f32 %v13267_v10, %v6355_v57  ;;  %11336 = vpow2.f32 %v6413_v46  ;;  %6426 = vadd.xlane.f32.xlu0 %v6425_v11 }
 0xc95   :  { %v13334_v0 = vpop.eup %11326  ;;  %v6423_v47 = vmul.f32 1.442695, %v6392_v17 }
 0xc96   :  { %v6409_v1 = vmul.f32 1.442695, %v6385_v12  ;;  %v13336_v53 = vpop.eup %11328  ;;  %v6370_v50 = vpop.xlane.xlu1 %6369  ;;  %v6440_v30 = vsel %vm1375_vm3, %v13334_v0, 0.0 }
 0xc97   :  { %v6373_v60 = vpop.xlane.xlu0 %6372  ;;  %v6390_v35 = vsub.f32 %v13275_v33, %v6370_v50  ;;  %6441 = vadd.xlane.f32.xlu1 %v6440_v30  ;;  %v6443_v9 = vsel %vm1375_vm3, %v13336_v53, 0.0 }
 0xc98   :  { %v6391_v10 = vsub.f32 %v13277_v2, %v6373_v60  ;;  %11338 = vpow2.f32 %v6409_v1  ;;  %6444 = vadd.xlane.f32.xlu0 %v6443_v9 }
 0xc99   :  { %v13344_v31 = vpop.eup %11330  ;;  %v6419_v24 = vmul.f32 1.442695, %v6390_v35  ;;  %11340 = vpow2.f32 %v6423_v47 }
 0xc9a   :  { %v13346_v27 = vpop.eup %11332  ;;  %v6421_v19 = vmul.f32 1.442695, %v6391_v10  ;;  %v11064_v21 = vpop.permute.xlu1 %11063  ;;  %v6458_v33 = vsel %vm1375_vm3, %v13344_v31, 0.0 }
 0xc9b   :  { %v6367_v41 = vpop.xlane.xlu0 %6366  ;;  %11342 = vpow2.f32 %v6419_v24  ;;  %v11066_v2 = vunpack.i.h.bf16 %v11064_v21  ;;  %v11065_v59 = vunpack.i.l.bf16 %v11064_v21  ;;  %6459 = vadd.xlane.f32.xlu1 %v6458_v33  ;;  %v6437_v3 = vsel %vm1375_vm3, %v13346_v27, 0.0 }
 0xc9c   :  { %v6389_v61 = vsub.f32 %v13283_v48, %v6367_v41  ;;  %6438 = vadd.xlane.f32.xlu0 %v6437_v3  ;;  %11344 = vpow2.f32 %v6421_v19 }
 0xc9d   :  { %v13353_v8 = vpop.eup %11334  ;;  %v13355_v16 = vpack.c.bf16 %v11066_v2, %v11065_v59 }
 0xc9e   :  { %v13357_v28 = vpop.eup %11336  ;;  %v11069_v6 = vpop.permute.xlu1 %11068  ;;  %v6452_v37 = vsel %vm1375_vm3, %v13353_v8, 0.0  ;;  %v6417_v46 = vmul.f32 1.442695, %v6389_v61 }
 0xc9f   :  { %v11059_v52 = vpop.permute.xlu0 %11058  ;;  %6453 = vadd.xlane.f32.xlu1 %v6452_v37  ;;  %10651 = vmatprep.subr.bf16.mxu0 %v13355_v16  ;;  %v11071_v48 = vunpack.i.h.bf16 %v11069_v6  ;;  %v11070_v57 = vunpack.i.l.bf16 %v11069_v6  ;;  %v6455_v17 = vsel %vm1375_vm3, %v13357_v28, 0.0 }
 0xca0   :  { %v11061_v58 = vunpack.i.h.bf16 %v11059_v52  ;;  %v11060_v63 = vunpack.i.l.bf16 %v11059_v52  ;;  %6456 = vadd.xlane.f32.xlu0 %v6455_v17  ;;  %11346 = vpow2.f32 %v6417_v46 }
 0xca1   :  { %v13370_v50 = vpack.c.bf16 %v11071_v48, %v11070_v57 }
 0xca2   :  { %v13364_v12 = vpop.eup %11338  ;;  %v10646_v11 = vpack.c.bf16 %v11061_v58, %v11060_v63 }
 0xca3   :  { %v6449_v1 = vsel %vm1375_vm3, %v13364_v12, 0.0  ;;  %v13368_v47 = vpop.eup %11340 }
 0xca4   :  { %10647 = vmatprep.subr.bf16.mxu1 %v10646_v11  ;;  %6450 = vadd.xlane.f32.xlu0 %v6449_v1  ;;  %v6470_v35 = vsel %vm1375_vm3, %v13368_v47, 0.0 }
 0xca5   :  { %v13372_v60 = vpop.eup %11342  ;;  %10649 = vmatpush3.bf16.msra.mxu1 %v10646_v11 }
 0xca6   :  { %10655 = vmatprep.subr.bf16.mxu1 %v13370_v50  ;;  %v6464_v30 = vsel %vm1375_vm3, %v13372_v60, 0.0  ;;  %v13379_v10 = vpop.eup %11344 }
 0xca7   :  { %6465 = vadd.xlane.f32.xlu1 %v6464_v30  ;;  %v6467_v9 = vsel %vm1375_vm3, %v13379_v10, 0.0 }
 0xca8   :  { %6471 = vadd.xlane.f32.xlu0 %v6470_v35 }
 0xcaa   :  { %v13383_v24 = vpop.eup %11346 }
 0xcab   :  { %v6461_v19 = vsel %vm1375_vm3, %v13383_v24, 0.0 }
 0xcac   :  { %6468 = vadd.xlane.f32.xlu0 %v6467_v9 }
 0xcb0   :  { %6462 = vadd.xlane.f32.xlu0 %v6461_v19 }
 0xcb8   :  { %11088 = vrot.lane.b32.xlu1 %v12044_v7, %s11563_s24  ;;  %v14545_v7 = vld [vmem:[#allocation55_spill] sm:$0xff] }
 0xcbc   :  { %7267 = vrot.lane.b32.xlu1 %v12837_v5, %s11551_s22  ;;  %v14548_v5 = vld [vmem:[#allocation56_spill] sm:$0xff] }
 0xcc0   :  { %7331 = vrot.lane.b32.xlu1 %v13193_v23, %s11564_s8  ;;  %v13451_v23 = vpop.permute.xlu1 %11073 }
 0xcc4   :  { %7271 = vrot.lane.b32.xlu1 %v12833_v25, %s11551_s22  ;;  %v14546_v25 = vld [vmem:[#allocation53_spill] sm:$0xff] }
 0xcc6   :  { %11083 = vrot.lane.b32.xlu0 %v12034_v54, %s11563_s24  ;;  %v14544_v54 = vld [vmem:[#allocation54_spill] sm:$0xff] }
 0xcc8   :  { %7335 = vrot.lane.b32.xlu1 %v13189_v34, %s11564_s8  ;;  %v14552_v34 = vld [vmem:[#allocation62_spill] sm:$0xff] }
 0xcca   :  { %7265 = vrot.lane.b32.xlu0 %v12839_v39, %s11551_s22  ;;  %v14549_v39 = vld [vmem:[#allocation61_spill] sm:$0xff] }
 0xccc   :  { %7275 = vrot.lane.b32.xlu1 %v12845_v43, %s11551_s22  ;;  %v14551_v43 = vld [vmem:[#allocation59_spill] sm:$0xff] }
 0xcce   :  { %7329 = vrot.lane.b32.xlu0 %v13195_v40, %s11564_s8  ;;  %v11079_v40 = vpop.permute.xlu1 %11078 }
 0xccf   :  { %v11081_v17 = vunpack.i.h.bf16 %v11079_v40  ;;  %v11080_v11 = vunpack.i.l.bf16 %v11079_v40 }
 0xcd0   :  { %7339 = vrot.lane.b32.xlu1 %v13201_v22, %s11564_s8 }
 0xcd2   :  { %7269 = vrot.lane.b32.xlu0 %v12835_v36, %s11551_s22  ;;  %v14547_v36 = vld [vmem:[#allocation57_spill] sm:$0xff] }
 0xcd4   :  { %7279 = vrot.lane.b32.xlu1 %v12841_v29, %s11551_s22  ;;  %v14550_v29 = vld [vmem:[#allocation58_spill] sm:$0xff] }
 0xcd6   :  { %7333 = vrot.lane.b32.xlu0 %v13191_v32, %s11564_s8  ;;  %v14553_v32 = vld [vmem:[#allocation60_spill] sm:$0xff] }
 0xcd8   :  { %7343 = vrot.lane.b32.xlu1 %v13197_v55, %s11564_s8 }
 0xcda   :  { %7273 = vrot.lane.b32.xlu0 %v14544_v54, %s11551_s22 }
 0xcdc   :  { %7283 = vrot.lane.b32.xlu1 %v14545_v7, %s11551_s22 }
 0xcde   :  { %7337 = vrot.lane.b32.xlu0 %v13203_v45, %s11564_s8 }
 0xce0   :  { %7347 = vrot.lane.b32.xlu1 %v13205_v13, %s11564_s8 }
 0xce2   :  { %7277 = vrot.lane.b32.xlu0 %v14546_v25, %s11551_s22 }
 0xce4   :  { %7287 = vrot.lane.b32.xlu1 %v14547_v36, %s11551_s22 }
 0xce6   :  { %7341 = vrot.lane.b32.xlu0 %v13199_v20, %s11564_s8 }
 0xce8   :  { %7351 = vrot.lane.b32.xlu1 %v13209_v49, %s11564_s8 }
 0xcea   :  { %7281 = vrot.lane.b32.xlu0 %v14548_v5, %s11551_s22 }
 0xcec   :  { %7291 = vrot.lane.b32.xlu1 %v14549_v39, %s11551_s22 }
 0xcee   :  { %7345 = vrot.lane.b32.xlu0 %v13207_v44, %s11564_s8 }
 0xcf0   :  { %7355 = vrot.lane.b32.xlu1 %v13217_v42, %s11564_s8 }
 0xcf2   :  { %7285 = vrot.lane.b32.xlu0 %v14550_v29, %s11551_s22  ;;  %v11076_v29 = vunpack.i.h.bf16 %v13451_v23 }
 0xcf4   :  { %7295 = vrot.lane.b32.xlu1 %v14551_v43, %s11551_s22  ;;  %v11075_v43 = vunpack.i.l.bf16 %v13451_v23 }
 0xcf6   :  { %7349 = vrot.lane.b32.xlu0 %v13211_v51, %s11564_s8 }
 0xcfa   :  { %7289 = vrot.lane.b32.xlu0 %v14552_v34, %s11551_s22  ;;  %v10662_v34 = vpack.c.bf16 %v11081_v17, %v11080_v11 }
 0xcfe   :  { %7353 = vrot.lane.b32.xlu0 %v13219_v14, %s11564_s8 }
 0xd02   :  { %7293 = vrot.lane.b32.xlu0 %v14553_v32, %s11551_s22  ;;  %s11565_s22 = smov 24  }
 0xd18   :  { %v6436_v55 = vpop.xlane.xlu1 %6435 }
 0xd19   :  { %11348 = vrcp.f32 %v6436_v55 }
 0xd1c   :  { %v6430_v20 = vpop.xlane.xlu1 %6429  ;;  %v6433_v22 = vpop.xlane.xlu0 %6432 }
 0xd1d   :  { %11350 = vrcp.f32 %v6430_v20 }
 0xd1e   :  { %11352 = vrcp.f32 %v6433_v22 }
 0xd20   :  { %v6448_v45 = vpop.xlane.xlu1 %6447 }
 0xd21   :  { %11354 = vrcp.f32 %v6448_v45  ;;  %v6427_v13 = vpop.xlane.xlu0 %6426 }
 0xd22   :  { %11356 = vrcp.f32 %v6427_v13 }
 0xd23   :  { %v11349_v44 = vpop.eup %11348 }
 0xd24   :  { %v6492_v49 = vmul.f32 %v11349_v44, %v6436_v55  ;;  %v6442_v51 = vpop.xlane.xlu1 %6441 }
 0xd25   :  { %11358 = vrcp.f32 %v6442_v51  ;;  %v6445_v42 = vpop.xlane.xlu0 %6444 }
 0xd26   :  { %11360 = vrcp.f32 %v6445_v42  ;;  %v6508_v41 = vsub.f32 2.0, %v6492_v49  ;;  %v10658_v49 = vpack.c.bf16 %v11076_v29, %v11075_v43 }
 0xd27   :  { %v11351_v14 = vpop.eup %11350 }
 0xd28   :  { %v11353_v21 = vpop.eup %11352  ;;  %v6490_v33 = vmul.f32 %v11351_v14, %v6430_v20  ;;  %v6460_v2 = vpop.xlane.xlu1 %6459  ;;  %v6524_v37 = vmul.f32 %v11349_v44, %v6508_v41 }
 0xd29   :  { %v6491_v59 = vmul.f32 %v11353_v21, %v6433_v22  ;;  %11362 = vrcp.f32 %v6460_v2  ;;  %v6439_v61 = vpop.xlane.xlu0 %6438 }
 0xd2a   :  { %11364 = vrcp.f32 %v6439_v61  ;;  %v6506_v46 = vsub.f32 2.0, %v6490_v33  ;;  %v6540_v54 = vmul.f32 %v13308_v62, %v6524_v37 }
 0xd2b   :  { %v11355_v3 = vpop.eup %11354  ;;  %v6507_v6 = vsub.f32 2.0, %v6491_v59 }
 0xd2c   :  { %v11357_v52 = vpop.eup %11356  ;;  %v6496_v58 = vmul.f32 %v11355_v3, %v6448_v45  ;;  %v6454_v48 = vpop.xlane.xlu1 %6453  ;;  %v6522_v7 = vmul.f32 %v11351_v14, %v6506_v46 }
 0xd2d   :  { %v6523_v57 = vmul.f32 %v11353_v21, %v6507_v6  ;;  %v6489_v63 = vmul.f32 %v11357_v52, %v6427_v13  ;;  %11366 = vrcp.f32 %v6454_v48  ;;  %v6457_v1 = vpop.xlane.xlu0 %6456 }
 0xd2e   :  { %11368 = vrcp.f32 %v6457_v1  ;;  %v6512_v25 = vsub.f32 2.0, %v6496_v58  ;;  %v6538_v55 = vmul.f32 %v13312_v4, %v6522_v7 }
 0xd2f   :  { %v11359_v30 = vpop.eup %11358  ;;  %v6505_v35 = vsub.f32 2.0, %v6489_v63  ;;  %v6539_v9 = vmul.f32 %v13316_v56, %v6523_v57 }
 0xd30   :  { %v11361_v19 = vpop.eup %11360  ;;  %v6494_v36 = vmul.f32 %v11359_v30, %v6442_v51  ;;  %v6528_v20 = vmul.f32 %v11355_v3, %v6512_v25 }
 0xd31   :  { %v6521_v5 = vmul.f32 %v11357_v52, %v6505_v35  ;;  %v6495_v39 = vmul.f32 %v11361_v19, %v6445_v42  ;;  %10093 = vmatprep.mubr.msk.f32.mxu1 %vm1375_vm3, %v6539_v9  ;;  %v6451_v32 = vpop.xlane.xlu0 %6450 }
 0xd32   :  { %10094 = vmatmul.mubr.msk.f32.vlgmr.msra.gmra.mrb[76].mxu1 %vm1375_vm3, %v6540_v54  ;;  %11370 = vrcp.f32 %v6451_v32  ;;  %v6510_v22 = vsub.f32 2.0, %v6494_v36  ;;  %v6544_v4 = vmul.f32 %v13324_v15, %v6528_v20 }
 0xd33   :  { %v11363_v40 = vpop.eup %11362  ;;  %v6511_v56 = vsub.f32 2.0, %v6495_v39  ;;  %10657 = vmatpush3.bf16.msra.mxu1 %v13370_v50  ;;  %v6537_v62 = vmul.f32 %v13326_v26, %v6521_v5 }
 0xd34   :  { %10663 = vmatprep.subr.bf16.mxu1 %v10662_v34  ;;  %v13462_v45 = vpop.xlane.xlu1 %6465  ;;  %v11365_v13 = vpop.eup %11364  ;;  %v6500_v44 = vmul.f32 %v11363_v40, %v6460_v2  ;;  %v6526_v14 = vmul.f32 %v11359_v30, %v6510_v22 }
 0xd35   :  { %v6527_v23 = vmul.f32 %v11361_v19, %v6511_v56  ;;  %10086 = vmatprep.mubr.msk.f32.mxu0 %vm1375_vm3, %v6537_v62  ;;  %v6493_v51 = vmul.f32 %v11365_v13, %v6439_v61  ;;  %v6472_v42 = vpop.xlane.xlu0 %6471 }
 0xd36   :  { %10087 = vmatmul.mubr.msk.f32.vlgmr.msra.gmra.mrb[68].mxu0 %vm1375_vm3, %v6538_v55  ;;  %11372 = vrcp.f32 %v6472_v42  ;;  %v6516_v2 = vsub.f32 2.0, %v6500_v44  ;;  %v6542_v58 = vmul.f32 %v13334_v0, %v6526_v14 }
 0xd37   :  { %v11367_v50 = vpop.eup %11366  ;;  %v6543_v26 = vmul.f32 %v13336_v53, %v6527_v23  ;;  %10653 = vmatpush3.bf16.msra.mxu0 %v13355_v16  ;;  %v6509_v21 = vsub.f32 2.0, %v6493_v51  ;;  %11374 = vrcp.f32 %v13462_v45  ;;  %v7491_v51 = vld [vmem:[#allocation2 + $0x8] sm:$0xff] }
 0xd38   :  { %10659 = vmatprep.subr.bf16.mxu0 %v10658_v49  ;;  %v11089_v41 = vpop.permute.xlu1 %11088  ;;  %v11369_v33 = vpop.eup %11368  ;;  %v6498_v59 = vmul.f32 %v11367_v50, %v6454_v48  ;;  %v6532_v57 = vmul.f32 %v11363_v40, %v6516_v2 }
 0xd39   :  { %v11091_v61 = vunpack.i.h.bf16 %v11089_v41  ;;  %v11090_v3 = vunpack.i.l.bf16 %v11089_v41  ;;  %10107 = vmatprep.mubr.msk.f32.mxu1 %vm1375_vm3, %v6543_v26  ;;  %v6525_v6 = vmul.f32 %v11365_v13, %v6509_v21  ;;  %v6499_v53 = vmul.f32 %v11369_v33, %v6457_v1  ;;  %v6469_v52 = vpop.xlane.xlu0 %6468 }
 0xd3a   :  { %10108 = vmatmul.mubr.msk.f32.vlgmr.msra.gmra.mrb[78].mxu1 %vm1375_vm3, %v6544_v4  ;;  %11376 = vrcp.f32 %v6469_v52  ;;  %v6514_v48 = vsub.f32 2.0, %v6498_v59  ;;  %v6548_v35 = vmul.f32 %v13344_v31, %v6532_v57 }
 0xd3b   :  { %v10670_v16 = vpack.c.bf16 %v11091_v61, %v11090_v3  ;;  %10665 = vmatpush3.bf16.msra.mxu1 %v10662_v34  ;;  %v6541_v15 = vmul.f32 %v13346_v27, %v6525_v6  ;;  %v6515_v37 = vsub.f32 2.0, %v6499_v53 }
 0xd3c   :  { %v11371_v46 = vpop.eup %11370  ;;  %v6530_v9 = vmul.f32 %v11367_v50, %v6514_v48  ;;  %v7268_v6 = vpop.permute.xlu1 %7267 }
 0xd3d   :  { %10671 = vmatprep.subr.bf16.mxu1 %v10670_v16  ;;  %v6531_v63 = vmul.f32 %v11369_v33, %v6515_v37  ;;  %v6497_v17 = vmul.f32 %v11371_v46, %v6451_v32  ;;  %10100 = vmatprep.mubr.msk.f32.mxu0 %vm1375_vm3, %v6541_v15  ;;  %v6463_v11 = vpop.xlane.xlu0 %6462 }
 0xd3e   :  { %11378 = vrcp.f32 %v6463_v11  ;;  %10101 = vmatmul.mubr.msk.f32.vlgmr.msra.gmra.mrb[70].mxu0 %vm1375_vm3, %v6542_v58  ;;  %v6546_v39 = vmul.f32 %v13353_v8, %v6530_v9 }
 0xd3f   :  { %v6547_v1 = vmul.f32 %v13357_v28, %v6531_v63  ;;  %v6513_v30 = vsub.f32 2.0, %v6497_v17  ;;  %10661 = vmatpush3.bf16.msra.mxu0 %v10658_v49  ;;  %v7490_v49 = vld [vmem:[#allocation2] sm:$0xff] }
 0xd40   :  { %v11373_v27 = vpop.eup %11372  ;;  %v7332_v15 = vpop.permute.xlu1 %7331 }
 0xd41   :  { %v11375_v0 = vpop.eup %11374  ;;  %v6529_v19 = vmul.f32 %v11371_v46, %v6513_v30  ;;  %v6504_v54 = vmul.f32 %v11373_v27, %v6472_v42  ;;  %v11084_v7 = vpop.permute.xlu0 %11083  ;;  %10121 = vmatprep.mubr.msk.f32.mxu1 %vm1375_vm3, %v6547_v1  ;;  %v7492_v42 = vld [vmem:[#allocation2 + $0x10] sm:$0xff] }
 0xd42   :  { %v11086_v25 = vunpack.i.h.bf16 %v11084_v7  ;;  %v11085_v36 = vunpack.i.l.bf16 %v11084_v7  ;;  %10122 = vmatmul.mubr.msk.f32.vlgmr.msra.gmra.mrb[80].mxu1 %vm1375_vm3, %v6548_v35  ;;  %v6502_v29 = vmul.f32 %v11375_v0, %v13462_v45 }
 0xd43   :  { %v6545_v5 = vmul.f32 %v13364_v12, %v6529_v19  ;;  %10673 = vmatpush3.bf16.msra.mxu1 %v10670_v16  ;;  %v6520_v31 = vsub.f32 2.0, %v6504_v54 }
 0xd44   :  { %v11377_v28 = vpop.eup %11376  ;;  %v10666_v43 = vpack.c.bf16 %v11086_v25, %v11085_v36  ;;  %v6518_v56 = vsub.f32 2.0, %v6502_v29  ;;  %v7272_v57 = vpop.permute.xlu1 %7271 }
 0xd45   :  { %v6503_v34 = vmul.f32 %v11377_v28, %v6469_v52  ;;  %10114 = vmatprep.mubr.msk.f32.mxu0 %vm1375_vm3, %v6545_v5  ;;  %v6536_v62 = vmul.f32 %v11373_v27, %v6520_v31  ;;  %v7266_v53 = vpop.permute.xlu0 %7265 }
 0xd46   :  { %10115 = vmatmul.mubr.msk.f32.vlgmr.msra.gmra.mrb[72].mxu0 %vm1375_vm3, %v6546_v39  ;;  %10667 = vmatprep.subr.bf16.mxu0 %v10666_v43  ;;  %v6534_v22 = vmul.f32 %v11375_v0, %v6518_v56 }
 0xd47   :  { %v6519_v32 = vsub.f32 2.0, %v6503_v34  ;;  %10669 = vmatpush3.bf16.msra.mxu0 %v10666_v43  ;;  %v6552_v45 = vmul.f32 %v13368_v47, %v6536_v62  ;;  %v7493_v47 = vld [vmem:[#allocation2 + $0x18] sm:$0xff]  ;;  %v14554_v62 = vld [vmem:[#allocation38_spill] sm:$0xff] }
 0xd48   :  { %v11379_v40 = vpop.eup %11378  ;;  %v6550_v44 = vmul.f32 %v13372_v60, %v6534_v22  ;;  %v10678_v50 = vpack.c.bf16 %v7493_v47, %v7492_v42  ;;  %v7336_v48 = vpop.permute.xlu1 %7335 }
 0xd49   :  { %v6535_v12 = vmul.f32 %v11377_v28, %v6519_v32  ;;  %v6501_v55 = vmul.f32 %v11379_v40, %v6463_v11  ;;  %v7330_v46 = vpop.permute.xlu0 %7329 }
 0xd4b   :  { %v6551_v20 = vmul.f32 %v13379_v10, %v6535_v12  ;;  %v6517_v8 = vsub.f32 2.0, %v6501_v55  ;;  %v10674_v10 = vpack.c.bf16 %v7491_v51, %v7490_v49  ;;  %v7441_v12 = vsel %vm668_vm1, %v14554_v62, %v7266_v53 }
 0xd4c   :  { %v7457_v22 = vsel %vm1375_vm3, %v7441_v12, %v7330_v46 }
 0xd4d   :  { %v6533_v13 = vmul.f32 %v11379_v40, %v6517_v8  ;;  %10135 = vmatprep.mubr.msk.f32.mxu1 %vm1375_vm3, %v6551_v20  ;;  %10675 = vmatprep.subr.bf16.mxu0 %v10674_v10  ;;  %v14555_v20 = vld [vmem:[#allocation37_spill] sm:$0xff] }
 0xd4e   :  { %10136 = vmatmul.mubr.msk.f32.vlgmr.msra.gmra.mrb[82].mxu1 %vm1375_vm3, %v6552_v45  ;;  %v7442_v8 = vsel %vm668_vm1, %v14555_v20, %v7268_v6  ;;  %v14560_v6 = vld [vmem:[#allocation42_spill] sm:$0xff] }
 0xd4f   :  { %v6549_v23 = vmul.f32 %v13383_v24, %v6533_v13  ;;  %v7458_v13 = vsel %vm1375_vm3, %v7442_v8, %v7332_v15  ;;  %v14566_v8 = vld [vmem:[#allocation52_spill] sm:$0xff] }
 0xd51   :  { %10128 = vmatprep.mubr.msk.f32.mxu0 %vm1375_vm3, %v6549_v23  ;;  %v14556_v23 = vld [vmem:[#allocation40_spill] sm:$0xff] }
 0xd52   :  { %10129 = vmatmul.mubr.msk.f32.vlgmr.msra.gmra.mrb[74].mxu0 %vm1375_vm3, %v6550_v44 }
 0xd53   :  { %10677 = vmatpush3.bf16.msra.mxu0 %v10674_v10 }
 0xd54   :  { %10679 = vmatprep.subr.bf16.mxu0 %v10678_v50 }
 0xd57   :  { %10681 = vmatpush3.bf16.msra.mxu0 %v10678_v50  ;;  %v14557_v50 = vld [vmem:[#allocation39_spill] sm:$0xff] }
 0xe05   :  { %v10095_v26 = vpop.f32.mrb[76].mxu1 }
 0xe06   :  { %7399 = vrot.lane.b32.xlu1 %v10095_v26, %s11565_s22  ;;  %v6718_v24 = vpop.f32.mrb[77].mxu1  ;;  %v7444_v26 = vsel %vm668_vm1, %v14557_v50, %v7272_v57 }
 0xe07   :  { %7397 = vrot.lane.b32.xlu0 %v6718_v24, %s11565_s22 }
 0xe09   :  { %v10088_v60 = vpop.f32.mrb[68].mxu0 }
 0xe0a   :  { %v6631_v4 = vpop.f32.mrb[69].mxu0  ;;  %7395 = vrot.lane.b32.xlu1 %v10088_v60, %s11565_s22  ;;  %v7460_v60 = vsel %vm1375_vm3, %v7444_v26, %v7336_v48 }
 0xe0b   :  { %7393 = vrot.lane.b32.xlu0 %v6631_v4, %s11565_s22 }
 0xe0d   :  { %v10109_v14 = vpop.f32.mrb[78].mxu1 }
 0xe0e   :  { %7407 = vrot.lane.b32.xlu1 %v10109_v14, %s11565_s22  ;;  %v6892_v21 = vpop.f32.mrb[79].mxu1  ;;  %v14558_v14 = vld [vmem:[#allocation44_spill] sm:$0xff] }
 0xe0f   :  { %7405 = vrot.lane.b32.xlu0 %v6892_v21, %s11565_s22 }
 0xe11   :  { %v10102_v41 = vpop.f32.mrb[70].mxu0 }
 0xe12   :  { %v6805_v33 = vpop.f32.mrb[71].mxu0  ;;  %7403 = vrot.lane.b32.xlu1 %v10102_v41, %s11565_s22 }
 0xe13   :  { %7401 = vrot.lane.b32.xlu0 %v6805_v33, %s11565_s22  ;;  %v14559_v33 = vld [vmem:[#allocation43_spill] sm:$0xff] }
 0xe15   :  { %v10123_v2 = vpop.f32.mrb[80].mxu1 }
 0xe16   :  { %7415 = vrot.lane.b32.xlu1 %v10123_v2, %s11565_s22  ;;  %v7066_v59 = vpop.f32.mrb[81].mxu1 }
 0xe17   :  { %7413 = vrot.lane.b32.xlu0 %v7066_v59, %s11565_s22 }
 0xe19   :  { %v10116_v61 = vpop.f32.mrb[72].mxu0 }
 0xe1a   :  { %v6979_v3 = vpop.f32.mrb[73].mxu0  ;;  %7411 = vrot.lane.b32.xlu1 %v10116_v61, %s11565_s22 }
 0xe1b   :  { %7409 = vrot.lane.b32.xlu0 %v6979_v3, %s11565_s22 }
 0xe1e   :  { %7359 = vrot.lane.b32.xlu1 %v13213_v38, %s11564_s8  ;;  %v7270_v38 = vpop.permute.xlu0 %7269 }
 0xe1f   :  { %7357 = vrot.lane.b32.xlu0 %v13215_v18, %s11564_s8  ;;  %v7276_v18 = vpop.permute.xlu1 %7275  ;;  %v7443_v44 = vsel %vm668_vm1, %v14556_v23, %v7270_v38 }
 0xe20   :  { %v7446_v2 = vsel %vm668_vm1, %v14559_v33, %v7276_v18  ;;  %v14562_v18 = vld [vmem:[#allocation46_spill] sm:$0xff] }
 0xe21   :  { %v10137_v52 = vpop.f32.mrb[82].mxu1 }
 0xe22   :  { %v7240_v16 = vpop.f32.mrb[83].mxu1  ;;  %v7334_v63 = vpop.permute.xlu0 %7333 }
 0xe23   :  { %v7340_v11 = vpop.permute.xlu1 %7339  ;;  %v7459_v51 = vsel %vm1375_vm3, %v7443_v44, %v7334_v63 }
 0xe24   :  { %v7462_v3 = vsel %vm1375_vm3, %v7446_v2, %v7340_v11  ;;  %v14571_v2 = vld [vmem:[#allocation9_spill] sm:$0xff] }
 0xe25   :  { %v10130_v37 = vpop.f32.mrb[74].mxu0 }
 0xe26   :  { %v7153_v58 = vpop.f32.mrb[75].mxu0  ;;  %7419 = vrot.lane.b32.xlu1 %v10130_v37, %s11565_s22  ;;  %v7274_v17 = vpop.permute.xlu0 %7273 }
 0xe27   :  { %7417 = vrot.lane.b32.xlu0 %v7153_v58, %s11565_s22  ;;  %v7280_v30 = vpop.permute.xlu1 %7279  ;;  %v7445_v21 = vsel %vm668_vm1, %v14558_v14, %v7274_v17  ;;  %v14561_v58 = vld [vmem:[#allocation41_spill] sm:$0xff] }
 0xe28   :  { %v7448_v57 = vsel %vm668_vm1, %v14561_v58, %v7280_v30 }
 0xe2a   :  { %7423 = vrot.lane.b32.xlu1 %v10137_v52, %s11565_s22  ;;  %v7338_v1 = vpop.permute.xlu0 %7337 }
 0xe2b   :  { %7421 = vrot.lane.b32.xlu0 %v7240_v16, %s11565_s22  ;;  %v7344_v35 = vpop.permute.xlu1 %7343  ;;  %v7461_v59 = vsel %vm1375_vm3, %v7445_v21, %v7338_v1  ;;  %v14563_v1 = vld [vmem:[#allocation45_spill] sm:$0xff] }
 0xe2c   :  { %v7464_v48 = vsel %vm1375_vm3, %v7448_v57, %v7344_v35  ;;  %v14577_v57 = vld [vmem:[#allocation12_spill] sm:$0xff] }
 0xe2e   :  { %v7278_v27 = vpop.permute.xlu0 %7277 }
 0xe2f   :  { %v7284_v0 = vpop.permute.xlu1 %7283  ;;  %v7447_v53 = vsel %vm668_vm1, %v14560_v6, %v7278_v27 }
 0xe30   :  { %v7450_v27 = vsel %vm668_vm1, %v14563_v1, %v7284_v0  ;;  %v14565_v0 = vld [vmem:[#allocation47_spill] sm:$0xff]  ;;  %v14579_v1 = vld [vmem:[#allocation13_spill] sm:$0xff] }
 0xe32   :  { %v7342_v9 = vpop.permute.xlu0 %7341 }
 0xe33   :  { %v7348_v54 = vpop.permute.xlu1 %7347  ;;  %v7463_v16 = vsel %vm1375_vm3, %v7447_v53, %v7342_v9 }
 0xe34   :  { %v7466_v30 = vsel %vm1375_vm3, %v7450_v27, %v7348_v54 }
 0xe36   :  { %v7282_v19 = vpop.permute.xlu0 %7281 }
 0xe37   :  { %v13513_v25 = vpop.permute.xlu1 %7287  ;;  %v7449_v17 = vsel %vm668_vm1, %v14562_v18, %v7282_v19 }
 0xe3a   :  { %v7346_v7 = vpop.permute.xlu0 %7345 }
 0xe3b   :  { %v13515_v5 = vpop.permute.xlu1 %7351  ;;  %v7465_v9 = vsel %vm1375_vm3, %v7449_v17, %v7346_v7  ;;  %v7452_v7 = vsel %vm668_vm1, %v14565_v0, %v13513_v25 }
 0xe3c   :  { %v7468_v54 = vsel %vm1375_vm3, %v7452_v7, %v13515_v5  ;;  %v14585_v7 = vld [vmem:[#allocation16_spill] sm:$0xff] }
 0xe3e   :  { %v7286_v36 = vpop.permute.xlu0 %7285 }
 0xe3f   :  { %v13517_v39 = vpop.permute.xlu1 %7291 }
 0xe42   :  { %v7350_v28 = vpop.permute.xlu0 %7349 }
 0xe43   :  { %v13521_v31 = vpop.permute.xlu1 %7355 }
 0xe46   :  { %v13519_v29 = vpop.permute.xlu0 %7289 }
 0xe47   :  { %v13525_v34 = vpop.permute.xlu1 %7295 }
 0xe4a   :  { %v13523_v43 = vpop.permute.xlu0 %7353 }
 0xe4e   :  { %v13527_v32 = vpop.permute.xlu0 %7293 }
 0xe78   :  { %v7400_v40 = vpop.permute.xlu1 %7399 }
 0xe79   :  { %v7398_v56 = vpop.permute.xlu0 %7397  ;;  %v7477_v4 = vsel %vm7473_vm4, %v7460_v60, %v7400_v40 }
 0xe7a   :  { %v7476_v42 = vsel %vm7473_vm4, %v7459_v51, %v7398_v56  ;;  %v14564_v56 = vld [vmem:[#allocation48_spill] sm:$0xff] }
 0xe7b   :  { %v7451_v62 = vsel %vm668_vm1, %v14564_v56, %v7286_v36 }
 0xe7c   :  { %v7396_v55 = vpop.permute.xlu1 %7395  ;;  %v7467_v12 = vsel %vm1375_vm3, %v7451_v62, %v7350_v28 }
 0xe7d   :  { %v7394_v45 = vpop.permute.xlu0 %7393  ;;  %v7475_v10 = vsel %vm7473_vm4, %v7458_v13, %v7396_v55  ;;  %v14567_v13 = vld [vmem:[#allocation51_spill] sm:$0xff] }
 0xe7e   :  { %v7474_v49 = vsel %vm7473_vm4, %v7457_v22, %v7394_v45  ;;  %v7453_v22 = vsel %vm668_vm1, %v14566_v8, %v13519_v29  ;;  %v7454_v25 = vsel %vm668_vm1, %v14567_v13, %v13517_v39  ;;  %v14568_v29 = vld [vmem:[#allocation50_spill] sm:$0xff]  ;;  %v14587_v13 = vld [vmem:[#allocation17_spill] sm:$0xff] }
 0xe7f   :  { %10146 = vmatprep.mubr.msk.f32.mxu0 %vm249_vm0, %v7474_v49  ;;  %v7469_v23 = vsel %vm1375_vm3, %v7453_v22, %v13523_v43  ;;  %v7470_v5 = vsel %vm1375_vm3, %v7454_v25, %v13521_v31 }
 0xe80   :  { %10147 = vmatmul.mubr.msk.f32.vlgmr.msra.gmra.mrb[76].mxu0 %vm249_vm0, %v7475_v10  ;;  %v7408_v47 = vpop.permute.xlu1 %7407  ;;  %v7455_v10 = vsel %vm668_vm1, %v14568_v29, %v13527_v32  ;;  %v14570_v32 = vld [vmem:[#allocation25_spill] sm:$0xff] }
 0xe81   :  { %10149 = vmatprep.mubr.msk.f32.mxu0 %vm249_vm0, %v7476_v42  ;;  %v7406_v24 = vpop.permute.xlu0 %7405  ;;  %v7481_v63 = vsel %vm7473_vm4, %v7464_v48, %v7408_v47  ;;  %v14569_v42 = vld [vmem:[#allocation49_spill] sm:$0xff]  ;;  %v7496_v60 = vsub.s32 2, %v14570_v32 }
 0xe82   :  { %v7480_v37 = vsel %vm7473_vm4, %v7463_v16, %v7406_v24  ;;  %v7456_v43 = vsel %vm668_vm1, %v14569_v42, %v13525_v34  ;;  %v14591_v42 = vld [vmem:[#allocation19_spill] sm:$0xff] }
 0xe84   :  { %10150 = vmatmul.mubr.msk.f32.gmra.mrb[78].mxu0 %vm249_vm0, %v7477_v4  ;;  %v7404_v41 = vpop.permute.xlu1 %7403  ;;  %v13618_v4 = vld [vmem:[#allocation6] sm:$0xf] }
 0xe85   :  { %v7402_v61 = vpop.permute.xlu0 %7401  ;;  %v7479_v15 = vsel %vm7473_vm4, %v7462_v3, %v7404_v41  ;;  %v13621_v14 = vrot.slane %v13618_v4, %v7496_v60 }
 0xe86   :  { %v7478_v52 = vsel %vm7473_vm4, %v7461_v59, %v7402_v61  ;;  %v14573_v61 = vld [vmem:[#allocation10_spill] sm:$0xff] }
 0xe87   :  { %10152 = vmatprep.mubr.msk.f32.mxu0 %vm249_vm0, %v7478_v52 }
 0xe88   :  { %10153 = vmatmul.mubr.msk.f32.gmra.mrb[80].mxu0 %vm249_vm0, %v7479_v15  ;;  %v7416_v46 = vpop.permute.xlu1 %7415 }
 0xe89   :  { %10155 = vmatprep.mubr.msk.f32.mxu0 %vm249_vm0, %v7480_v37  ;;  %v7414_v38 = vpop.permute.xlu0 %7413  ;;  %v7485_v36 = vsel %vm7473_vm4, %v7468_v54, %v7416_v46  ;;  %v14575_v46 = vld [vmem:[#allocation11_spill] sm:$0xff] }
 0xe8a   :  { %v7484_v55 = vsel %vm7473_vm4, %v7467_v12, %v7414_v38 }
 0xe8c   :  { %10156 = vmatmul.mubr.msk.f32.gmra.mrb[82].mxu0 %vm249_vm0, %v7481_v63  ;;  %v7412_v11 = vpop.permute.xlu1 %7411 }
 0xe8d   :  { %v7410_v40 = vpop.permute.xlu0 %7409  ;;  %v7483_v19 = vsel %vm7473_vm4, %v7466_v30, %v7412_v11 }
 0xe8e   :  { %v7482_v35 = vsel %vm7473_vm4, %v7465_v9, %v7410_v40  ;;  %v14581_v9 = vld [vmem:[#allocation14_spill] sm:$0xff] }
 0xe8f   :  { %10158 = vmatprep.mubr.msk.f32.mxu0 %vm249_vm0, %v7482_v35 }
 0xe90   :  { %10159 = vmatmul.mubr.msk.f32.gmra.mrb[84].mxu0 %vm249_vm0, %v7483_v19  ;;  %v7360_v28 = vpop.permute.xlu1 %7359 }
 0xe91   :  { %10161 = vmatprep.mubr.msk.f32.mxu0 %vm249_vm0, %v7484_v55  ;;  %v7358_v20 = vpop.permute.xlu0 %7357  ;;  %v7472_v50 = vsel %vm1375_vm3, %v7456_v43, %v7360_v28  ;;  %v14583_v55 = vld [vmem:[#allocation15_spill] sm:$0xff] }
 0xe92   :  { %v7471_v47 = vsel %vm1375_vm3, %v7455_v10, %v7358_v20 }
 0xe94   :  { %10162 = vmatmul.mubr.msk.f32.gmra.mrb[86].mxu0 %vm249_vm0, %v7485_v36 }
 0xe98   :  { %v7420_v45 = vpop.permute.xlu1 %7419 }
 0xe99   :  { %v7418_v44 = vpop.permute.xlu0 %7417  ;;  %v7487_v51 = vsel %vm7473_vm4, %v7470_v5, %v7420_v45 }
 0xe9a   :  { %v7486_v49 = vsel %vm7473_vm4, %v7469_v23, %v7418_v44  ;;  %v14589_v23 = vld [vmem:[#allocation18_spill] sm:$0xff] }
 0xe9b   :  { %10164 = vmatprep.mubr.msk.f32.mxu0 %vm249_vm0, %v7486_v49 }
 0xe9c   :  { %10165 = vmatmul.mubr.msk.f32.gmra.mrb[88].mxu0 %vm249_vm0, %v7487_v51  ;;  %v7424_v39 = vpop.permute.xlu1 %7423 }
 0xe9d   :  { %v7422_v31 = vpop.permute.xlu0 %7421  ;;  %v7489_v24 = vsel %vm7473_vm4, %v7472_v50, %v7424_v39 }
 0xe9e   :  { %v7488_v26 = vsel %vm7473_vm4, %v7471_v47, %v7422_v31  ;;  %v14593_v47 = vld [vmem:[#allocation20_spill] sm:$0xff] }
 0xe9f   :  { %10167 = vmatprep.mubr.msk.f32.mxu0 %vm249_vm0, %v7488_v26 }
 0xea0   :  { %10168 = vmatmul.mubr.msk.f32.gmra.mrb[90].mxu0 %vm249_vm0, %v7489_v24 }
 0xf53   :  { %v10148_v34 = vpop.f32.mrb[76].mxu0 }
 0xf54   :  { %v7618_v21 = vadd.f32 %v10148_v34, %v13621_v14  ;;  %v7612_v41 = vpop.f32.mrb[77].mxu0 }
 0xf55   :  { %v7613_v33 = vadd.f32 %v7612_v41, %v13621_v14 }
 0xf56   :  { %v13626_v59 = vadd.f32 %v14571_v2, %v7618_v21 }
 0xf57   :  { %v13629_v3 = vadd.f32 %v7613_v33, %v14573_v61  ;;  %v10151_v6 = vpop.f32.mrb[78].mxu0  ;;  %v14595_v33 = vld [vmem:[#allocation21_spill] sm:$0xff]  ;;  %v14597_v61 = vld [vmem:[#allocation22_spill] sm:$0xff] }
 0xf58   :  { %14572 = vst [vmem:[#allocation27_spill] sm:$0xff] %v13626_v59  ;;  %v7628_v53 = vadd.f32 %v10151_v6, %v13621_v14  ;;  %v7622_v52 = vpop.f32.mrb[79].mxu0  ;;  %v7710_v16 = vsel %vm249_vm0, %v13626_v59, 0.0 }
 0xf59   :  { %14574 = vst [vmem:[#allocation30_spill] sm:$0xff] %v13629_v3  ;;  %v7623_v15 = vadd.f32 %v7622_v52, %v13621_v14  ;;  %7711 = vadd.xlane.f32.xlu1 %v7710_v16  ;;  %v7707_v37 = vsel %vm249_vm0, %v13629_v3, 0.0 }
 0xf5a   :  { %v13638_v58 = vadd.f32 %v14575_v46, %v7628_v53  ;;  %7708 = vadd.xlane.f32.xlu0 %v7707_v37 }
 0xf5b   :  { %v13641_v38 = vadd.f32 %v7623_v15, %v14577_v57  ;;  %v10154_v48 = vpop.f32.mrb[80].mxu0  ;;  %v14599_v57 = vld [vmem:[#allocation23_spill] sm:$0xff] }
 0xf5c   :  { %14576 = vst [vmem:[#allocation26_spill] sm:$0xff] %v13638_v58  ;;  %v7716_v63 = vsel %vm249_vm0, %v13638_v58, 0.0  ;;  %v7638_v18 = vadd.f32 %v10154_v48, %v13621_v14  ;;  %v7632_v17 = vpop.f32.mrb[81].mxu0 }
 0xf5d   :  { %14578 = vst [vmem:[#allocation28_spill] sm:$0xff] %v13641_v38  ;;  %v7633_v11 = vadd.f32 %v7632_v17, %v13621_v14  ;;  %v7713_v12 = vsel %vm249_vm0, %v13641_v38, 0.0 }
 0xf5e   :  { %7717 = vadd.xlane.f32.xlu0 %v7716_v63  ;;  %v13648_v27 = vadd.f32 %v14579_v1, %v7638_v18  ;;  %v14601_v63 = vld [vmem:[#allocation24_spill] sm:$0xff] }
 0xf5f   :  { %v13651_v40 = vadd.f32 %v7633_v11, %v14581_v9  ;;  %v10157_v30 = vpop.f32.mrb[82].mxu0 }
 0xf60   :  { %14580 = vst [vmem:[#allocation31_spill] sm:$0xff] %v13648_v27  ;;  %v7648_v56 = vadd.f32 %v10157_v30, %v13621_v14  ;;  %v7642_v62 = vpop.f32.mrb[83].mxu0  ;;  %v7722_v35 = vsel %vm249_vm0, %v13648_v27, 0.0 }
 0xf61   :  { %14582 = vst [vmem:[#allocation33_spill] sm:$0xff] %v13651_v40  ;;  %v7643_v19 = vadd.f32 %v7642_v62, %v13621_v14  ;;  %7723 = vadd.xlane.f32.xlu1 %v7722_v35  ;;  %v7719_v22 = vsel %vm249_vm0, %v13651_v40, 0.0 }
 0xf62   :  { %7714 = vadd.xlane.f32.xlu0 %v7713_v12  ;;  %v13660_v0 = vadd.f32 %v14583_v55, %v7648_v56 }
 0xf63   :  { %v13663_v54 = vadd.f32 %v7643_v19, %v14585_v7  ;;  %v10160_v36 = vpop.f32.mrb[84].mxu0 }
 0xf64   :  { %14584 = vst [vmem:[#allocation29_spill] sm:$0xff] %v13660_v0  ;;  %v7658_v28 = vadd.f32 %v10160_v36, %v13621_v14  ;;  %v7652_v20 = vpop.f32.mrb[85].mxu0  ;;  %v7728_v8 = vsel %vm249_vm0, %v13660_v0, 0.0 }
 0xf65   :  { %14586 = vst [vmem:[#allocation35_spill] sm:$0xff] %v13663_v54  ;;  %v7653_v45 = vadd.f32 %v7652_v20, %v13621_v14  ;;  %7729 = vadd.xlane.f32.xlu1 %v7728_v8  ;;  %v7725_v10 = vsel %vm249_vm0, %v13663_v54, 0.0 }
 0xf66   :  { %7720 = vadd.xlane.f32.xlu0 %v7719_v22  ;;  %v13672_v25 = vadd.f32 %v14587_v13, %v7658_v28 }
 0xf67   :  { %v13675_v44 = vadd.f32 %v7653_v45, %v14589_v23  ;;  %v10163_v5 = vpop.f32.mrb[86].mxu0 }
 0xf68   :  { %14588 = vst [vmem:[#allocation32_spill] sm:$0xff] %v13672_v25  ;;  %v7668_v49 = vadd.f32 %v10163_v5, %v13621_v14  ;;  %v7662_v51 = vpop.f32.mrb[87].mxu0  ;;  %v7734_v29 = vsel %vm249_vm0, %v13672_v25, 0.0 }
 0xf69   :  { %14590 = vst [vmem:[#allocation34_spill] sm:$0xff] %v13675_v44  ;;  %v7663_v39 = vadd.f32 %v7662_v51, %v13621_v14  ;;  %7735 = vadd.xlane.f32.xlu1 %v7734_v29  ;;  %v7731_v26 = vsel %vm249_vm0, %v13675_v44, 0.0 }
 0xf6a   :  { %7726 = vadd.xlane.f32.xlu0 %v7725_v10  ;;  %v13684_v43 = vadd.f32 %v14591_v42, %v7668_v49 }
 0xf6b   :  { %v13687_v31 = vadd.f32 %v7663_v39, %v14593_v47 }
 0xf6c   :  { %14592 = vst [vmem:[#allocation36_spill] sm:$0xff] %v13684_v43  ;;  %v7740_v50 = vsel %vm249_vm0, %v13684_v43, 0.0 }
 0xf6d   :  { %14594 = vst [vmem:[#allocation54_spill] sm:$0xff] %v13687_v31  ;;  %7741 = vadd.xlane.f32.xlu1 %v7740_v50  ;;  %v7737_v21 = vsel %vm249_vm0, %v13687_v31, 0.0 }
 0xf6e   :  { %7732 = vadd.xlane.f32.xlu0 %v7731_v26 }
 0xf6f   :  { %v10166_v24 = vpop.f32.mrb[88].mxu0 }
 0xf70   :  { %v7678_v60 = vadd.f32 %v10166_v24, %v13621_v14  ;;  %v7672_v34 = vpop.f32.mrb[89].mxu0 }
 0xf71   :  { %v7673_v41 = vadd.f32 %v7672_v34, %v13621_v14 }
 0xf72   :  { %7738 = vadd.xlane.f32.xlu0 %v7737_v21  ;;  %v13698_v2 = vadd.f32 %v14595_v33, %v7678_v60 }
 0xf73   :  { %v13701_v6 = vadd.f32 %v7673_v41, %v14597_v61  ;;  %v10169_v53 = vpop.f32.mrb[90].mxu0 }
 0xf74   :  { %14596 = vst [vmem:[#allocation55_spill] sm:$0xff] %v13698_v2  ;;  %v7688_v52 = vadd.f32 %v10169_v53, %v13621_v14  ;;  %v7682_v16 = vpop.f32.mrb[91].mxu0  ;;  %v7746_v15 = vsel %vm249_vm0, %v13698_v2, 0.0 }
 0xf75   :  { %14598 = vst [vmem:[#allocation53_spill] sm:$0xff] %v13701_v6  ;;  %v7683_v37 = vadd.f32 %v7682_v16, %v13621_v14  ;;  %7747 = vadd.xlane.f32.xlu1 %v7746_v15  ;;  %v7743_v46 = vsel %vm249_vm0, %v13701_v6, 0.0 }
 0xf76   :  { %v13710_v48 = vadd.f32 %v14599_v57, %v7688_v52  ;;  %7744 = vadd.xlane.f32.xlu0 %v7743_v46 }
 0xf77   :  { %v13713_v18 = vadd.f32 %v7683_v37, %v14601_v63 }
 0xf78   :  { %14600 = vst [vmem:[#allocation57_spill] sm:$0xff] %v13710_v48  ;;  %v7752_v17 = vsel %vm249_vm0, %v13710_v48, 0.0 }
 0xf79   :  { %14602 = vst [vmem:[#allocation56_spill] sm:$0xff] %v13713_v18  ;;  %7753 = vadd.xlane.f32.xlu1 %v7752_v17  ;;  %v7749_v11 = vsel %vm249_vm0, %v13713_v18, 0.0 }
 0xf7a   :  { %7750 = vadd.xlane.f32.xlu0 %v7749_v11 }
 0xfe6   :  { %v7712_v14 = vpop.xlane.xlu1 %7711 }
 0xfe7   :  { %v7756_v1 = vmul.f32 0.03125, %v7712_v14  ;;  %v7709_v9 = vpop.xlane.xlu0 %7708 }
 0xfe8   :  { %v7755_v30 = vmul.f32 0.03125, %v7709_v9 }
 0xfe9   :  { %v13720_v56 = vsub.f32 %v13626_v59, %v7756_v1 }
 0xfea   :  { %v13723_v62 = vsub.f32 %v13629_v3, %v7755_v30 }
 0xfeb   :  { %v7718_v35 = vpop.xlane.xlu0 %7717  ;;  %v7788_v12 = vmul.f32 %v13720_v56, %v13720_v56 }
 0xfec   :  { %v7758_v19 = vmul.f32 0.03125, %v7718_v35  ;;  %v7787_v55 = vmul.f32 %v13723_v62, %v13723_v62 }
 0xfed   :  { %v7806_v7 = vsel %vm249_vm0, %v7788_v12, 0.0 }
 0xfee   :  { %v13731_v36 = vsub.f32 %v13638_v58, %v7758_v19  ;;  %7807 = vadd.xlane.f32.xlu1 %v7806_v7  ;;  %v7803_v28 = vsel %vm249_vm0, %v7787_v55, 0.0  ;;  %v7724_v20 = vpop.xlane.xlu1 %7723 }
 0xfef   :  { %7804 = vadd.xlane.f32.xlu0 %v7803_v28  ;;  %v7715_v8 = vpop.xlane.xlu0 %7714  ;;  %v7760_v22 = vmul.f32 0.03125, %v7724_v20 }
 0xff0   :  { %v7757_v45 = vmul.f32 0.03125, %v7715_v8  ;;  %v7790_v13 = vmul.f32 %v13731_v36, %v13731_v36 }
 0xff1   :  { %v13737_v23 = vsub.f32 %v13648_v27, %v7760_v22 }
 0xff2   :  { %v13740_v5 = vsub.f32 %v13641_v38, %v7757_v45  ;;  %v7812_v49 = vsel %vm249_vm0, %v7790_v13, 0.0  ;;  %v7730_v51 = vpop.xlane.xlu1 %7729 }
 0xff3   :  { %7813 = vadd.xlane.f32.xlu1 %v7812_v49  ;;  %v7721_v29 = vpop.xlane.xlu0 %7720  ;;  %v7762_v10 = vmul.f32 0.03125, %v7730_v51  ;;  %v7792_v42 = vmul.f32 %v13737_v23, %v13737_v23 }
 0xff4   :  { %v7759_v39 = vmul.f32 0.03125, %v7721_v29  ;;  %v7789_v47 = vmul.f32 %v13740_v5, %v13740_v5 }
 0xff5   :  { %v13748_v50 = vsub.f32 %v13660_v0, %v7762_v10  ;;  %v7818_v24 = vsel %vm249_vm0, %v7792_v42, 0.0  ;;  %v7916_v42 = vld [vmem:[#allocation4 + $0x8] sm:$0xff] }
 0xff6   :  { %v13751_v26 = vsub.f32 %v13651_v40, %v7759_v39  ;;  %v7809_v60 = vsel %vm249_vm0, %v7789_v47, 0.0  ;;  %v7736_v34 = vpop.xlane.xlu1 %7735  ;;  %v7915_v39 = vld [vmem:[#allocation4] sm:$0xff] }
 0xff7   :  { %7819 = vadd.xlane.f32.xlu1 %v7818_v24  ;;  %7810 = vadd.xlane.f32.xlu0 %v7809_v60  ;;  %v7727_v21 = vpop.xlane.xlu0 %7726  ;;  %v7764_v41 = vmul.f32 0.03125, %v7736_v34  ;;  %v7794_v61 = vmul.f32 %v13748_v50, %v13748_v50  ;;  %v10682_v60 = vpack.c.bf16 %v7916_v42, %v7915_v39 }
 0xff8   :  { %v7761_v33 = vmul.f32 0.03125, %v7727_v21  ;;  %v7791_v53 = vmul.f32 %v13751_v26, %v13751_v26 }
 0xff9   :  { %v13760_v52 = vsub.f32 %v13672_v25, %v7764_v41  ;;  %v7824_v15 = vsel %vm249_vm0, %v7794_v61, 0.0  ;;  %10683 = vmatprep.subr.bf16.mxu1 %v10682_v60 }
 0xffa   :  { %v13763_v16 = vsub.f32 %v13663_v54, %v7761_v33  ;;  %v7815_v37 = vsel %vm249_vm0, %v7791_v53, 0.0  ;;  %v7742_v46 = vpop.xlane.xlu1 %7741  ;;  %10685 = vmatpush3.bf16.msra.mxu1 %v10682_v60 }
 0xffb   :  { %7825 = vadd.xlane.f32.xlu1 %v7824_v15  ;;  %7816 = vadd.xlane.f32.xlu0 %v7815_v37  ;;  %v7733_v57 = vpop.xlane.xlu0 %7732  ;;  %v7766_v63 = vmul.f32 0.03125, %v7742_v46  ;;  %v7796_v11 = vmul.f32 %v13760_v52, %v13760_v52  ;;  %v7917_v37 = vld [vmem:[#allocation4 + $0x10] sm:$0xff]  ;;  %v7918_v46 = vld [vmem:[#allocation4 + $0x18] sm:$0xff] }
 0xffc   :  { %v7763_v17 = vmul.f32 0.03125, %v7733_v57  ;;  %v7793_v14 = vmul.f32 %v13763_v16, %v13763_v16 }
 0xffd   :  { %v13772_v1 = vsub.f32 %v13684_v43, %v7766_v63  ;;  %v7830_v30 = vsel %vm249_vm0, %v7796_v11, 0.0 }
 0xffe   :  { %v13775_v9 = vsub.f32 %v13675_v44, %v7763_v17  ;;  %v7821_v35 = vsel %vm249_vm0, %v7793_v14, 0.0  ;;  %v10686_v17 = vpack.c.bf16 %v7918_v46, %v7917_v37 }
 0xfff   :  { %7831 = vadd.xlane.f32.xlu1 %v7830_v30  ;;  %7822 = vadd.xlane.f32.xlu0 %v7821_v35  ;;  %v7739_v12 = vpop.xlane.xlu0 %7738  ;;  %v7798_v55 = vmul.f32 %v13772_v1, %v13772_v1 }
0x1000   :  { %v7765_v19 = vmul.f32 0.03125, %v7739_v12  ;;  %v7795_v7 = vmul.f32 %v13775_v9, %v13775_v9  ;;  %10687 = vmatprep.subr.bf16.mxu1 %v10686_v17 }
0x1001   :  { %v7836_v20 = vsel %vm249_vm0, %v7798_v55, 0.0  ;;  %10689 = vmatpush3.bf16.msra.mxu1 %v10686_v17 }
0x1002   :  { %v13784_v28 = vsub.f32 %v13687_v31, %v7765_v19  ;;  %v7827_v8 = vsel %vm249_vm0, %v7795_v7, 0.0  ;;  %v7748_v22 = vpop.xlane.xlu1 %7747 }
0x1003   :  { %7837 = vadd.xlane.f32.xlu1 %v7836_v20  ;;  %7828 = vadd.xlane.f32.xlu0 %v7827_v8  ;;  %v7768_v45 = vmul.f32 0.03125, %v7748_v22  ;;  %v7745_v13 = vpop.xlane.xlu0 %7744 }
0x1004   :  { %v7797_v49 = vmul.f32 %v13784_v28, %v13784_v28  ;;  %v7767_v51 = vmul.f32 0.03125, %v7745_v13 }
0x1005   :  { %v13791_v29 = vsub.f32 %v13698_v2, %v7768_v45 }
0x1006   :  { %v7833_v10 = vsel %vm249_vm0, %v7797_v49, 0.0  ;;  %v13795_v47 = vsub.f32 %v13701_v6, %v7767_v51  ;;  %v7754_v24 = vpop.xlane.xlu1 %7753 }
0x1007   :  { %7834 = vadd.xlane.f32.xlu0 %v7833_v10  ;;  %v7770_v34 = vmul.f32 0.03125, %v7754_v24  ;;  %v7751_v21 = vpop.xlane.xlu0 %7750  ;;  %v7800_v41 = vmul.f32 %v13791_v29, %v13791_v29 }
0x1008   :  { %v7769_v33 = vmul.f32 0.03125, %v7751_v21  ;;  %v7799_v61 = vmul.f32 %v13795_v47, %v13795_v47 }
0x1009   :  { %v13802_v53 = vsub.f32 %v13710_v48, %v7770_v34  ;;  %v7842_v15 = vsel %vm249_vm0, %v7800_v41, 0.0 }
0x100a   :  { %v13806_v57 = vsub.f32 %v13713_v18, %v7769_v33  ;;  %7843 = vadd.xlane.f32.xlu1 %v7842_v15  ;;  %v7839_v63 = vsel %vm249_vm0, %v7799_v61, 0.0 }
0x100b   :  { %7840 = vadd.xlane.f32.xlu0 %v7839_v63  ;;  %v7802_v11 = vmul.f32 %v13802_v53, %v13802_v53 }
0x100c   :  { %v7801_v14 = vmul.f32 %v13806_v57, %v13806_v57 }
0x100d   :  { %v7848_v30 = vsel %vm249_vm0, %v7802_v11, 0.0 }
0x100e   :  { %7849 = vadd.xlane.f32.xlu1 %v7848_v30  ;;  %v7845_v35 = vsel %vm249_vm0, %v7801_v14, 0.0 }
0x100f   :  { %7846 = vadd.xlane.f32.xlu0 %v7845_v35 }
0x107b   :  { %v7808_v12 = vpop.xlane.xlu1 %7807 }
0x107c   :  { %v7852_v19 = vmul.f32 0.03125, %v7808_v12  ;;  %v7805_v55 = vpop.xlane.xlu0 %7804 }
0x107d   :  { %v7851_v7 = vmul.f32 0.03125, %v7805_v55 }
0x107e   :  { %v7868_v20 = vadd.f32 1e-05, %v7852_v19 }
0x107f   :  { %v7867_v8 = vadd.f32 1e-05, %v7851_v7 }
0x1080   :  { %11380 = vrsqrt.f32 %v7868_v20  ;;  %v7814_v22 = vpop.xlane.xlu1 %7813 }
0x1081   :  { %11382 = vrsqrt.f32 %v7867_v8  ;;  %v7854_v45 = vmul.f32 0.03125, %v7814_v22 }
0x1083   :  { %v7870_v51 = vadd.f32 1e-05, %v7854_v45 }
0x1084   :  { %v7820_v13 = vpop.xlane.xlu1 %7819  ;;  %v7811_v49 = vpop.xlane.xlu0 %7810 }
0x1085   :  { %v7856_v10 = vmul.f32 0.03125, %v7820_v13  ;;  %v7853_v39 = vmul.f32 0.03125, %v7811_v49  ;;  %11384 = vrsqrt.f32 %v7870_v51 }
0x1087   :  { %v7869_v42 = vadd.f32 1e-05, %v7853_v39  ;;  %v7872_v24 = vadd.f32 1e-05, %v7856_v10 }
0x1088   :  { %v7826_v60 = vpop.xlane.xlu1 %7825  ;;  %v7817_v34 = vpop.xlane.xlu0 %7816 }
0x1089   :  { %v7858_v21 = vmul.f32 0.03125, %v7826_v60  ;;  %v7855_v41 = vmul.f32 0.03125, %v7817_v34  ;;  %11386 = vrsqrt.f32 %v7869_v42 }
0x108a   :  { %v11381_v33 = vpop.eup %11380  ;;  %11388 = vrsqrt.f32 %v7872_v24 }
0x108b   :  { %v11383_v61 = vpop.eup %11382  ;;  %v7871_v15 = vadd.f32 1e-05, %v7855_v41  ;;  %v7874_v17 = vadd.f32 1e-05, %v7858_v21  ;;  %v7900_v30 = vmul.f32 %v11381_v33, %v13720_v56 }
0x108c   :  { %v7832_v37 = vpop.xlane.xlu1 %7831  ;;  %v7823_v46 = vpop.xlane.xlu0 %7822  ;;  %v7899_v63 = vmul.f32 %v11383_v61, %v13723_v62 }
0x108d   :  { %v7860_v11 = vmul.f32 0.03125, %v7832_v37  ;;  %v7857_v14 = vmul.f32 0.03125, %v7823_v46  ;;  %11390 = vrsqrt.f32 %v7871_v15 }
0x108e   :  { %10178 = vmatprep.mubr.msk.f32.mxu1 %vm249_vm0, %v7899_v63  ;;  %11392 = vrsqrt.f32 %v7874_v17 }
0x108f   :  { %v7873_v35 = vadd.f32 1e-05, %v7857_v14  ;;  %10179 = vmatmul.mubr.msk.f32.vlgmr.msra.gmra.mrb[84].mxu1 %vm249_vm0, %v7900_v30  ;;  %v7876_v55 = vadd.f32 1e-05, %v7860_v11  ;;  %v11385_v8 = vpop.eup %11384 }
0x1090   :  { %v7838_v12 = vpop.xlane.xlu1 %7837  ;;  %v7829_v19 = vpop.xlane.xlu0 %7828  ;;  %v7902_v10 = vmul.f32 %v11385_v8, %v13731_v36 }
0x1091   :  { %v7862_v7 = vmul.f32 0.03125, %v7838_v12  ;;  %v7859_v20 = vmul.f32 0.03125, %v7829_v19  ;;  %11394 = vrsqrt.f32 %v7873_v35 }
0x1092   :  { %11396 = vrsqrt.f32 %v7876_v55 }
0x1093   :  { %v7875_v62 = vadd.f32 1e-05, %v7859_v20  ;;  %v11387_v22 = vpop.eup %11386  ;;  %v7878_v45 = vadd.f32 1e-05, %v7862_v7 }
0x1094   :  { %v7835_v13 = vpop.xlane.xlu0 %7834  ;;  %v7901_v49 = vmul.f32 %v11387_v22, %v13740_v5  ;;  %v11389_v51 = vpop.eup %11388 }
0x1095   :  { %v7861_v56 = vmul.f32 0.03125, %v7835_v13  ;;  %11398 = vrsqrt.f32 %v7875_v62  ;;  %v7904_v5 = vmul.f32 %v11389_v51, %v13737_v23 }
0x1096   :  { %10181 = vmatprep.mubr.msk.f32.mxu1 %vm249_vm0, %v7901_v49  ;;  %11400 = vrsqrt.f32 %v7878_v45  ;;  %v8553_v49 = vld [vmem:[%s14409_s6 + $0x28] sm:$0xff] }
0x1097   :  { %v7877_v39 = vadd.f32 1e-05, %v7861_v56  ;;  %v11391_v42 = vpop.eup %11390  ;;  %v7844_v24 = vpop.xlane.xlu1 %7843  ;;  %10182 = vmatmul.mubr.msk.f32.gmra.mrb[86].mxu1 %vm249_vm0, %v7902_v10  ;;  %v8552_v56 = vld [vmem:[%s14409_s6 + $0x20] sm:$0xff]  ;;  %v8554_v10 = vld [vmem:[%s14409_s6 + $0x30] sm:$0xff] }
0x1098   :  { %v7864_v60 = vmul.f32 0.03125, %v7844_v24  ;;  %v7841_v34 = vpop.xlane.xlu0 %7840  ;;  %v7903_v21 = vmul.f32 %v11391_v42, %v13751_v26  ;;  %v11393_v33 = vpop.eup %11392  ;;  %v10698_v51 = vpack.c.bf16 %v8553_v49, %v8552_v56  ;;  %v8556_v24 = vld [vmem:[%s14409_s6 + $0x40] sm:$0xff] }
0x1099   :  { %11402 = vrsqrt.f32 %v7877_v39  ;;  %v7863_v41 = vmul.f32 0.03125, %v7841_v34  ;;  %v7906_v26 = vmul.f32 %v11393_v33, %v13748_v50  ;;  %v8555_v39 = vld [vmem:[%s14409_s6 + $0x38] sm:$0xff]  ;;  %v8560_v33 = vld [vmem:[%s14409_s6 + $0x60] sm:$0xff] }
0x109a   :  { %v7880_v61 = vadd.f32 1e-05, %v7864_v60  ;;  %10184 = vmatprep.mubr.msk.f32.mxu1 %vm249_vm0, %v7903_v21  ;;  %v10702_v42 = vpack.c.bf16 %v8555_v39, %v8554_v10  ;;  %v8557_v60 = vld [vmem:[%s14409_s6 + $0x48] sm:$0xff]  ;;  %v8558_v21 = vld [vmem:[%s14409_s6 + $0x50] sm:$0xff] }
0x109b   :  { %v11395_v36 = vpop.eup %11394  ;;  %v7879_v15 = vadd.f32 1e-05, %v7863_v41  ;;  %v7850_v37 = vpop.xlane.xlu1 %7849  ;;  %10185 = vmatmul.mubr.msk.f32.gmra.mrb[88].mxu1 %vm249_vm0, %v7904_v5  ;;  %v10706_v34 = vpack.c.bf16 %v8557_v60, %v8556_v24  ;;  %v8559_v41 = vld [vmem:[%s14409_s6 + $0x58] sm:$0xff] }
0x109c   :  { %11404 = vrsqrt.f32 %v7880_v61  ;;  %v7866_v46 = vmul.f32 0.03125, %v7850_v37  ;;  %v7847_v63 = vpop.xlane.xlu0 %7846  ;;  %v7905_v17 = vmul.f32 %v11395_v36, %v13763_v16  ;;  %v11397_v14 = vpop.eup %11396  ;;  %v10710_v5 = vpack.c.bf16 %v8559_v41, %v8558_v21  ;;  %v8561_v61 = vld [vmem:[%s14409_s6 + $0x68] sm:$0xff]  ;;  %v8563_v37 = vld [vmem:[%s14409_s6 + $0x78] sm:$0xff] }
0x109d   :  { %11406 = vrsqrt.f32 %v7879_v15  ;;  %v7865_v11 = vmul.f32 0.03125, %v7847_v63  ;;  %v7908_v55 = vmul.f32 %v11397_v14, %v13760_v52  ;;  %v10714_v36 = vpack.c.bf16 %v8561_v61, %v8560_v33  ;;  %v8562_v15 = vld [vmem:[%s14409_s6 + $0x70] sm:$0xff] }
0x109e   :  { %v7882_v23 = vadd.f32 1e-05, %v7866_v46  ;;  %10187 = vmatprep.mubr.msk.f32.mxu1 %vm249_vm0, %v7905_v17  ;;  %v10718_v46 = vpack.c.bf16 %v8563_v37, %v8562_v15  ;;  %v7921_v63 = vsub.s32 1, %v14570_v32 }
0x109f   :  { %v11399_v30 = vpop.eup %11398  ;;  %v7881_v35 = vadd.f32 1e-05, %v7865_v11  ;;  %10188 = vmatmul.mubr.msk.f32.gmra.mrb[90].mxu1 %vm249_vm0, %v7906_v26 }
0x10a0   :  { %11408 = vrsqrt.f32 %v7882_v23  ;;  %v7907_v12 = vmul.f32 %v11399_v30, %v13775_v9  ;;  %v11401_v19 = vpop.eup %11400  ;;  %v13897_v17 = vrot.slane %v13618_v4, %v7921_v63 }
0x10a1   :  { %11410 = vrsqrt.f32 %v7881_v35  ;;  %v7910_v7 = vmul.f32 %v11401_v19, %v13772_v1  ;;  %v8548_v1 = vld [vmem:[%s14409_s6] sm:$0xff] }
0x10a2   :  { %10190 = vmatprep.mubr.msk.f32.mxu1 %vm249_vm0, %v7907_v12 }
0x10a3   :  { %v11403_v16 = vpop.eup %11402  ;;  %10191 = vmatmul.mubr.msk.f32.gmra.mrb[92].mxu1 %vm249_vm0, %v7908_v55 }
0x10a4   :  { %v7909_v50 = vmul.f32 %v11403_v16, %v13784_v28 }
0x10a6   :  { %10193 = vmatprep.mubr.msk.f32.mxu1 %vm249_vm0, %v7909_v50  ;;  %v11405_v20 = vpop.eup %11404 }
0x10a7   :  { %v11407_v8 = vpop.eup %11406  ;;  %10194 = vmatmul.mubr.msk.f32.gmra.mrb[94].mxu1 %vm249_vm0, %v7910_v7  ;;  %v7912_v62 = vmul.f32 %v11405_v20, %v13791_v29  ;;  %v8549_v29 = vld [vmem:[%s14409_s6 + $0x8] sm:$0xff] }
0x10a8   :  { %v7911_v9 = vmul.f32 %v11407_v8, %v13795_v47  ;;  %v10690_v47 = vpack.c.bf16 %v8549_v29, %v8548_v1 }
0x10aa   :  { %v11409_v52 = vpop.eup %11408  ;;  %10196 = vmatprep.mubr.msk.f32.mxu1 %vm249_vm0, %v7911_v9  ;;  %10691 = vmatprep.subr.bf16.mxu0 %v10690_v47 }
0x10ab   :  { %v11411_v22 = vpop.eup %11410  ;;  %10197 = vmatmul.mubr.msk.f32.gmra.mrb[96].mxu1 %vm249_vm0, %v7912_v62  ;;  %v7914_v45 = vmul.f32 %v11409_v52, %v13802_v53  ;;  %10693 = vmatpush3.bf16.msra.mxu0 %v10690_v47  ;;  %v8551_v53 = vld [vmem:[%s14409_s6 + $0x18] sm:$0xff] }
0x10ac   :  { %v7913_v28 = vmul.f32 %v11411_v22, %v13806_v57  ;;  %v8550_v57 = vld [vmem:[%s14409_s6 + $0x10] sm:$0xff] }
0x10ad   :  { %v10694_v13 = vpack.c.bf16 %v8551_v53, %v8550_v57 }
0x10ae   :  { %10199 = vmatprep.mubr.msk.f32.mxu1 %vm249_vm0, %v7913_v28 }
0x10af   :  { %10200 = vmatmul.mubr.msk.f32.gmra.mrb[98].mxu1 %vm249_vm0, %v7914_v45  ;;  %10695 = vmatprep.subr.bf16.mxu0 %v10694_v13 }
0x10b0   :  { %10697 = vmatpush3.bf16.msra.mxu0 %v10694_v13 }
0x10b1   :  { %10699 = vmatprep.subr.bf16.mxu0 %v10698_v51 }
0x10b4   :  { %10701 = vmatpush3.bf16.msra.mxu0 %v10698_v51 }
0x10b5   :  { %10703 = vmatprep.subr.bf16.mxu0 %v10702_v42 }
0x10b8   :  { %10705 = vmatpush3.bf16.msra.mxu0 %v10702_v42 }
0x10b9   :  { %10707 = vmatprep.subr.bf16.mxu0 %v10706_v34 }
0x10bc   :  { %10709 = vmatpush3.bf16.msra.mxu0 %v10706_v34 }
0x10bd   :  { %10711 = vmatprep.subr.bf16.mxu0 %v10710_v5 }
0x10c0   :  { %10713 = vmatpush3.bf16.msra.mxu0 %v10710_v5 }
0x10c1   :  { %10715 = vmatprep.subr.bf16.mxu0 %v10714_v36 }
0x10c4   :  { %10717 = vmatpush3.bf16.msra.mxu0 %v10714_v36 }
0x10c5   :  { %10719 = vmatprep.subr.bf16.mxu0 %v10718_v46 }
0x10c8   :  { %10721 = vmatpush3.bf16.msra.mxu0 %v10718_v46 }
0x1162   :  { %v10180_v11 = vpop.f32.mrb[84].mxu1 }
0x1163   :  { %v8043_v26 = vadd.f32 %v10180_v11, %v13897_v17  ;;  %v8037_v14 = vpop.f32.mrb[85].mxu1 }
0x1164   :  { %v8038_v23 = vadd.f32 %v8037_v14, %v13897_v17 }
0x1165   :  { %v13901_v30 = vmul.f32 0.70710677, %v8043_v26  ;;  %v13937_v33 = vmul.f32 0.5, %v8043_v26 }
0x1166   :  { %v13904_v12 = vmul.f32 0.70710677, %v8038_v23  ;;  %v13940_v46 = vmul.f32 0.5, %v8038_v23 }
0x1167   :  { %v8133_v35 = vand.u32 2147483647, %v13901_v30  ;;  %vm8453_vm5 = vcmp.ge.f32.partialorder %v13901_v30, 0.0 }
0x1168   :  { %v8132_v16 = vand.u32 2147483647, %v13904_v12  ;;  %vm8452_vm6 = vcmp.ge.f32.partialorder %v13904_v12, 0.0 }
0x1169   :  { %v8149_v19 = vmul.f32 0.3275911, %v8133_v35  ;;  %v8357_v20 = vsub.f32 0.0, %v8133_v35 }
0x116a   :  { %v10183_v50 = vpop.f32.mrb[86].mxu1  ;;  %v8356_v62 = vsub.f32 0.0, %v8132_v16  ;;  %v8148_v28 = vmul.f32 0.3275911, %v8132_v16 }
0x116b   :  { %v8165_v55 = vadd.f32 1.0, %v8149_v19  ;;  %v13908_v4 = vadd.f32 %v10183_v50, %v13897_v17  ;;  %v8047_v7 = vpop.f32.mrb[87].mxu1  ;;  %v8373_v47 = vmul.f32 %v8357_v20, %v8133_v35 }
0x116c   :  { %v13911_v8 = vadd.f32 %v8047_v7, %v13897_v17  ;;  %v8372_v49 = vmul.f32 %v8356_v62, %v8132_v16  ;;  %v8164_v10 = vadd.f32 1.0, %v8148_v28 }
0x116d   :  { %11412 = vrcp.f32 %v8165_v55  ;;  %v13914_v9 = vmul.f32 0.70710677, %v13908_v4  ;;  %v8390_v42 = vmul.f32 1.442695, %v8373_v47 }
0x116e   :  { %v13917_v52 = vmul.f32 0.70710677, %v13911_v8  ;;  %v10186_v22 = vpop.f32.mrb[88].mxu1  ;;  %v8388_v61 = vmul.f32 1.442695, %v8372_v49  ;;  %11414 = vrcp.f32 %v8164_v10  ;;  %v13981_v48 = vmul.f32 0.5, %v13911_v8 }
0x116f   :  { %v8135_v45 = vand.u32 2147483647, %v13914_v9  ;;  %v13921_v1 = vadd.f32 %v10186_v22, %v13897_v17  ;;  %v8057_v29 = vpop.f32.mrb[89].mxu1  ;;  %11416 = vpow2.f32 %v8390_v42  ;;  %vm8455_vm8 = vcmp.ge.f32.partialorder %v13914_v9, 0.0 }
0x1170   :  { %v8134_v57 = vand.u32 2147483647, %v13917_v52  ;;  %v13925_v53 = vadd.f32 %v8057_v29, %v13897_v17  ;;  %11418 = vpow2.f32 %v8388_v61  ;;  %vm8454_vm7 = vcmp.ge.f32.partialorder %v13917_v52, 0.0 }
0x1171   :  { %v8359_v13 = vsub.f32 0.0, %v8135_v45  ;;  %v13928_v56 = vmul.f32 0.70710677, %v13921_v1  ;;  %v8151_v36 = vmul.f32 0.3275911, %v8135_v45 }
0x1172   :  { %v13931_v51 = vmul.f32 0.70710677, %v13925_v53  ;;  %v10189_v39 = vpop.f32.mrb[90].mxu1  ;;  %v8358_v24 = vsub.f32 0.0, %v8134_v57  ;;  %v8150_v63 = vmul.f32 0.3275911, %v8134_v57 }
0x1173   :  { %v8137_v60 = vand.u32 2147483647, %v13928_v56  ;;  %v8067_v34 = vpop.f32.mrb[91].mxu1  ;;  %v8375_v21 = vmul.f32 %v8359_v13, %v8135_v45  ;;  %v13943_v19 = vadd.f32 %v10189_v39, %v13897_v17  ;;  %v8167_v7 = vadd.f32 1.0, %v8151_v36 }
0x1174   :  { %v8136_v41 = vand.u32 2147483647, %v13931_v51  ;;  %v8374_v14 = vmul.f32 %v8358_v24, %v8134_v57  ;;  %v13946_v50 = vadd.f32 %v8067_v34, %v13897_v17  ;;  %v8166_v28 = vadd.f32 1.0, %v8150_v63 }
0x1175   :  { %v8361_v35 = vsub.f32 0.0, %v8137_v60  ;;  %v8394_v16 = vmul.f32 1.442695, %v8375_v21  ;;  %v8153_v20 = vmul.f32 0.3275911, %v8137_v60  ;;  %11420 = vrcp.f32 %v8167_v7 }
0x1176   :  { %v10192_v15 = vpop.f32.mrb[92].mxu1  ;;  %v8360_v26 = vsub.f32 0.0, %v8136_v41  ;;  %v13949_v23 = vmul.f32 0.70710677, %v13943_v19  ;;  %v8152_v45 = vmul.f32 0.3275911, %v8136_v41  ;;  %11422 = vrcp.f32 %v8166_v28 }
0x1177   :  { %v13935_v5 = vpop.eup %11412  ;;  %v8077_v11 = vpop.f32.mrb[93].mxu1  ;;  %v13953_v29 = vmul.f32 0.70710677, %v13946_v50  ;;  %v8392_v57 = vmul.f32 1.442695, %v8374_v14  ;;  %v8377_v13 = vmul.f32 %v8361_v35, %v8137_v60  ;;  %v13957_v10 = vadd.f32 %v10192_v15, %v13897_v17 }
0x1178   :  { %v8213_v37 = vmul.f32 1.0614054, %v13935_v5  ;;  %v8139_v49 = vand.u32 2147483647, %v13949_v23  ;;  %v8376_v42 = vmul.f32 %v8360_v26, %v8136_v41  ;;  %v13961_v34 = vadd.f32 %v8077_v11, %v13897_v17 }
0x1179   :  { %v8138_v24 = vand.u32 2147483647, %v13953_v29  ;;  %v8169_v21 = vadd.f32 1.0, %v8153_v20  ;;  %v13964_v36 = vmul.f32 0.70710677, %v13957_v10  ;;  %11424 = vpow2.f32 %v8394_v16 }
0x117a   :  { %v9159_v55 = vadd.f32 -1.4531521, %v8213_v37  ;;  %v10195_v62 = vpop.f32.mrb[94].mxu1  ;;  %v8155_v61 = vmul.f32 0.3275911, %v8139_v49  ;;  %v8168_v37 = vadd.f32 1.0, %v8152_v45  ;;  %11426 = vpow2.f32 %v8392_v57 }
0x117b   :  { %v8087_v47 = vpop.f32.mrb[95].mxu1  ;;  %v13968_v15 = vmul.f32 0.70710677, %v13961_v34  ;;  %v8398_v41 = vmul.f32 1.442695, %v8377_v13  ;;  %v8363_v14 = vsub.f32 0.0, %v8139_v49  ;;  %11428 = vrcp.f32 %v8169_v21 }
0x117c   :  { %v8245_v22 = vmul.f32 %v13935_v5, %v9159_v55  ;;  %v8141_v11 = vand.u32 2147483647, %v13964_v36  ;;  %v13971_v55 = vpop.eup %11414  ;;  %v8396_v7 = vmul.f32 1.442695, %v8376_v42  ;;  %v8362_v20 = vsub.f32 0.0, %v8138_v24 }
0x117d   :  { %v8171_v28 = vadd.f32 1.0, %v8155_v61  ;;  %v8154_v45 = vmul.f32 0.3275911, %v8138_v24  ;;  %v13978_v13 = vmul.f32 0.5, %v13908_v4  ;;  %11430 = vrcp.f32 %v8168_v37 }
0x117e   :  { %v8261_v39 = vadd.f32 1.4214138, %v8245_v22  ;;  %v10198_v63 = vpop.f32.mrb[96].mxu1  ;;  %v11417_v22 = vpop.eup %11416  ;;  %11432 = vpow2.f32 %v8398_v41  ;;  %v13988_v21 = vmul.f32 0.5, %v13921_v1  ;;  %v8379_v61 = vmul.f32 %v8363_v14, %v8139_v49 }
0x117f   :  { %v8097_v35 = vpop.f32.mrb[97].mxu1  ;;  %v13985_v42 = vpop.eup %11418  ;;  %11434 = vpow2.f32 %v8396_v7  ;;  %v8378_v4 = vmul.f32 %v8362_v20, %v8138_v24  ;;  %v8170_v8 = vadd.f32 1.0, %v8154_v45  ;;  %v8157_v2 = vmul.f32 0.3275911, %v8141_v11 }
0x1180   :  { %v8277_v60 = vmul.f32 %v13935_v5, %v8261_v39  ;;  %v8140_v39 = vand.u32 2147483647, %v13968_v15  ;;  %11436 = vrcp.f32 %v8171_v28  ;;  %v13995_v41 = vadd.f32 %v10195_v62, %v13897_v17  ;;  %v14000_v49 = vpop.eup %11420 }
0x1181   :  { %v13998_v1 = vadd.f32 %v8087_v47, %v13897_v17  ;;  %v8402_v14 = vmul.f32 1.442695, %v8379_v61  ;;  %v14006_v24 = vadd.f32 %v8097_v35, %v13897_v17  ;;  %v14008_v20 = vpop.eup %11422  ;;  %11438 = vrcp.f32 %v8170_v8 }
0x1182   :  { %v9175_v26 = vadd.f32 -0.28449672, %v8277_v60  ;;  %v13974_v18 = vpop.f32.mrb[98].mxu1  ;;  %v8365_v60 = vsub.f32 0.0, %v8141_v11  ;;  %v8364_v37 = vsub.f32 0.0, %v8140_v39  ;;  %14603 = vst [vmem:[#allocation61_spill] sm:$0xff] %v13995_v41 }
0x1183   :  { %v13983_v57 = vpop.f32.mrb[99].mxu1  ;;  %v8156_v43 = vmul.f32 0.3275911, %v8140_v39  ;;  %14605 = vst [vmem:[#allocation59_spill] sm:$0xff] %v14006_v24  ;;  %v14011_v62 = vmul.f32 0.70710677, %v13995_v41  ;;  %v14016_v28 = vpop.eup %11424  ;;  %11440 = vpow2.f32 %v8402_v14 }
0x1184   :  { %v8309_v16 = vmul.f32 %v13935_v5, %v9175_v26  ;;  %v13991_v26 = vmul.f32 0.5, %v13925_v53  ;;  %v8381_v7 = vmul.f32 %v8365_v60, %v8141_v11  ;;  %v14003_v53 = vadd.f32 %v10198_v63, %v13897_v17  ;;  %v14022_v45 = vpop.eup %11426 }
0x1185   :  { %v14014_v47 = vmul.f32 0.70710677, %v13998_v1  ;;  %v8173_v63 = vadd.f32 1.0, %v8157_v2  ;;  %v8380_v11 = vmul.f32 %v8364_v37, %v8140_v39  ;;  %v14026_v60 = vpop.eup %11428  ;;  %v14030_v2 = vmul.f32 0.70710677, %v14006_v24 }
0x1186   :  { %v8325_v6 = vadd.f32 0.2548296, %v8309_v16  ;;  %14604 = vst [vmem:[#allocation58_spill] sm:$0xff] %v14003_v53  ;;  %v14020_v35 = vmul.f32 0.70710677, %v14003_v53  ;;  %v14048_v53 = vmul.f32 0.5, %v13957_v10 }
0x1187   :  { %14606 = vst [vmem:[#allocation62_spill] sm:$0xff] %v14014_v47  ;;  %v8143_v16 = vand.u32 2147483647, %v14011_v62  ;;  %v8142_v61 = vand.u32 2147483647, %v14014_v47  ;;  %14608 = vst [vmem:[#allocation38_spill] sm:$0xff] %v14030_v2  ;;  %v14032_v39 = vpop.eup %11430 }
0x1188   :  { %v8341_v31 = vmul.f32 %v13935_v5, %v8325_v6  ;;  %v8400_v5 = vmul.f32 1.442695, %v8378_v4  ;;  %14607 = vst [vmem:[#allocation60_spill] sm:$0xff] %v14020_v35  ;;  %v8406_v4 = vmul.f32 1.442695, %v8381_v7  ;;  %14609 = vst [vmem:[#allocation37_spill] sm:$0xff] %v14048_v53 }
0x1189   :  { %v8145_v44 = vand.u32 2147483647, %v14020_v35  ;;  %v8159_v8 = vmul.f32 0.3275911, %v8143_v16  ;;  %v8367_v37 = vsub.f32 0.0, %v8143_v16  ;;  %v8366_v54 = vsub.f32 0.0, %v8142_v61 }
0x118a   :  { %v8421_v6 = vmul.f32 %v11417_v22, %v8341_v31  ;;  %v8172_v22 = vadd.f32 1.0, %v8156_v43  ;;  %11442 = vpow2.f32 %v8400_v5  ;;  %v14034_v43 = vpop.eup %11432  ;;  %v8404_v25 = vmul.f32 1.442695, %v8380_v11 }
0x118b   :  { %11444 = vrcp.f32 %v8173_v63  ;;  %v8144_v0 = vand.u32 2147483647, %v14030_v2  ;;  %v14037_v14 = vpop.eup %11434  ;;  %v8383_v40 = vmul.f32 %v8367_v37, %v8143_v16  ;;  %v8161_v27 = vmul.f32 0.3275911, %v8145_v44 }
0x118c   :  { %v8437_v31 = vsub.f32 1.0, %v8421_v6  ;;  %v8158_v6 = vmul.f32 0.3275911, %v8142_v61  ;;  %v8369_v38 = vsub.f32 0.0, %v8145_v44  ;;  %v14039_v58 = vpop.eup %11436  ;;  %v14042_v5 = vmul.f32 0.5, %v13943_v19 }
0x118d   :  { %11446 = vrcp.f32 %v8172_v22  ;;  %v8175_v3 = vadd.f32 1.0, %v8159_v8  ;;  %v8382_v59 = vmul.f32 %v8366_v54, %v8142_v61  ;;  %v14045_v63 = vmul.f32 0.5, %v13946_v50  ;;  %v14055_v61 = vpop.eup %11438 }
0x118e   :  { %v8469_v7 = vsub.f32 0.0, %v8437_v31  ;;  %11448 = vpow2.f32 %v8406_v4  ;;  %v8174_v11 = vadd.f32 1.0, %v8158_v6  ;;  %v8368_v32 = vsub.f32 0.0, %v8144_v0 }
0x118f   :  { %11450 = vpow2.f32 %v8404_v25  ;;  %v14051_v16 = vmul.f32 0.5, %v13961_v34  ;;  %v8410_v37 = vmul.f32 1.442695, %v8383_v40  ;;  %v8408_v22 = vmul.f32 1.442695, %v8382_v59 }
0x1190   :  { %v8485_v19 = vsel %vm8453_vm5, %v8437_v31, %v8469_v7  ;;  %v8177_v8 = vadd.f32 1.0, %v8161_v27  ;;  %v8385_v54 = vmul.f32 %v8369_v38, %v8145_v44  ;;  %11452 = vrcp.f32 %v8175_v3  ;;  %v14067_v27 = vpop.eup %11440 }
0x1191   :  { %v8160_v50 = vmul.f32 0.3275911, %v8144_v0  ;;  %v14059_v4 = vadd.f32 %v13974_v18, %v13897_v17  ;;  %v14063_v25 = vadd.f32 %v13983_v57, %v13897_v17  ;;  %11454 = vrcp.f32 %v8174_v11 }
0x1192   :  { %v8384_v40 = vmul.f32 %v8368_v32, %v8144_v0  ;;  %v8212_v30 = vmul.f32 1.0614054, %v13971_v55  ;;  %v8214_v59 = vmul.f32 1.0614054, %v14008_v20  ;;  %v8517_v38 = vadd.f32 1.0, %v8485_v19 }
0x1193   :  { %14610 = vst [vmem:[#allocation40_spill] sm:$0xff] %v14059_v4  ;;  %14611 = vst [vmem:[#allocation39_spill] sm:$0xff] %v14063_v25  ;;  %11456 = vpow2.f32 %v8410_v37  ;;  %v14070_v3 = vmul.f32 0.70710677, %v14059_v4  ;;  %v14073_v44 = vmul.f32 0.70710677, %v14063_v25 }
0x1194   :  { %v14075_v18 = vpop.eup %11442  ;;  %11458 = vpow2.f32 %v8408_v22  ;;  %v8414_v17 = vmul.f32 1.442695, %v8385_v54  ;;  %v9158_v10 = vadd.f32 -1.4531521, %v8212_v30  ;;  %v9160_v32 = vadd.f32 -1.4531521, %v8214_v59 }
0x1195   :  { %14612 = vst [vmem:[#allocation44_spill] sm:$0xff] %v14070_v3  ;;  %14613 = vst [vmem:[#allocation43_spill] sm:$0xff] %v14073_v44  ;;  %v14077_v0 = vpop.eup %11444  ;;  %11460 = vrcp.f32 %v8177_v8  ;;  %v8176_v34 = vadd.f32 1.0, %v8160_v50  ;;  %v8147_v57 = vand.u32 2147483647, %v14070_v3  ;;  %vm8457_vm9 = vcmp.ge.f32.partialorder %v13928_v56, 0.0 }
0x1196   :  { %v8146_v31 = vand.u32 2147483647, %v14073_v44  ;;  %v8412_v6 = vmul.f32 1.442695, %v8384_v40  ;;  %v8244_v7 = vmul.f32 %v13971_v55, %v9158_v10  ;;  %v8246_v11 = vmul.f32 %v14008_v20, %v9160_v32 }
0x1197   :  { %v8215_v37 = vmul.f32 1.0614054, %v14000_v49  ;;  %v14084_v19 = vpop.eup %11446  ;;  %v8163_v22 = vmul.f32 0.3275911, %v8147_v57  ;;  %v8371_v54 = vsub.f32 0.0, %v8147_v57  ;;  %11462 = vpow2.f32 %v8414_v17 }
0x1198   :  { %v8162_v30 = vmul.f32 0.3275911, %v8146_v31  ;;  %v8370_v59 = vsub.f32 0.0, %v8146_v31  ;;  %v14086_v4 = vpop.eup %11448  ;;  %v8260_v8 = vadd.f32 1.4214138, %v8244_v7  ;;  %v14091_v40 = vmul.f32 0.5, %v13998_v1 }
0x1199   :  { %v8262_v50 = vadd.f32 1.4214138, %v8246_v11  ;;  %v9161_v3 = vadd.f32 -1.4531521, %v8215_v37  ;;  %v14088_v25 = vpop.eup %11450  ;;  %11464 = vrcp.f32 %v8176_v34  ;;  %v8179_v10 = vadd.f32 1.0, %v8163_v22 }
0x119a   :  { %14614 = vst [vmem:[#allocation42_spill] sm:$0xff] %v14091_v40  ;;  %v8386_v32 = vmul.f32 %v8370_v59, %v8146_v31  ;;  %v8276_v44 = vmul.f32 %v13971_v55, %v8260_v8  ;;  %v8216_v2 = vmul.f32 1.0614054, %v14032_v39  ;;  %v14097_v17 = vpop.eup %11452  ;;  %v14100_v7 = vmul.f32 %v8517_v38, %v13937_v33 }
0x119b   :  { %v8278_v24 = vmul.f32 %v14008_v20, %v8262_v50  ;;  %v8247_v35 = vmul.f32 %v14000_v49, %v9161_v3  ;;  %11466 = vpow2.f32 %v8412_v6  ;;  %v8178_v11 = vadd.f32 1.0, %v8162_v30  ;;  %v14103_v34 = vpop.eup %11454 }
0x119c   :  { %v8217_v1 = vmul.f32 1.0614054, %v14026_v60  ;;  %v14105_v31 = vmul.f32 %v8371_v54, %v8147_v57  ;;  %v9174_v37 = vadd.f32 -0.28449672, %v8276_v44  ;;  %11468 = vrcp.f32 %v8179_v10 }
0x119d   :  { %v9176_v22 = vadd.f32 -0.28449672, %v8278_v24  ;;  %v8263_v59 = vadd.f32 1.4214138, %v8247_v35  ;;  %v14107_v8 = vpop.eup %11456  ;;  %v9162_v3 = vadd.f32 -1.4531521, %v8216_v2  ;;  %11470 = vrcp.f32 %v8178_v11 }
0x119e   :  { %v9163_v50 = vadd.f32 -1.4531521, %v8217_v1  ;;  %v8218_v40 = vmul.f32 1.0614054, %v14055_v61  ;;  %v14110_v33 = vpop.eup %11458  ;;  %v14112_v38 = vmul.f32 1.442695, %v8386_v32  ;;  %v8308_v6 = vmul.f32 %v13971_v55, %v9174_v37 }
0x119f   :  { %v8310_v30 = vmul.f32 %v14008_v20, %v9176_v22  ;;  %v8279_v57 = vmul.f32 %v14000_v49, %v8263_v59  ;;  %v14117_v44 = vpop.eup %11460  ;;  %v8248_v24 = vmul.f32 %v14032_v39, %v9162_v3  ;;  %v8219_v54 = vmul.f32 1.0614054, %v14039_v58 }
0x11a0   :  { %v8249_v35 = vmul.f32 %v14026_v60, %v9163_v50  ;;  %v9164_v2 = vadd.f32 -1.4531521, %v8218_v40  ;;  %v8324_v10 = vadd.f32 0.2548296, %v8308_v6  ;;  %v8220_v50 = vmul.f32 1.0614054, %v14084_v19 }
0x11a1   :  { %v8326_v1 = vadd.f32 0.2548296, %v8310_v30  ;;  %v9177_v32 = vadd.f32 -0.28449672, %v8279_v57  ;;  %v8264_v37 = vadd.f32 1.4214138, %v8248_v24  ;;  %v14125_v53 = vpop.eup %11462  ;;  %11472 = vpow2.f32 %v14112_v38 }
0x11a2   :  { %v8265_v22 = vadd.f32 1.4214138, %v8249_v35  ;;  %v8250_v59 = vmul.f32 %v14055_v61, %v9164_v2  ;;  %v9165_v41 = vadd.f32 -1.4531521, %v8219_v54  ;;  %14615 = vst [vmem:[#allocation41_spill] sm:$0xff] %v14125_v53  ;;  %v8340_v3 = vmul.f32 %v13971_v55, %v8324_v10 }
0x11a3   :  { %v8342_v40 = vmul.f32 %v14008_v20, %v8326_v1  ;;  %v8311_v11 = vmul.f32 %v14000_v49, %v9177_v32  ;;  %v14131_v6 = vpop.eup %11464  ;;  %v8280_v30 = vmul.f32 %v14032_v39, %v8264_v37  ;;  %v9166_v10 = vadd.f32 -1.4531521, %v8220_v50 }
0x11a4   :  { %v8281_v57 = vmul.f32 %v14026_v60, %v8265_v22  ;;  %v8266_v24 = vadd.f32 1.4214138, %v8250_v59  ;;  %v8251_v35 = vmul.f32 %v14039_v58, %v9165_v41  ;;  %v8420_v2 = vmul.f32 %v13985_v42, %v8340_v3 }
0x11a5   :  { %v8422_v54 = vmul.f32 %v14022_v45, %v8342_v40  ;;  %v8327_v55 = vadd.f32 0.2548296, %v8311_v11  ;;  %v14138_v20 = vpop.eup %11466  ;;  %v9178_v1 = vadd.f32 -0.28449672, %v8280_v30  ;;  %v8252_v41 = vmul.f32 %v14084_v19, %v9166_v10 }
0x11a6   :  { %v9179_v32 = vadd.f32 -0.28449672, %v8281_v57  ;;  %v8282_v53 = vmul.f32 %v14055_v61, %v8266_v24  ;;  %v8267_v37 = vadd.f32 1.4214138, %v8251_v35  ;;  %v8436_v47 = vsub.f32 1.0, %v8420_v2  ;;  %v14144_v42 = vpop.eup %11468 }
0x11a7   :  { %v8438_v22 = vsub.f32 1.0, %v8422_v54  ;;  %v8343_v59 = vmul.f32 %v14000_v49, %v8327_v55  ;;  %v8312_v45 = vmul.f32 %v14032_v39, %v9178_v1  ;;  %v8268_v24 = vadd.f32 1.4214138, %v8252_v41  ;;  %v14151_v55 = vpop.eup %11470 }
0x11a8   :  { %v8313_v3 = vmul.f32 %v14026_v60, %v9179_v32  ;;  %v9180_v40 = vadd.f32 -0.28449672, %v8282_v53  ;;  %v8283_v11 = vmul.f32 %v14039_v58, %v8267_v37  ;;  %v8468_v50 = vsub.f32 0.0, %v8436_v47 }
0x11a9   :  { %v8470_v30 = vsub.f32 0.0, %v8438_v22  ;;  %v8423_v57 = vmul.f32 %v14016_v28, %v8343_v59  ;;  %v8328_v35 = vadd.f32 0.2548296, %v8312_v45  ;;  %vm8456_vm10 = vcmp.ge.f32.partialorder %v13931_v51, 0.0 }
0x11aa   :  { %v8329_v2 = vadd.f32 0.2548296, %v8313_v3  ;;  %v8314_v49 = vmul.f32 %v14055_v61, %v9180_v40  ;;  %v9181_v54 = vadd.f32 -0.28449672, %v8283_v11  ;;  %v8484_v53 = vsel %vm8452_vm6, %v8436_v47, %v8468_v50 }
0x11ab   :  { %v8486_v10 = vsel %vm8454_vm7, %v8438_v22, %v8470_v30  ;;  %v8439_v1 = vsub.f32 1.0, %v8423_v57  ;;  %v8284_v28 = vmul.f32 %v14084_v19, %v8268_v24  ;;  %v8516_v32 = vadd.f32 1.0, %v8484_v53 }
0x11ac   :  { %v8518_v37 = vadd.f32 1.0, %v8486_v10  ;;  %v8344_v59 = vmul.f32 %v14032_v39, %v8328_v35  ;;  %v8345_v41 = vmul.f32 %v14026_v60, %v8329_v2  ;;  %v8330_v3 = vadd.f32 0.2548296, %v8314_v49 }
0x11ad   :  { %v8471_v45 = vsub.f32 0.0, %v8439_v1  ;;  %v8315_v40 = vmul.f32 %v14039_v58, %v9181_v54  ;;  %v9182_v11 = vadd.f32 -0.28449672, %v8284_v28  ;;  %vm8458_vm11 = vcmp.ge.f32.partialorder %v13953_v29, 0.0 }
0x11ae   :  { %v8532_v12 = vmul.f32 %v8516_v32, %v13940_v46  ;;  %v8534_v52 = vmul.f32 %v8518_v37, %v13981_v48  ;;  %v8424_v47 = vmul.f32 %v14037_v14, %v8344_v59  ;;  %v8425_v22 = vmul.f32 %v14034_v43, %v8345_v41 }
0x11af   :  { %v8487_v39 = vsel %vm8455_vm8, %v8439_v1, %v8471_v45  ;;  %v8346_v60 = vmul.f32 %v14055_v61, %v8330_v3  ;;  %v8331_v50 = vadd.f32 0.2548296, %v8315_v40  ;;  %v8316_v30 = vmul.f32 %v14084_v19, %v9182_v11 }
0x11b0   :  { %vm8459_vm12 = vcmp.ge.f32.partialorder %v13949_v23, 0.0  ;;  %10234 = vmatprep.mubr.f32.mxu0 %v8532_v12  ;;  %v8519_v57 = vadd.f32 1.0, %v8487_v39  ;;  %v8440_v24 = vsub.f32 1.0, %v8424_v47  ;;  %v8441_v46 = vsub.f32 1.0, %v8425_v22 }
0x11b1   :  { %v8221_v48 = vmul.f32 1.0614054, %v14077_v0  ;;  %10235 = vmatmul.mubr.f32.vlgmr.msra.gmra.mrb[92].mxu0 %v14100_v7  ;;  %v8426_v43 = vmul.f32 %v14075_v18, %v8346_v60  ;;  %v8347_v9 = vmul.f32 %v14039_v58, %v8331_v50  ;;  %v8332_v14 = vadd.f32 0.2548296, %v8316_v30 }
0x11b2   :  { %v8222_v61 = vmul.f32 1.0614054, %v14103_v34  ;;  %10237 = vmatprep.mubr.f32.mxu0 %v8534_v52  ;;  %v8535_v35 = vmul.f32 %v8519_v57, %v13978_v13  ;;  %v8472_v2 = vsub.f32 0.0, %v8440_v24  ;;  %v8473_v49 = vsub.f32 0.0, %v8441_v46 }
0x11b3   :  { %v9167_v54 = vadd.f32 -1.4531521, %v8221_v48  ;;  %vm8460_vm13 = vcmp.ge.f32.partialorder %v13968_v15, 0.0  ;;  %v8442_v53 = vsub.f32 1.0, %v8426_v43  ;;  %v8427_v10 = vmul.f32 %v14067_v27, %v8347_v9 }
0x11b4   :  { %v8348_v7 = vmul.f32 %v14084_v19, %v8332_v14  ;;  %v9168_v1 = vadd.f32 -1.4531521, %v8222_v61  ;;  %v8488_v58 = vsel %vm8456_vm10, %v8440_v24, %v8472_v2  ;;  %v8489_v18 = vsel %vm8457_vm9, %v8441_v46, %v8473_v49 }
0x11b5   :  { %v8253_v28 = vmul.f32 %v14077_v0, %v9167_v54  ;;  %v8223_v13 = vmul.f32 1.0614054, %v14097_v17  ;;  %10238 = vmatmul.mubr.f32.gmra.mrb[94].mxu0 %v8535_v35  ;;  %v8520_v32 = vadd.f32 1.0, %v8488_v58  ;;  %v8521_v37 = vadd.f32 1.0, %v8489_v18 }
0x11b6   :  { %v8474_v59 = vsub.f32 0.0, %v8442_v53  ;;  %v8443_v41 = vsub.f32 1.0, %v8427_v10  ;;  %v8428_v27 = vmul.f32 %v14088_v25, %v8348_v7  ;;  %v8254_v19 = vmul.f32 %v14103_v34, %v9168_v1 }
0x11b7   :  { %v8269_v45 = vadd.f32 1.4214138, %v8253_v28  ;;  %v9169_v3 = vadd.f32 -1.4531521, %v8223_v13  ;;  %v8536_v51 = vmul.f32 %v8520_v32, %v13991_v26  ;;  %v8537_v56 = vmul.f32 %v8521_v37, %v13988_v21 }
0x11b8   :  { %v8490_v40 = vsel %vm8458_vm11, %v8442_v53, %v8474_v59  ;;  %v8475_v11 = vsub.f32 0.0, %v8443_v41  ;;  %v8444_v52 = vsub.f32 1.0, %v8428_v27  ;;  %v8270_v22 = vadd.f32 1.4214138, %v8254_v19 }
0x11b9   :  { %v8522_v12 = vadd.f32 1.0, %v8490_v40  ;;  %v8285_v47 = vmul.f32 %v14077_v0, %v8269_v45  ;;  %10240 = vmatprep.mubr.f32.mxu0 %v8536_v51  ;;  %v8255_v39 = vmul.f32 %v14097_v17, %v9169_v3  ;;  %v8224_v60 = vmul.f32 1.0614054, %v14131_v6 }
0x11ba   :  { %v8491_v25 = vsel %vm8459_vm12, %v8443_v41, %v8475_v11  ;;  %v8225_v26 = vmul.f32 1.0614054, %v14117_v44  ;;  %10241 = vmatmul.mubr.f32.gmra.mrb[96].mxu0 %v8537_v56  ;;  %v8476_v50 = vsub.f32 0.0, %v8444_v52  ;;  %v8286_v57 = vmul.f32 %v14103_v34, %v8270_v22 }
0x11bb   :  { %v8538_v29 = vmul.f32 %v8522_v12, %v14045_v63  ;;  %v8523_v21 = vadd.f32 1.0, %v8491_v25  ;;  %v9183_v30 = vadd.f32 -0.28449672, %v8285_v47  ;;  %v8271_v24 = vadd.f32 1.4214138, %v8255_v39 }
0x11bc   :  { %v9170_v46 = vadd.f32 -1.4531521, %v8224_v60  ;;  %v9171_v48 = vadd.f32 -1.4531521, %v8225_v26  ;;  %v8492_v43 = vsel %vm8460_vm13, %v8444_v52, %v8476_v50  ;;  %v8226_v14 = vmul.f32 1.0614054, %v14151_v55 }
0x11bd   :  { %10243 = vmatprep.mubr.f32.mxu0 %v8538_v29  ;;  %v8539_v23 = vmul.f32 %v8523_v21, %v14042_v5  ;;  %v8317_v9 = vmul.f32 %v14077_v0, %v9183_v30  ;;  %v8524_v61 = vadd.f32 1.0, %v8492_v43  ;;  %v9184_v63 = vadd.f32 -0.28449672, %v8286_v57 }
0x11be   :  { %v8287_v35 = vmul.f32 %v14097_v17, %v8271_v24  ;;  %v8256_v2 = vmul.f32 %v14131_v6, %v9170_v46  ;;  %v8257_v54 = vmul.f32 %v14117_v44, %v9171_v48  ;;  %v9172_v53 = vadd.f32 -1.4531521, %v8226_v14  ;;  %v14616_v24 = vld [vmem:[#allocation62_spill] sm:$0xff] }
0x11bf   :  { %10244 = vmatmul.mubr.f32.gmra.mrb[98].mxu0 %v8539_v23  ;;  %v8333_v49 = vadd.f32 0.2548296, %v8317_v9  ;;  %v8227_v5 = vmul.f32 1.0614054, %v14144_v42  ;;  %vm8461_vm14 = vcmp.ge.f32.partialorder %v13964_v36, 0.0  ;;  %v8540_v15 = vmul.f32 %v8524_v61, %v14051_v16  ;;  %v14617_v23 = vld [vmem:[#allocation37_spill] sm:$0xff] }
0x11c0   :  { %v8318_v10 = vmul.f32 %v14103_v34, %v9184_v63  ;;  %v9185_v7 = vadd.f32 -0.28449672, %v8287_v35  ;;  %v8272_v1 = vadd.f32 1.4214138, %v8256_v2  ;;  %v8273_v18 = vadd.f32 1.4214138, %v8257_v54 }
0x11c1   :  { %v8349_v58 = vmul.f32 %v14077_v0, %v8333_v49  ;;  %v8258_v28 = vmul.f32 %v14151_v55, %v9172_v53  ;;  %v9173_v13 = vadd.f32 -1.4531521, %v8227_v5  ;;  %v8418_v32 = vmul.f32 1.442695, %v14105_v31  ;;  %10246 = vmatprep.mubr.f32.mxu0 %v8540_v15  ;;  %v14618_v63 = vld [vmem:[#allocation41_spill] sm:$0xff]  ;;  %v14620_v15 = vld [vmem:[#allocation42_spill] sm:$0xff] }
0x11c2   :  { %v8334_v37 = vadd.f32 0.2548296, %v8318_v10  ;;  %v8319_v59 = vmul.f32 %v14097_v17, %v9185_v7  ;;  %v8288_v41 = vmul.f32 %v14131_v6, %v8272_v1  ;;  %v8289_v27 = vmul.f32 %v14117_v44, %v8273_v18  ;;  %v14619_v54 = vld [vmem:[#allocation61_spill] sm:$0xff] }
0x11c3   :  { %v8429_v16 = vmul.f32 %v14086_v4, %v8349_v58  ;;  %v8274_v45 = vadd.f32 1.4214138, %v8258_v28  ;;  %v8259_v19 = vmul.f32 %v14144_v42, %v9173_v13  ;;  %11474 = vpow2.f32 %v8418_v32  ;;  %v14621_v13 = vld [vmem:[#allocation38_spill] sm:$0xff] }
0x11c4   :  { %v8350_v0 = vmul.f32 %v14103_v34, %v8334_v37  ;;  %v8335_v3 = vadd.f32 0.2548296, %v8319_v59  ;;  %v9186_v51 = vadd.f32 -0.28449672, %v8288_v41  ;;  %v9187_v56 = vadd.f32 -0.28449672, %v8289_v27 }
0x11c5   :  { %v8445_v31 = vsub.f32 1.0, %v8429_v16  ;;  %v8290_v40 = vmul.f32 %v14151_v55, %v8274_v45  ;;  %v8275_v11 = vadd.f32 1.4214138, %v8259_v19  ;;  %vm8463_vm15 = vcmp.ge.f32.partialorder %v14011_v62, 0.0  ;;  %v14622_v59 = vld [vmem:[#allocation60_spill] sm:$0xff]  ;;  %v14623_v16 = vld [vmem:[#allocation59_spill] sm:$0xff] }
0x11c6   :  { %v8430_v12 = vmul.f32 %v14110_v33, %v8350_v0  ;;  %v8351_v4 = vmul.f32 %v14097_v17, %v8335_v3  ;;  %v8320_v52 = vmul.f32 %v14131_v6, %v9186_v51  ;;  %v8321_v22 = vmul.f32 %v14117_v44, %v9187_v56  ;;  %v14624_v3 = vld [vmem:[#allocation58_spill] sm:$0xff] }
0x11c7   :  { %v8477_v47 = vsub.f32 0.0, %v8445_v31  ;;  %v9188_v38 = vadd.f32 -0.28449672, %v8290_v40  ;;  %v8291_v34 = vmul.f32 %v14144_v42, %v8275_v11  ;;  %vm8462_vm1 = vcmp.ge.f32.partialorder %v14616_v24, 0.0 }
0x11c8   :  { %v8446_v25 = vsub.f32 1.0, %v8430_v12  ;;  %v8431_v39 = vmul.f32 %v14107_v8, %v8351_v4  ;;  %v8336_v60 = vadd.f32 0.2548296, %v8320_v52  ;;  %v8337_v33 = vadd.f32 0.2548296, %v8321_v22  ;;  %v14626_v12 = vld [vmem:[#allocation39_spill] sm:$0xff] }
0x11c9   :  { %v8493_v26 = vsel %vm8461_vm14, %v8445_v31, %v8477_v47  ;;  %v8322_v17 = vmul.f32 %v14151_v55, %v9188_v38  ;;  %v9189_v29 = vadd.f32 -0.28449672, %v8291_v34  ;;  %v8511_v53 = vmul.f32 0.5, %v14619_v54  ;;  %v14625_v31 = vld [vmem:[#allocation43_spill] sm:$0xff]  ;;  %v14627_v38 = vld [vmem:[#allocation44_spill] sm:$0xff] }
0x11ca   :  { %v8525_v21 = vadd.f32 1.0, %v8493_v26  ;;  %v8478_v50 = vsub.f32 0.0, %v8446_v25  ;;  %v8447_v30 = vsub.f32 1.0, %v8431_v39  ;;  %v8352_v57 = vmul.f32 %v14131_v6, %v8336_v60  ;;  %v11473_v6 = vpop.eup %11472  ;;  %v14628_v39 = vld [vmem:[#allocation40_spill] sm:$0xff] }
0x11cb   :  { %v8353_v46 = vmul.f32 %v14117_v44, %v8337_v33  ;;  %v8338_v48 = vadd.f32 0.2548296, %v8322_v17  ;;  %v8323_v8 = vmul.f32 %v14144_v42, %v9189_v29  ;;  %vm8464_vm2 = vcmp.ge.f32.partialorder %v14621_v13, 0.0  ;;  %v8729_v17 = vld [vmem:[%s14405_s2] sm:$0xff] }
0x11cc   :  { %v8541_v43 = vmul.f32 %v8525_v21, %v14617_v23  ;;  %v8494_v36 = vsel %vm8462_vm1, %v8446_v25, %v8478_v50  ;;  %v8479_v9 = vsub.f32 0.0, %v8447_v30  ;;  %v8432_v14 = vmul.f32 %v14138_v20, %v8352_v57  ;;  %10290 = vmatprep.mubr.f32.mxu1 %v8729_v17  ;;  %v14629_v29 = vld [vmem:[#allocation25_spill] sm:$0xff]  ;;  %v11477_v50 = vld [vmem:[#allocation6] sm:$0xf] }
0x11cd   :  { %v8526_v61 = vadd.f32 1.0, %v8494_v36  ;;  %v8433_v35 = vmul.f32 %v14618_v63, %v8353_v46  ;;  %v8354_v2 = vmul.f32 %v14151_v55, %v8338_v48  ;;  %v8339_v49 = vadd.f32 0.2548296, %v8323_v8  ;;  %v11475_v20 = vpop.eup %11474  ;;  %v14630_v8 = vld [vmem:[#allocation27_spill] sm:$0xff] }
0x11ce   :  { %10247 = vmatmul.mubr.f32.gmra.mrb[100].mxu0 %v8541_v43  ;;  %v8495_v44 = vsel %vm8463_vm15, %v8447_v30, %v8479_v9  ;;  %v8448_v5 = vsub.f32 1.0, %v8432_v14  ;;  %vm8465_vm3 = vcmp.ge.f32.partialorder %v14622_v59, 0.0  ;;  %v8512_v27 = vmul.f32 0.5, %v14623_v16  ;;  %v14631_v43 = vld [vmem:[#allocation30_spill] sm:$0xff] }
0x11cf   :  { %v8542_v10 = vmul.f32 %v8526_v61, %v14620_v15  ;;  %v8527_v7 = vadd.f32 1.0, %v8495_v44  ;;  %v8449_v1 = vsub.f32 1.0, %v8433_v35  ;;  %v8434_v58 = vmul.f32 %v11473_v6, %v8354_v2  ;;  %v14632_v2 = vld [vmem:[#allocation26_spill] sm:$0xff]  ;;  %v14633_v6 = vld [vmem:[#allocation28_spill] sm:$0xff] }
0x11d0   :  { %v8480_v18 = vsub.f32 0.0, %v8448_v5  ;;  %v8355_v28 = vmul.f32 %v14144_v42, %v8339_v49  ;;  %v8513_v51 = vmul.f32 0.5, %v14624_v3  ;;  %vm8466_vm4 = vcmp.ge.f32.partialorder %v14625_v31, 0.0  ;;  %v14638_v3 = vld [vmem:[#allocation32_spill] sm:$0xff]  ;;  %v14639_v31 = vld [vmem:[#allocation34_spill] sm:$0xff] }
0x11d1   :  { %10249 = vmatprep.mubr.f32.mxu0 %v8542_v10  ;;  %v8543_v55 = vmul.f32 %v8527_v7, %v8511_v53  ;;  %v8481_v32 = vsub.f32 0.0, %v8449_v1  ;;  %v8450_v37 = vsub.f32 1.0, %v8434_v58  ;;  %v8514_v4 = vmul.f32 0.5, %v14626_v12  ;;  %v14634_v7 = vld [vmem:[#allocation31_spill] sm:$0xff]  ;;  %v14635_v58 = vld [vmem:[#allocation33_spill] sm:$0xff] }
0x11d2   :  { %v8496_v62 = vsel %vm8464_vm2, %v8448_v5, %v8480_v18  ;;  %v8435_v41 = vmul.f32 %v11475_v20, %v8355_v28  ;;  %vm8467_vm5 = vcmp.ge.f32.partialorder %v14627_v38, 0.0  ;;  %v8515_v60 = vmul.f32 0.5, %v14628_v39 }
0x11d3   :  { %10250 = vmatmul.mubr.f32.gmra.mrb[102].mxu0 %v8543_v55  ;;  %v8528_v45 = vadd.f32 1.0, %v8496_v62  ;;  %v8497_v19 = vsel %vm8465_vm3, %v8449_v1, %v8481_v32  ;;  %v8482_v0 = vsub.f32 0.0, %v8450_v37  ;;  %v8566_v21 = vsub.s32 3, %v14629_v29  ;;  %v14637_v62 = vld [vmem:[#allocation35_spill] sm:$0xff]  ;;  %v14643_v29 = vld [vmem:[#allocation53_spill] sm:$0xff] }
0x11d4   :  { %v8529_v42 = vadd.f32 1.0, %v8497_v19  ;;  %v8451_v56 = vsub.f32 1.0, %v8435_v41 }
0x11d5   :  { %v8544_v40 = vmul.f32 %v8528_v45, %v8512_v27  ;;  %v8498_v11 = vsel %vm8466_vm4, %v8450_v37, %v8482_v0  ;;  %v14260_v30 = vrot.slane %v11477_v50, %v8566_v21  ;;  %v14636_v37 = vld [vmem:[#allocation29_spill] sm:$0xff] }
0x11d6   :  { %v8545_v52 = vmul.f32 %v8529_v42, %v8513_v51  ;;  %v8530_v47 = vadd.f32 1.0, %v8498_v11  ;;  %v8483_v22 = vsub.f32 0.0, %v8451_v56 }
0x11d7   :  { %10252 = vmatprep.mubr.f32.mxu0 %v8544_v40 }
0x11d8   :  { %10253 = vmatmul.mubr.f32.gmra.mrb[104].mxu0 %v8545_v52  ;;  %v8546_v34 = vmul.f32 %v8530_v47, %v8514_v4  ;;  %v8499_v25 = vsel %vm8467_vm5, %v8451_v56, %v8483_v22  ;;  %v14640_v52 = vld [vmem:[#allocation36_spill] sm:$0xff]  ;;  %v14641_v22 = vld [vmem:[#allocation54_spill] sm:$0xff] }
0x11d9   :  { %v8531_v26 = vadd.f32 1.0, %v8499_v25 }
0x11da   :  { %10255 = vmatprep.mubr.f32.mxu0 %v8546_v34 }
0x11db   :  { %v8547_v33 = vmul.f32 %v8531_v26, %v8515_v60 }
0x11dd   :  { %10256 = vmatmul.mubr.f32.gmra.mrb[106].mxu0 %v8547_v33  ;;  %v14642_v33 = vld [vmem:[#allocation55_spill] sm:$0xff] }
0x1284   :  { %v10236_v57 = vpop.f32.mrb[92].mxu0 }
0x1285   :  { %v8640_v24 = vadd.f32 %v10236_v57, %v14260_v30  ;;  %v8634_v46 = vpop.f32.mrb[93].mxu0 }
0x1286   :  { %v8635_v48 = vadd.f32 %v8634_v46, %v14260_v30 }
0x1287   :  { %v8714_v23 = vadd.f32 %v8640_v24, %v14630_v8  ;;  %v14644_v8 = vld [vmem:[#allocation57_spill] sm:$0xff] }
0x1288   :  { %v8713_v36 = vadd.f32 %v8635_v48, %v14631_v43  ;;  %v10239_v9 = vpop.f32.mrb[94].mxu0  ;;  %v14645_v43 = vld [vmem:[#allocation56_spill] sm:$0xff] }
0x1289   :  { %v8650_v14 = vadd.f32 %v10239_v9, %v14260_v30  ;;  %v8644_v61 = vpop.f32.mrb[95].mxu0 }
0x128a   :  { %v10722_v63 = vpack.c.bf16 %v8714_v23, %v8713_v36  ;;  %v8645_v35 = vadd.f32 %v8644_v61, %v14260_v30  ;;  %v8731_v61 = vld [vmem:[%s14405_s2 + $0x10] sm:$0xff] }
0x128b   :  { %v8716_v49 = vadd.f32 %v8650_v14, %v14632_v2  ;;  %v8730_v14 = vld [vmem:[%s14405_s2 + $0x8] sm:$0xff]  ;;  %v8735_v2 = vld [vmem:[%s14405_s2 + $0x30] sm:$0xff] }
0x128c   :  { %10723 = vmatprep.subr.bf16.mxu1 %v10722_v63  ;;  %v8715_v54 = vadd.f32 %v8645_v35, %v14633_v6  ;;  %v8734_v35 = vld [vmem:[%s14405_s2 + $0x28] sm:$0xff]  ;;  %v8737_v6 = vld [vmem:[%s14405_s2 + $0x40] sm:$0xff] }
0x128d   :  { %10725 = vmatpush3.bf16.msra.mxu1 %v10722_v63  ;;  %v10242_v53 = vpop.f32.mrb[96].mxu0  ;;  %v8733_v63 = vld [vmem:[%s14405_s2 + $0x20] sm:$0xff] }
0x128e   :  { %v8660_v44 = vadd.f32 %v10242_v53, %v14260_v30  ;;  %v8654_v5 = vpop.f32.mrb[97].mxu0  ;;  %v10726_v15 = vpack.c.bf16 %v8716_v49, %v8715_v54  ;;  %v8736_v49 = vld [vmem:[%s14405_s2 + $0x38] sm:$0xff]  ;;  %v8738_v54 = vld [vmem:[%s14405_s2 + $0x48] sm:$0xff]  ;;  %v8739_v53 = vld [vmem:[%s14405_s2 + $0x50] sm:$0xff] }
0x128f   :  { %v8655_v10 = vadd.f32 %v8654_v5, %v14260_v30  ;;  %v8741_v5 = vld [vmem:[%s14405_s2 + $0x60] sm:$0xff] }
0x1290   :  { %v8718_v1 = vadd.f32 %v8660_v44, %v14634_v7  ;;  %10727 = vmatprep.subr.bf16.mxu1 %v10726_v15  ;;  %v8740_v44 = vld [vmem:[%s14405_s2 + $0x58] sm:$0xff] }
0x1291   :  { %v8717_v20 = vadd.f32 %v8655_v10, %v14635_v58  ;;  %10729 = vmatpush3.bf16.msra.mxu1 %v10726_v15  ;;  %v8742_v15 = vld [vmem:[%s14405_s2 + $0x68] sm:$0xff]  ;;  %v8743_v10 = vld [vmem:[%s14405_s2 + $0x70] sm:$0xff]  ;;  %v8744_v7 = vld [vmem:[%s14405_s2 + $0x78] sm:$0xff] }
0x1292   :  { %v10245_v18 = vpop.f32.mrb[98].mxu0 }
0x1293   :  { %v8670_v28 = vadd.f32 %v10245_v18, %v14260_v30  ;;  %v8664_v13 = vpop.f32.mrb[99].mxu0  ;;  %v10730_v32 = vpack.c.bf16 %v8718_v1, %v8717_v20 }
0x1294   :  { %v8665_v55 = vadd.f32 %v8664_v13, %v14260_v30 }
0x1295   :  { %v8720_v59 = vadd.f32 %v8670_v28, %v14636_v37  ;;  %10731 = vmatprep.subr.bf16.mxu1 %v10730_v32 }
0x1296   :  { %v8719_v41 = vadd.f32 %v8665_v55, %v14637_v62  ;;  %10733 = vmatpush3.bf16.msra.mxu1 %v10730_v32 }
0x1298   :  { %v10734_v16 = vpack.c.bf16 %v8720_v59, %v8719_v41 }
0x129a   :  { %10735 = vmatprep.subr.bf16.mxu1 %v10734_v16 }
0x129b   :  { %10737 = vmatpush3.bf16.msra.mxu1 %v10734_v16 }
0x12a1   :  { %v10248_v27 = vpop.f32.mrb[100].mxu0 }
0x12a2   :  { %v8680_v45 = vadd.f32 %v10248_v27, %v14260_v30  ;;  %v8674_v19 = vpop.f32.mrb[101].mxu0 }
0x12a3   :  { %v8675_v0 = vadd.f32 %v8674_v19, %v14260_v30 }
0x12a4   :  { %v8722_v51 = vadd.f32 %v8680_v45, %v14638_v3 }
0x12a5   :  { %v8721_v42 = vadd.f32 %v8675_v0, %v14639_v31 }
0x12a6   :  { %v10251_v56 = vpop.f32.mrb[102].mxu0 }
0x12a7   :  { %v8690_v40 = vadd.f32 %v10251_v56, %v14260_v30  ;;  %v8684_v11 = vpop.f32.mrb[103].mxu0  ;;  %v10738_v12 = vpack.c.bf16 %v8722_v51, %v8721_v42 }
0x12a8   :  { %v8685_v4 = vadd.f32 %v8684_v11, %v14260_v30 }
0x12a9   :  { %v8724_v47 = vadd.f32 %v8690_v40, %v14640_v52  ;;  %10739 = vmatprep.subr.bf16.mxu1 %v10738_v12 }
0x12aa   :  { %v8723_v38 = vadd.f32 %v8685_v4, %v14641_v22  ;;  %10741 = vmatpush3.bf16.msra.mxu1 %v10738_v12 }
0x12ab   :  { %v10254_v34 = vpop.f32.mrb[104].mxu0 }
0x12ac   :  { %v8700_v25 = vadd.f32 %v10254_v34, %v14260_v30  ;;  %v8694_v39 = vpop.f32.mrb[105].mxu0  ;;  %v10742_v60 = vpack.c.bf16 %v8724_v47, %v8723_v38 }
0x12ad   :  { %v8695_v26 = vadd.f32 %v8694_v39, %v14260_v30 }
0x12ae   :  { %v8726_v17 = vadd.f32 %v8700_v25, %v14642_v33  ;;  %10743 = vmatprep.subr.bf16.mxu1 %v10742_v60 }
0x12af   :  { %v8725_v21 = vadd.f32 %v8695_v26, %v14643_v29  ;;  %10745 = vmatpush3.bf16.msra.mxu1 %v10742_v60 }
0x12b0   :  { %v10257_v50 = vpop.f32.mrb[106].mxu0 }
0x12b1   :  { %v8710_v57 = vadd.f32 %v10257_v50, %v14260_v30  ;;  %v8704_v24 = vpop.f32.mrb[107].mxu0  ;;  %v10746_v46 = vpack.c.bf16 %v8726_v17, %v8725_v21 }
0x12b2   :  { %v8705_v48 = vadd.f32 %v8704_v24, %v14260_v30  ;;  %v8732_v30 = vld [vmem:[%s14405_s2 + $0x18] sm:$0xff] }
0x12b3   :  { %v8728_v23 = vadd.f32 %v8710_v57, %v14644_v8  ;;  %10747 = vmatprep.subr.bf16.mxu1 %v10746_v46 }
0x12b4   :  { %v8727_v36 = vadd.f32 %v8705_v48, %v14645_v43  ;;  %10749 = vmatpush3.bf16.msra.mxu1 %v10746_v46 }
0x12b6   :  { %v10750_v9 = vpack.c.bf16 %v8728_v23, %v8727_v36 }
0x12b8   :  { %10751 = vmatprep.subr.bf16.mxu1 %v10750_v9 }
0x12b9   :  { %10753 = vmatpush3.bf16.msra.mxu1 %v10750_v9 }
0x12bc   :  { %10291 = vmatmul.mubr.f32.vlgmr.msra.gmra.mrb[100].mxu1 %v8730_v14 }
0x12bd   :  { %10293 = vmatprep.mubr.f32.mxu1 %v8731_v61 }
0x12c0   :  { %10294 = vmatmul.mubr.f32.gmra.mrb[102].mxu1 %v8732_v30 }
0x12c1   :  { %10296 = vmatprep.mubr.f32.mxu1 %v8733_v63 }
0x12c4   :  { %10297 = vmatmul.mubr.f32.gmra.mrb[104].mxu1 %v8734_v35 }
0x12c5   :  { %10299 = vmatprep.mubr.f32.mxu1 %v8735_v2 }
0x12c8   :  { %10300 = vmatmul.mubr.f32.gmra.mrb[106].mxu1 %v8736_v49 }
0x12c9   :  { %10302 = vmatprep.mubr.f32.mxu1 %v8737_v6 }
0x12cc   :  { %10303 = vmatmul.mubr.f32.gmra.mrb[108].mxu1 %v8738_v54 }
0x12cd   :  { %10305 = vmatprep.mubr.f32.mxu1 %v8739_v53 }
0x12d0   :  { %10306 = vmatmul.mubr.f32.gmra.mrb[110].mxu1 %v8740_v44 }
0x12d1   :  { %10308 = vmatprep.mubr.f32.mxu1 %v8741_v5 }
0x12d4   :  { %10309 = vmatmul.mubr.f32.gmra.mrb[112].mxu1 %v8742_v15 }
0x12d5   :  { %10311 = vmatprep.mubr.f32.mxu1 %v8743_v10 }
0x12d8   :  { %10312 = vmatmul.mubr.f32.gmra.mrb[114].mxu1 %v8744_v7 }
0x138f   :  { %v10292_v1 = vpop.f32.mrb[100].mxu1 }
0x1390   :  { %8891 = vst.msk [vmem:[%s14412_s9 + $0x8] sm:$0xff] %vm249_vm0, %v10292_v1  ;;  %v8811_v58 = vpop.f32.mrb[101].mxu1 }
0x1391   :  { %8890 = vst.msk [vmem:[%s14412_s9] sm:$0xff] %vm249_vm0, %v8811_v58 }
0x1393   :  { %v10295_v20 = vpop.f32.mrb[102].mxu1 }
0x1394   :  { %8893 = vst.msk [vmem:[%s14412_s9 + $0x18] sm:$0xff] %vm249_vm0, %v10295_v20  ;;  %v8821_v18 = vpop.f32.mrb[103].mxu1 }
0x1395   :  { %8892 = vst.msk [vmem:[%s14412_s9 + $0x10] sm:$0xff] %vm249_vm0, %v8821_v18 }
0x1397   :  { %v10298_v28 = vpop.f32.mrb[104].mxu1 }
0x1398   :  { %8895 = vst.msk [vmem:[%s14412_s9 + $0x28] sm:$0xff] %vm249_vm0, %v10298_v28  ;;  %v8831_v13 = vpop.f32.mrb[105].mxu1 }
0x1399   :  { %8894 = vst.msk [vmem:[%s14412_s9 + $0x20] sm:$0xff] %vm249_vm0, %v8831_v13 }
0x139b   :  { %v10301_v55 = vpop.f32.mrb[106].mxu1 }
0x139c   :  { %8897 = vst.msk [vmem:[%s14412_s9 + $0x38] sm:$0xff] %vm249_vm0, %v10301_v55  ;;  %v8841_v32 = vpop.f32.mrb[107].mxu1 }
0x139d   :  { %8896 = vst.msk [vmem:[%s14412_s9 + $0x30] sm:$0xff] %vm249_vm0, %v8841_v32 }
0x139f   :  { %v10304_v37 = vpop.f32.mrb[108].mxu1 }
0x13a0   :  { %8899 = vst.msk [vmem:[%s14412_s9 + $0x48] sm:$0xff] %vm249_vm0, %v10304_v37  ;;  %v8851_v59 = vpop.f32.mrb[109].mxu1 }
0x13a1   :  { %8898 = vst.msk [vmem:[%s14412_s9 + $0x40] sm:$0xff] %vm249_vm0, %v8851_v59 }
0x13a3   :  { %v10307_v62 = vpop.f32.mrb[110].mxu1 }
0x13a4   :  { %8901 = vst.msk [vmem:[%s14412_s9 + $0x58] sm:$0xff] %vm249_vm0, %v10307_v62  ;;  %v8861_v41 = vpop.f32.mrb[111].mxu1 }
0x13a5   :  { %8900 = vst.msk [vmem:[%s14412_s9 + $0x50] sm:$0xff] %vm249_vm0, %v8861_v41 }
0x13a7   :  { %v10310_v16 = vpop.f32.mrb[112].mxu1 }
0x13a8   :  { %8903 = vst.msk [vmem:[%s14412_s9 + $0x68] sm:$0xff] %vm249_vm0, %v10310_v16  ;;  %v8871_v27 = vpop.f32.mrb[113].mxu1 }
0x13a9   :  { %8902 = vst.msk [vmem:[%s14412_s9 + $0x60] sm:$0xff] %vm249_vm0, %v8871_v27 }
0x13ab   :  { %v10313_v45 = vpop.f32.mrb[114].mxu1 }
0x13ac   :  { %8905 = vst.msk [vmem:[%s14412_s9 + $0x78] sm:$0xff] %vm249_vm0, %v10313_v45  ;;  %v8881_v19 = vpop.f32.mrb[115].mxu1 }
0x13ad   :  { %8904 = vst.msk [vmem:[%s14412_s9 + $0x70] sm:$0xff] %vm249_vm0, %v8881_v19 }
0x13ae   :  { %8910 = vsyncpa [#allocation3], 1 }
0x13af   :  { %8911 = vsyncpa [#allocation5], 1 }

</bundles_post_ra>
